<compile_context>
chip_gen: v7x
topology: tpu7x:2x2x1
jax: 0.10.0
libtpu: 0.0.40
codegen_flags: <defaults>
</compile_context>

<pallas_src>
import functools
import math

import jax
import jax.numpy as jnp
from jax.experimental import pallas as pl
from jax.experimental.pallas import tpu as pltpu


_BLOCK_BYTES_BUDGET = 8 * 1024 * 1024      # per-buffer target for the log-prob tile
_VMEM_LIMIT_BYTES = 32 * 1024 * 1024       # 2x double-buffered 8 MiB + small refs, safe on v5e/v6e/v7x


def _label_smoothing_kl_kernel(output_ref, target_ref, rowloss_ref,
                               sum_acc, tgt_acc, pad_acc,
                               *, smoothing, confidence, padding_idx, plogp_const):
    j = pl.program_id(1)                     # vocab tile index (reduction axis, innermost)

    @pl.when(j == 0)
    def _():
        sum_acc[...] = jnp.zeros_like(sum_acc)
        tgt_acc[...] = jnp.zeros_like(tgt_acc)
        pad_acc[...] = jnp.zeros_like(pad_acc)

    out = output_ref[...]                    # (TB, TV) log-probs, native dtype (f32 or bf16)
    tgt = target_ref[...]                    # (TB, 1) int32
    tb, tv = out.shape

    # For f32 inputs force exact f32 matmul passes; bf16 inputs are MXU-native.
    prec = (jax.lax.Precision.HIGHEST if out.dtype == jnp.float32
            else jax.lax.Precision.DEFAULT)
    ones_col = jnp.ones((tv, 1), dtype=out.dtype)

    # (a) per-row sum of log-probs on the MXU (f32 accumulate); VPU stays free.
    sum_acc[...] += jnp.dot(out, ones_col, precision=prec,
                            preferred_element_type=jnp.float32)

    # (b) gather out[:, target]: tile-local iota compare (loop-invariant constant)
    #     + select, then reduce on the MXU.  This is the only per-element VPU work.
    col = jax.lax.broadcasted_iota(jnp.int32, (tb, tv), 1)
    tgt_local = tgt - j * tv                 # (TB, 1)
    masked = jnp.where(col == tgt_local, out, jnp.zeros((), out.dtype))
    tgt_acc[...] += jnp.dot(masked, ones_col, precision=prec,
                            preferred_element_type=jnp.float32)

    # (c) the static padding column: only the single vocab tile containing it pays.
    pad_tile = padding_idx // tv
    pad_local = padding_idx % tv

    @pl.when(j == pad_tile)
    def _():
        pad_col = jnp.where(col == pad_local, out, jnp.zeros((), out.dtype))
        pad_acc[...] = jnp.dot(pad_col, ones_col, precision=prec,
                               preferred_element_type=jnp.float32)

    @pl.when(j == pl.num_programs(1) - 1)
    def _():
        # KL per row:  sum_v p*log p  -  sum_v p*out
        cross = (smoothing * sum_acc[...]
                 + (confidence - smoothing) * tgt_acc[...]
                 - smoothing * pad_acc[...])
        row_kl = plogp_const - cross
        # Rows whose target is the padding index contribute nothing (per-row mask,
        # hoisted out of the per-element path).
        row_kl = jnp.where(tgt == padding_idx, 0.0, row_kl)
        rowloss_ref[...] = row_kl.astype(jnp.float32)


def _pick_tile_b(B):
    tb = None
    for c in (128, 64, 32, 16, 8):
        if B % c == 0:
            tb = c
            break
    if tb is None:
        return B                             # full-dim block (legal even if B % 8 != 0)
    # Ensure at least two batch tiles so the "parallel" axis can shard across the
    # two TensorCores on v7x (no-op on v5e/v6e).
    if B // tb < 2 and tb % 16 == 0:
        tb //= 2
    return tb


def _pick_tile_v(V, max_elems):
    max_elems = max(128, min(V, max_elems))
    if V <= max_elems:
        return V                             # full-dim block
    best = 0
    tv = 128
    while tv <= max_elems:                   # largest lane-aligned divisor within budget
        if V % tv == 0:
            best = tv
        tv += 128
    if best == 0:
        tv = 128
        while tv < V:                        # fall back: any lane-aligned divisor
            if V % tv == 0:
                best = tv
            tv += 128
        if best == 0:
            best = V
    return best


def label_smoothing_loss(output, target, *, label_smoothing, padding_idx,
                         tile_b=None, tile_v=None):
    """output: [B, V] log-probs (f32 or bf16), target: [B] int. Returns scalar loss."""
    B, V = output.shape
    assert 0.0 < label_smoothing <= 1.0
    assert V > 2
    assert 0 <= padding_idx < V, "padding_idx must be a valid (non-negative) vocab column"

    confidence = 1.0 - label_smoothing
    smoothing = label_smoothing / (V - 2)
    # sum_v p*log p for a non-pad row, computed once at trace time (0*log0 := 0).
    plogp = (V - 2) * smoothing * math.log(smoothing)
    if confidence > 0.0:
        plogp += confidence * math.log(confidence)

    target2d = target.reshape(B, 1).astype(jnp.int32)
    itemsize = jnp.dtype(output.dtype).itemsize

    # Tile sizes: sublane-aligned batch tile, lane-aligned vocab tile, sized by BYTES
    # so bf16 gets twice the elements of f32 for the same HBM/VMEM footprint.
    TB = tile_b if tile_b is not None else _pick_tile_b(B)
    TV = tile_v if tile_v is not None else _pick_tile_v(
        V, _BLOCK_BYTES_BUDGET // max(1, TB * itemsize))
    # Mosaic (8,128) rule: last two block dims divisible by (8,128) or equal full dims.
    assert B % TB == 0 and (TB % 8 == 0 or TB == B), (B, TB)
    assert V % TV == 0 and (TV % 128 == 0 or TV == V), (V, TV)
    nB, nV = B // TB, V // TV

    kernel = functools.partial(
        _label_smoothing_kl_kernel,
        smoothing=float(smoothing),
        confidence=float(confidence),
        padding_idx=int(padding_idx),
        plogp_const=float(plogp))

    row_losses = pl.pallas_call(
        kernel,
        out_shape=jax.ShapeDtypeStruct((B, 1), jnp.float32),
        grid_spec=pltpu.PrefetchScalarGridSpec(
            num_scalar_prefetch=0,
            grid=(nB, nV),                                   # vocab (reduction) axis last
            in_specs=[
                pl.BlockSpec((TB, TV), lambda i, j: (i, j)),  # log-probs, native dtype
                pl.BlockSpec((TB, 1), lambda i, j: (i, 0)),   # targets (resident per i)
            ],
            out_specs=pl.BlockSpec((TB, 1), lambda i, j: (i, 0)),
            scratch_shapes=[pltpu.VMEM((TB, 1), jnp.float32),   # rowsum acc
                            pltpu.VMEM((TB, 1), jnp.float32),   # out[target] acc
                            pltpu.VMEM((TB, 1), jnp.float32)],  # out[pad_col]
        ),
        compiler_params=pltpu.CompilerParams(
            dimension_semantics=("parallel", "arbitrary"),
            vmem_limit_bytes=_VMEM_LIMIT_BYTES),
    )(output, target2d)

    # Tiny cross-row reduction + normalization in the wrapper (per-row losses are free).
    return jnp.sum(row_losses) / jnp.float32(B)


def _reference_loss(output, target, *, label_smoothing, padding_idx):
    """Pure-JAX mirror of the PyTorch module (materializes model_prob explicitly)."""
    B, V = output.shape
    smoothing_value = label_smoothing / (V - 2)
    confidence = 1.0 - label_smoothing
    one_hot = jnp.full((V,), smoothing_value, dtype=jnp.float32).at[padding_idx].set(0.0)
    out = output.astype(jnp.float32)
    p = jnp.tile(one_hot[None, :], (B, 1))
    p = jnp.where(jnp.arange(V)[None, :] == target[:, None], confidence, p)
    p = jnp.where((target == padding_idx)[:, None], 0.0, p)
    safe_p = jnp.where(p > 0, p, 1.0)
    kl = jnp.where(p > 0, p * (jnp.log(safe_p) - out), 0.0)
    return jnp.sum(kl) / B


if __name__ == "__main__":
    # Module parameters (deterministic, in-script).
    label_smoothing = 0.1
    tgt_vocab_size = 2048
    ignore_index = 0            # padding index must be a valid column for the buffer init
    B = 16

    key = jax.random.PRNGKey(0)
    k1, k2 = jax.random.split(key)
    logits = jax.random.normal(k1, (B, tgt_vocab_size), dtype=jnp.float32)
    output = jax.nn.log_softmax(logits, axis=-1)          # F.kl_div expects log-probs
    target = jax.random.randint(k2, (B,), 0, tgt_vocab_size, dtype=jnp.int32)
    target = target.at[3].set(ignore_index)               # exercise the padding-row mask

    ref = _reference_loss(output, target,
                          label_smoothing=label_smoothing, padding_idx=ignore_index)

    # 1) Default (large) tiles: single vocab step per batch tile, nB >= 2.
    loss = label_smoothing_loss(output, target,
                                label_smoothing=label_smoothing, padding_idx=ignore_index)
    loss = jax.block_until_ready(loss)
    assert jnp.allclose(loss, ref, rtol=1e-4, atol=1e-4), (loss, ref)

    # 2) Small vocab tiles: exercises accumulation across vocab tiles (pad col in tile 0).
    loss_tiled = label_smoothing_loss(output, target,
                                      label_smoothing=label_smoothing,
                                      padding_idx=ignore_index, tile_b=8, tile_v=256)
    loss_tiled = jax.block_until_ready(loss_tiled)
    assert jnp.allclose(loss_tiled, ref, rtol=1e-4, atol=1e-4), (loss_tiled, ref)

    # 3) Padding column that lives inside a non-zero vocab tile (pad_tile > 0 path).
    pad2 = 300
    target2 = target.at[5].set(pad2)
    ref2 = _reference_loss(output, target2,
                           label_smoothing=label_smoothing, padding_idx=pad2)
    loss2 = label_smoothing_loss(output, target2,
                                 label_smoothing=label_smoothing, padding_idx=pad2,
                                 tile_b=8, tile_v=256)
    loss2 = jax.block_until_ready(loss2)
    assert jnp.allclose(loss2, ref2, rtol=1e-4, atol=1e-4), (loss2, ref2)

    # 4) bf16 log-probs: consumed natively by the MXU, f32 accumulation in-kernel.
    output_bf16 = output.astype(jnp.bfloat16)
    ref_bf16 = _reference_loss(output_bf16, target,
                               label_smoothing=label_smoothing, padding_idx=ignore_index)
    loss_bf16 = label_smoothing_loss(output_bf16, target,
                                     label_smoothing=label_smoothing,
                                     padding_idx=ignore_index)
    loss_bf16 = jax.block_until_ready(loss_bf16)
    assert jnp.allclose(loss_bf16, ref_bf16, rtol=1e-4, atol=1e-4), (loss_bf16, ref_bf16)

    print("KERNEL_OK")
</pallas_src>

<mosaic_0001>
module attributes {stable_mosaic.version = 11 : i64} {
  func.func @_label_smoothing_kl_kernel(%arg0: i32, %arg1: i32, %arg2: memref<8x2048xf32, #tpu.memory_space<vmem>>, %arg3: memref<8x1xi32, #tpu.memory_space<vmem>>, %arg4: memref<8x1xf32, #tpu.memory_space<vmem>>, %arg5: memref<8x1xf32, #tpu.memory_space<vmem>>, %arg6: memref<8x1xf32, #tpu.memory_space<vmem>>, %arg7: memref<8x1xf32, #tpu.memory_space<vmem>>) attributes {dimension_semantics = [#tpu.dimension_semantics<parallel>, #tpu.dimension_semantics<arbitrary>], iteration_bounds = array<i64: 2, 1>, scalar_prefetch = 0 : i64, scratch_operands = 3 : i64, tpu.core_type = #tpu.core_type<tc>, window_params = [{transform_indices = @transform_0, window_bounds = array<i64: 8, 2048>}, {transform_indices = @transform_1, window_bounds = array<i64: 8, 1>}, {transform_indices = @transform_2, window_bounds = array<i64: 8, 1>}]} {
    %c0_i32 = arith.constant 0 : i32
    %0 = arith.cmpi eq, %arg1, %c0_i32 : i32
    %1 = arith.extui %0 : i1 to i32
    %c0_i32_0 = arith.constant 0 : i32
    %2 = arith.cmpi ne, %1, %c0_i32_0 : i32
    scf.if %2 {
      %cst_19 = arith.constant 0.000000e+00 : f32
      %28 = vector.broadcast %cst_19 : f32 to vector<8x1xf32>
      %c0_20 = arith.constant 0 : index
      %c0_21 = arith.constant 0 : index
      %29 = vector.load %arg5[%c0_20, %c0_21] : memref<8x1xf32, #tpu.memory_space<vmem>>, vector<8x1xf32>
      tpu.vector_store %arg5[%c0_20, %c0_21], %28 {strides = array<i32>} : memref<8x1xf32, #tpu.memory_space<vmem>>, vector<8x1xf32>,
      %cst_22 = arith.constant 0.000000e+00 : f32
      %30 = vector.broadcast %cst_22 : f32 to vector<8x1xf32>
      %c0_23 = arith.constant 0 : index
      %c0_24 = arith.constant 0 : index
      %31 = vector.load %arg6[%c0_23, %c0_24] : memref<8x1xf32, #tpu.memory_space<vmem>>, vector<8x1xf32>
      tpu.vector_store %arg6[%c0_23, %c0_24], %30 {strides = array<i32>} : memref<8x1xf32, #tpu.memory_space<vmem>>, vector<8x1xf32>,
      %cst_25 = arith.constant 0.000000e+00 : f32
      %32 = vector.broadcast %cst_25 : f32 to vector<8x1xf32>
      %c0_26 = arith.constant 0 : index
      %c0_27 = arith.constant 0 : index
      %33 = vector.load %arg7[%c0_26, %c0_27] : memref<8x1xf32, #tpu.memory_space<vmem>>, vector<8x1xf32>
      tpu.vector_store %arg7[%c0_26, %c0_27], %32 {strides = array<i32>} : memref<8x1xf32, #tpu.memory_space<vmem>>, vector<8x1xf32>,
    } else {
    }
    %c0 = arith.constant 0 : index
    %c0_1 = arith.constant 0 : index
    %3 = vector.load %arg2[%c0, %c0_1] : memref<8x2048xf32, #tpu.memory_space<vmem>>, vector<8x2048xf32>
    %c0_2 = arith.constant 0 : index
    %c0_3 = arith.constant 0 : index
    %4 = vector.load %arg3[%c0_2, %c0_3] : memref<8x1xi32, #tpu.memory_space<vmem>>, vector<8x1xi32>
    %cst = arith.constant 1.000000e+00 : f32
    %5 = vector.broadcast %cst : f32 to vector<2048x1xf32>
    %c0_4 = arith.constant 0 : index
    %c0_5 = arith.constant 0 : index
    %6 = vector.load %arg5[%c0_4, %c0_5] : memref<8x1xf32, #tpu.memory_space<vmem>>, vector<8x1xf32>
    %cst_6 = arith.constant dense<0.000000e+00> : vector<8x1xf32>
    %7 = tpu.matmul %3, %5, %cst_6 {dimension_numbers = #tpu.dot_dimension_numbers<[1], [0], [0], [1], [0, 0, 1, 1], [], []>, precision = #tpu.contract_precision<fp32>} : vector<8x2048xf32>, vector<2048x1xf32>, vector<8x1xf32> -> vector<8x1xf32>
    %8 = arith.addf %6, %7 : vector<8x1xf32>
    %c0_7 = arith.constant 0 : index
    %c0_8 = arith.constant 0 : index
    %9 = vector.load %arg5[%c0_7, %c0_8] : memref<8x1xf32, #tpu.memory_space<vmem>>, vector<8x1xf32>
    tpu.vector_store %arg5[%c0_7, %c0_8], %8 {strides = array<i32>} : memref<8x1xf32, #tpu.memory_space<vmem>>, vector<8x1xf32>,
    %10 = tpu.iota {dimensions = array<i32: 1>} : vector<8x2048xi32>
    %c2048_i32 = arith.constant 2048 : i32
    %11 = arith.muli %arg1, %c2048_i32 : i32
    %12 = vector.broadcast %11 : i32 to vector<8x1xi32>
    %13 = arith.subi %4, %12 : vector<8x1xi32>
    %14 = vector.broadcast %13 : vector<8x1xi32> to vector<8x2048xi32>
    %15 = arith.cmpi eq, %10, %14 : vector<8x2048xi32>
    %cst_9 = arith.constant 0.000000e+00 : f32
    %16 = vector.broadcast %cst_9 : f32 to vector<8x2048xf32>
    %17 = arith.select %15, %3, %16 : vector<8x2048xi1>, vector<8x2048xf32>
    %c0_10 = arith.constant 0 : index
    %c0_11 = arith.constant 0 : index
    %18 = vector.load %arg6[%c0_10, %c0_11] : memref<8x1xf32, #tpu.memory_space<vmem>>, vector<8x1xf32>
    %cst_12 = arith.constant dense<0.000000e+00> : vector<8x1xf32>
    %19 = tpu.matmul %17, %5, %cst_12 {dimension_numbers = #tpu.dot_dimension_numbers<[1], [0], [0], [1], [0, 0, 1, 1], [], []>, precision = #tpu.contract_precision<fp32>} : vector<8x2048xf32>, vector<2048x1xf32>, vector<8x1xf32> -> vector<8x1xf32>
    %20 = arith.addf %18, %19 : vector<8x1xf32>
    %c0_13 = arith.constant 0 : index
    %c0_14 = arith.constant 0 : index
    %21 = vector.load %arg6[%c0_13, %c0_14] : memref<8x1xf32, #tpu.memory_space<vmem>>, vector<8x1xf32>
    tpu.vector_store %arg6[%c0_13, %c0_14], %20 {strides = array<i32>} : memref<8x1xf32, #tpu.memory_space<vmem>>, vector<8x1xf32>,
    %c0_i32_15 = arith.constant 0 : i32
    %22 = arith.cmpi eq, %arg1, %c0_i32_15 : i32
    %23 = arith.extui %22 : i1 to i32
    %c0_i32_16 = arith.constant 0 : i32
    %24 = arith.cmpi ne, %23, %c0_i32_16 : i32
    scf.if %24 {
      %c0_i32_19 = arith.constant 0 : i32
      %28 = vector.broadcast %c0_i32_19 : i32 to vector<8x2048xi32>
      %29 = arith.cmpi eq, %10, %28 : vector<8x2048xi32>
      %cst_20 = arith.constant 0.000000e+00 : f32
      %30 = vector.broadcast %cst_20 : f32 to vector<8x2048xf32>
      %31 = arith.select %29, %3, %30 : vector<8x2048xi1>, vector<8x2048xf32>
      %cst_21 = arith.constant dense<0.000000e+00> : vector<8x1xf32>
      %32 = tpu.matmul %31, %5, %cst_21 {dimension_numbers = #tpu.dot_dimension_numbers<[1], [0], [0], [1], [0, 0, 1, 1], [], []>, precision = #tpu.contract_precision<fp32>} : vector<8x2048xf32>, vector<2048x1xf32>, vector<8x1xf32> -> vector<8x1xf32>
      %c0_22 = arith.constant 0 : index
      %c0_23 = arith.constant 0 : index
      %33 = vector.load %arg7[%c0_22, %c0_23] : memref<8x1xf32, #tpu.memory_space<vmem>>, vector<8x1xf32>
      tpu.vector_store %arg7[%c0_22, %c0_23], %32 {strides = array<i32>} : memref<8x1xf32, #tpu.memory_space<vmem>>, vector<8x1xf32>,
    } else {
    }
    %c0_i32_17 = arith.constant 0 : i32
    %25 = arith.cmpi eq, %arg1, %c0_i32_17 : i32
    %26 = arith.extui %25 : i1 to i32
    %c0_i32_18 = arith.constant 0 : i32
    %27 = arith.cmpi ne, %26, %c0_i32_18 : i32
    scf.if %27 {
      %c0_19 = arith.constant 0 : index
      %c0_20 = arith.constant 0 : index
      %28 = vector.load %arg5[%c0_19, %c0_20] : memref<8x1xf32, #tpu.memory_space<vmem>>, vector<8x1xf32>
      %cst_21 = arith.constant 4.8875856E-5 : f32
      %29 = vector.broadcast %cst_21 : f32 to vector<8x1xf32>
      %30 = arith.mulf %29, %28 : vector<8x1xf32>
      %c0_22 = arith.constant 0 : index
      %c0_23 = arith.constant 0 : index
      %31 = vector.load %arg6[%c0_22, %c0_23] : memref<8x1xf32, #tpu.memory_space<vmem>>, vector<8x1xf32>
      %cst_24 = arith.constant 0.8999511 : f32
      %32 = vector.broadcast %cst_24 : f32 to vector<8x1xf32>
      %33 = arith.mulf %32, %31 : vector<8x1xf32>
      %34 = arith.addf %30, %33 : vector<8x1xf32>
      %c0_25 = arith.constant 0 : index
      %c0_26 = arith.constant 0 : index
      %35 = vector.load %arg7[%c0_25, %c0_26] : memref<8x1xf32, #tpu.memory_space<vmem>>, vector<8x1xf32>
      %cst_27 = arith.constant 4.8875856E-5 : f32
      %36 = vector.broadcast %cst_27 : f32 to vector<8x1xf32>
      %37 = arith.mulf %36, %35 : vector<8x1xf32>
      %38 = arith.subf %34, %37 : vector<8x1xf32>
      %cst_28 = arith.constant -1.08744717 : f32
      %39 = vector.broadcast %cst_28 : f32 to vector<8x1xf32>
      %40 = arith.subf %39, %38 : vector<8x1xf32>
      %c0_i32_29 = arith.constant 0 : i32
      %41 = vector.broadcast %c0_i32_29 : i32 to vector<8x1xi32>
      %42 = arith.cmpi eq, %4, %41 : vector<8x1xi32>
      %cst_30 = arith.constant 0.000000e+00 : f32
      %43 = vector.broadcast %cst_30 : f32 to vector<8x1xf32>
      %44 = arith.select %42, %43, %40 : vector<8x1xi1>, vector<8x1xf32>
      %c0_31 = arith.constant 0 : index
      %c0_32 = arith.constant 0 : index
      %45 = vector.load %arg4[%c0_31, %c0_32] : memref<8x1xf32, #tpu.memory_space<vmem>>, vector<8x1xf32>
      tpu.vector_store %arg4[%c0_31, %c0_32], %44 {strides = array<i32>} : memref<8x1xf32, #tpu.memory_space<vmem>>, vector<8x1xf32>,
    } else {
    }
    return
  }
  func.func @transform_0(%arg0: i32, %arg1: i32) -> (i32, i32) {
    %c0_i32 = arith.constant 0 : i32
    return %arg0, %arg1 : i32, i32
  }
  func.func @transform_1(%arg0: i32, %arg1: i32) -> (i32, i32) {
    %c0_i32 = arith.constant 0 : i32
    %c0_i32_0 = arith.constant 0 : i32
    return %arg0, %c0_i32 : i32, i32
  }
  func.func @transform_2(%arg0: i32, %arg1: i32) -> (i32, i32) {
    %c0_i32 = arith.constant 0 : i32
    %c0_i32_0 = arith.constant 0 : i32
    return %arg0, %c0_i32 : i32, i32
  }
}

</mosaic_0001>

<bundles_post_ra>
// kernel: tpu_custom_call.1
= control target key start
LH: loop header
LB: loop body
LE: loop exit
PB: predicated region body
PF: predicated region fallthrough
CT: control target
= control target key end

     0   :  { %7 = vsyncpa [#allocation6], 0  ;;  %s17140_s0 = inlined_call_operand.hbm [shape: f32[16,2048], index: 0, kind: input, shape index: {}]   ;;  %s17141_s1 = inlined_call_operand.vmem [shape: s32[16,1], index: 1, kind: input, shape index: {}]   ;;  %s17142_s2 = inlined_call_operand.vmem [shape: f32[16,1], index: 2, kind: output, shape index: {}]  }
   0x1   :  { %9 = vsyncpa [#allocation6 + $0x1], 0  ;;  %s15155_s9 = smov 0   ;;  %s15157_s10 = smov 0  }
   0x2   :  { %s15159_s11 = smov 0   ;;  %s15161_s12 = smov 0  }
   0x3   :  { %s15163_s13 = smov 0   ;;  %s15165_s14 = smov 0  }
   0x4 LB: > { %s11121_s15 = sadd.s32 4294967295, %s15133_s14   ;;  %s27_s16 = sadd.s32 1, %s15129_s13  ;;  %s15133_s14 = sphi %s15165_s14, %s15_s14   ;;  %s15129_s13 = sphi %s15163_s13, %s17152_s13   ;;  %s15125_s12 = sphi %s15161_s12, %s17151_s12   ;;  %s15121_s11 = sphi %s15159_s11, %s17150_s11   ;;  %s15117_s10 = sphi %s15157_s10, %s17149_s10   ;;  %s15113_s9 = sphi %s15155_s9, %s17148_s9  }
   0x5   : > { %p29_p0 = scmp.ge.s32.totalorder %s27_s16, 2  ;;  %s36_s17 = sadd.s32 1, %s15121_s11 }
   0x6   : > { %p43_p1 = scmp.ne.s32.totalorder %s15121_s11, %s15117_s10  ;;  %p44_p2 = scmp.eq.s32.totalorder %s15133_s14, 0 }
   0x7   : > { %s17154_s16 = smov (%p29_p0, %s27_s16), 0  ;;  %p49_p4 = scmp.ne.s32.totalorder %s15117_s10, %s15113_s9 }
   0x8   : > { %p15191_p3 = por %p44_p2, %p43_p1  ;;  %s31_s19 = ssub.s32 %s15129_s13, %s17154_s16 }
   0x9   : > { %p50_p5 = scmp.eq.s32.totalorder %s11121_s15, 0  ;;  %p34_p6 = scmp.eq.s32.totalorder %s31_s19, 0 }
   0xa   : > { %p14981_p8 = scmp.lt.s32.totalorder %s15133_s14, 2  ;;  %s125_s22 = sand.u32 1, %s15121_s11  }
   0xb   : > { %p15198_p7 = por %p50_p5, %p49_p4  ;;  %s11134_s23 = sshll.u32 %s15129_s13, 11 }
   0xc   : > { %s15204_s21 = scalar_select %p34_p6, %s15121_s11, %s36_s17  }
   0xd   : > { %s11125_s24 = sshll.u32 %s125_s22, 7  ;;  %s15211_s27 = scalar_lea.hbm %s17140_s0, %s11134_s23 }
   0xe   : > { %s129_s28 = scalar_lea.vmem [#allocation5], %s11125_s24  ;;  %p15215_p9 = pnand %p14981_p8, %p15191_p3 }
   0xf   : > { %s139_s29 = sshll.u32 %s129_s28, 4  ;;  %s126_s3 = scalar_lea.sflag [#allocation6], %s125_s22  ;;  %s15219_s29 = int_to_ptr.vmem [resolvable:$true] %s139_s29 }
  0x10   : > { %s15053_s4 = scalar_lea.hbm %s15211_s27, 2048  ;;  %p15055_p13 = pneg %p15215_p9 }
  0x11   : > { %p15054_p12 = scmp.ne.s32.totalorder %s15211_s27, %s15053_s4  ;;  %s15058_s7 = scalar_lea.hbm %s17140_s0, 4096 }
  0x12   : > { %p15059_p2 = scmp.lt.u32.totalorder %s15211_s27, %s17140_s0  ;;  %p15060_p3 = scmp.lt.u32.totalorder %s15058_s7, %s15053_s4 }
  0x13   : > { %p15056_p0 = pnand %p15055_p13, %p15054_p12  ;;  %p15062_p5 = scmp.lt.u32.totalorder %s15053_s4, %s15211_s27 }
  0x14   : > { %p15061_p4 = por %p15060_p3, %p15059_p2 }
  0x15   : > { %p15057_p1 = pneg %p15056_p0 }
  0x16   : > { %p15063_p6 = por %p15062_p5, %p15061_p4 }
  0x18   : > { %p15064_p8 = pnand %p15063_p6, %p15057_p1 }
  0x1a   : > { %15067 = shalt.err (!%p15064_p8)
}
  0x1b   : > { %s15068_s15 = scalar_lea.vmem %s15219_s29, 2048  ;;  %s15135_s17 = smov [#allocation5]  }
  0x1c   : > { %p15069_p12 = scmp.ne.s32.totalorder %s15219_s29, %s15068_s15  ;;  %s15073_s18 = sshll.u32 %s15135_s17, 4  ;;  %s15074_s18 = int_to_ptr.vmem [resolvable:$false] %s15073_s18 }
  0x1d   : > { %s15075_s19 = scalar_lea.vmem %s15074_s18, 4096  ;;  %p15076_p11 = scmp.lt.s32.totalorder %s15219_s29, %s15074_s18 }
  0x1e   : > { %p15071_p0 = pnand %p15069_p12, %p15055_p13  ;;  %p15077_p2 = scmp.lt.s32.totalorder %s15075_s19, %s15068_s15 }
  0x20   : > { %p15072_p10 = pneg %p15071_p0  ;;  %p15078_p3 = por %p15077_p2, %p15076_p11 }
  0x22   : > { %p15079_p4 = pnand %p15078_p3, %p15072_p10 }
  0x24   : > { %15082 = shalt.err (!%p15079_p4)
}
  0x25   : > { %14980 = dma.hbm_to_vmem [thread:$0]  (!%p15215_p9), %s15211_s27, 2048, %s15219_s29, %s126_s3  }
  0x26   : > { %p17146_p1 = scmp.lt.s32.totalorder %s15133_s14, 3  ;;  %p17147_p5 = scmp.ge.s32.totalorder %s15133_s14, 1 }
  0x28   : > { %p152_p13 = pnand %p17147_p5, %p17146_p1 }
  0x29   : > { %s157_s22 = sand.u32 (!%p152_p13), 1, %s15117_s10  }
  0x2a   : > { %155 = sbr.rel (%p152_p13) target bundleno = 1584 (0x630), region = 28  ;;  %s11129_s23 = sshll.u32 (!%p152_p13), %s157_s22, 7 }
  0x2b   : > { %s158_s24 = scalar_lea.sflag (!%p152_p13), [#allocation6], %s157_s22  ;;  %s15253_s25 = scalar_lea.vmem (!%p152_p13), [#allocation5], %s11129_s23 }
  0x31   : > { %15108 = dma.done.wait (%p15198_p7), %s158_s24, 2048  }
  0x32   : > { %15110 = vsyncadd (%p15198_p7), %s158_s24, 4294965248  ;;  %v15136_v0 = vmov 1.0|1.0   ;;  %v15137_v1 = vmov 0.0   ;;  %v203_v2 = vld [vmem:[%s15253_s25 + $0x8] sm:$0xff]  ;;  %v202_v3 = vld [vmem:[%s15253_s25] sm:$0xff] }
  0x33   : > { %13823 = vmatprep.subr.bf16.mxu0 %v15136_v0  ;;  %372 = vmatprep.subr.mxu1 %v15137_v1  ;;  %v284_v4 = vand.u32 4294901760, %v203_v2  ;;  %v15269_v5 = vand.u32 4294901760, %v202_v3  ;;  %v205_v13 = vld [vmem:[%s15253_s25 + $0x18] sm:$0xff]  ;;  %v204_v20 = vld [vmem:[%s15253_s25 + $0x10] sm:$0xff]  ;;  %v207_v26 = vld [vmem:[%s15253_s25 + $0x28] sm:$0xff]  ;;  %p186_p7 = scmp.lt.s32.totalorder %s15125_s12, 1 }
  0x34   : > { %13824 = vmatpush3.bf16.msra.mxu0 %v15136_v0  ;;  %373 = vmatpush1.msra.mxu1 %v15137_v1  ;;  %v15291_v14 = vand.u32 4294901760, %v205_v13  ;;  %v15331_v21 = vand.u32 4294901760, %v204_v20  ;;  %v15389_v27 = vand.u32 4294901760, %v207_v26  ;;  %v206_v32 = vld [vmem:[%s15253_s25 + $0x20] sm:$0xff]  ;;  %v209_v38 = vld [vmem:[%s15253_s25 + $0x38] sm:$0xff]  ;;  %v208_v44 = vld [vmem:[%s15253_s25 + $0x30] sm:$0xff] }
  0x35   : > { %13825 = vmatprep.subr.bf16.mxu0 %v15136_v0  ;;  %13839 = vmatprep.subr.bf16.mxu1 %v15136_v0  ;;  %v285_v6 = vsub.f32 %v203_v2, %v284_v4  ;;  %v291_v7 = vsub.f32 %v202_v3, %v15269_v5  ;;  %v15414_v33 = vand.u32 4294901760, %v206_v32  ;;  %v15444_v39 = vand.u32 4294901760, %v209_v38  ;;  %s17156_s12 = smov (!%p186_p7, %s15125_s12), 1  ;;  %v211_v52 = vld [vmem:[%s15253_s25 + $0x48] sm:$0xff]  ;;  %v210_v58 = vld [vmem:[%s15253_s25 + $0x40] sm:$0xff] }
  0x36   : > { %v15298_v16 = vsub.f32 %v205_v13, %v15291_v14  ;;  %v15338_v22 = vsub.f32 %v204_v20, %v15331_v21  ;;  %v1177_v28 = vsub.f32 %v207_v26, %v15389_v27  ;;  %v15485_v45 = vand.u32 4294901760, %v208_v44  ;;  %s11130_s20 = sshll.u32 %s17156_s12, 3 }
  0x37   : > { %438 = vmatprep.mubr.f32.mxu1 %v285_v6  ;;  %v286_v8 = vand.u32 4294901760, %v285_v6  ;;  %v292_v11 = vand.u32 4294901760, %v291_v7  ;;  %v1183_v34 = vsub.f32 %v206_v32, %v15414_v33  ;;  %v15452_v40 = vsub.f32 %v209_v38, %v15444_v39  ;;  %s15508_s28 = scalar_lea.vmem %s17141_s1, %s11130_s20  ;;  %s193_s3 = scalar_lea.vmem %s17142_s2, %s11130_s20 }
  0x38   : > { %13826 = vmatpush3.bf16.msra.mxu0 %v15136_v0  ;;  %441 = vmatmul.mubr.f32.vlgmr.msra.gmra.mrb[0].mxu1 %v291_v7  ;;  %v732_v17 = vand.u32 4294901760, %v15298_v16  ;;  %v738_v23 = vand.u32 4294901760, %v15338_v22  ;;  %v1178_v29 = vand.u32 4294901760, %v1177_v28  ;;  %v15493_v46 = vsub.f32 %v208_v44, %v15485_v45  ;;  %v218_v49 = vld [vmem:[%s15508_s28] sm:$0xff] }
  0x39   : > { %13827 = vmatprep.subr.bf16.mxu0 %v15136_v0  ;;  %13840 = vmatpush3.bf16.msra.mxu1 %v15136_v0  ;;  %v287_v9 = vsub.f32 %v285_v6, %v286_v8  ;;  %v293_v12 = vsub.f32 %v291_v7, %v292_v11  ;;  %v1184_v35 = vand.u32 4294901760, %v1183_v34  ;;  %v1624_v41 = vand.u32 4294901760, %v15452_v40  ;;  %v213_v6 = vld [vmem:[%s15253_s25 + $0x58] sm:$0xff] }
  0x3a   : > { %13841 = vmatprep.subr.bf16.mxu1 %v15136_v0  ;;  %513 = vmatprep.mubr.f32.mxu1 %v286_v8  ;;  %v733_v18 = vsub.f32 %v15298_v16, %v732_v17  ;;  %v739_v24 = vsub.f32 %v15338_v22, %v738_v23  ;;  %v1179_v30 = vsub.f32 %v1177_v28, %v1178_v29  ;;  %v15138_v47 = vmov 0  }
  0x3b   : > { %v288_v10 = vand.u32 4294901760, %v287_v9  ;;  %v294_v15 = vand.u32 4294901760, %v293_v12  ;;  %v1185_v36 = vsub.f32 %v1183_v34, %v1184_v35  ;;  %v1625_v42 = vsub.f32 %v15452_v40, %v1624_v41  ;;  %15034 = vset.pattern.permute.xlu0 %v15138_v47 }
  0x3c   : > { %13828 = vmatpush3.bf16.msra.mxu0 %v15136_v0  ;;  %v734_v19 = vand.u32 4294901760, %v733_v18  ;;  %v740_v25 = vand.u32 4294901760, %v739_v24  ;;  %v1180_v31 = vand.u32 4294901760, %v1179_v30  ;;  %v1630_v48 = vand.u32 4294901760, %v15493_v46  ;;  %3812 = vperm.xlu0 %15034, %v218_v49   ;;  %v212_v24 = vld [vmem:[%s15253_s25 + $0x50] sm:$0xff] }
  0x3d   : > { %13829 = vmatprep.subr.bf16.mxu0 %v15136_v0  ;;  %13842 = vmatpush3.bf16.msra.mxu1 %v15136_v0  ;;  %v1186_v37 = vand.u32 4294901760, %v1185_v36  ;;  %v1626_v43 = vand.u32 4294901760, %v1625_v42  ;;  %v15552_v53 = vand.u32 4294901760, %v211_v52  ;;  %v15577_v61 = vand.u32 4294901760, %v210_v58 }
  0x3e   : > { %13843 = vmatprep.subr.bf16.mxu1 %v15136_v0  ;;  %289 = vmatprep.mubr.f32.mxu0 %v288_v10  ;;  %v1631_v50 = vsub.f32 %v15493_v46, %v1630_v48  ;;  %v15612_v9 = vand.u32 4294901760, %v213_v6  ;;  %vm198_vm5 = vcmask 7168  }
  0x3f   : > { %v2069_v54 = vsub.f32 %v211_v52, %v15552_v53  ;;  %v15586_v62 = vsub.f32 %v210_v58, %v15577_v61  ;;  %199 = vst.msk [vmem:[#allocation2] sm:$0xff] %vm198_vm5, %v15137_v1  ;;  %200 = vst.msk [vmem:[#allocation3] sm:$0xff] %vm198_vm5, %v15137_v1 }
  0x40   : > { %13830 = vmatpush3.bf16.msra.mxu0 %v15136_v0  ;;  %v1632_v51 = vand.u32 4294901760, %v1631_v50  ;;  %201 = vst.msk [vmem:[#allocation4] sm:$0xff] %vm198_vm5, %v15137_v1 }
  0x41   : > { %13831 = vmatprep.subr.bf16.mxu0 %v15136_v0  ;;  %13844 = vmatpush3.bf16.msra.mxu1 %v15136_v0  ;;  %v2070_v55 = vand.u32 4294901760, %v2069_v54  ;;  %v2076_v63 = vand.u32 4294901760, %v15586_v62 }
  0x42   : > { %13845 = vmatprep.subr.bf16.mxu1 %v15136_v0 }
  0x43   : > { %v2071_v56 = vsub.f32 %v2069_v54, %v2070_v55  ;;  %v2077_v2 = vsub.f32 %v15586_v62, %v2076_v63 }
  0x44   : > { %13832 = vmatpush3.bf16.msra.mxu0 %v15136_v0 }
  0x45   : > { %13833 = vmatprep.subr.bf16.mxu0 %v15136_v0  ;;  %13846 = vmatpush3.bf16.msra.mxu1 %v15136_v0  ;;  %v2072_v57 = vand.u32 4294901760, %v2071_v56 }
  0x46   : > { %13847 = vmatprep.subr.bf16.mxu1 %v15136_v0 }
  0x48   : > { %13834 = vmatpush3.bf16.msra.mxu0 %v15136_v0 }
  0x49   : > { %13835 = vmatprep.subr.bf16.mxu0 %v15136_v0  ;;  %13848 = vmatpush3.bf16.msra.mxu1 %v15136_v0 }
  0x4a   : > { %13849 = vmatprep.subr.bf16.mxu1 %v15136_v0 }
  0x4c   : > { %13836 = vmatpush3.bf16.msra.mxu0 %v15136_v0 }
  0x4d   : > { %13837 = vmatprep.subr.bf16.mxu0 %v15136_v0  ;;  %13850 = vmatpush3.bf16.msra.mxu1 %v15136_v0 }
  0x4e   : > { %13851 = vmatprep.subr.bf16.mxu1 %v15136_v0 }
  0x50   : > { %13838 = vmatpush3.bf16.msra.mxu0 %v15136_v0 }
  0x51   : > { %300 = vmatprep.subr.mxu0 %v15137_v1  ;;  %13852 = vmatpush3.bf16.msra.mxu1 %v15136_v0 }
  0x52   : > { %13853 = vmatprep.subr.bf16.mxu1 %v15136_v0 }
  0x53   : > { %295 = vmatmul.mubr.f32.vlgmr.msra.gmra.mrb[0].mxu0 %v294_v15 }
  0x54   : > { %301 = vmatpush1.msra.mxu0 %v15137_v1  ;;  %365 = vmatprep.mubr.f32.mxu0 %v284_v4 }
  0x55   : > { %522 = vmatprep.subr.mxu0 %v15137_v1  ;;  %13854 = vmatpush3.bf16.msra.mxu1 %v15136_v0 }
  0x56   : > { %13871 = vmatprep.subr.bf16.mxu1 %v15136_v0 }
  0x57   : > { %367 = vmatmul.mubr.f32.vlgmr.msra.gmra.mrb[2].mxu0 %v15269_v5 }
  0x58   : > { %523 = vmatpush1.msra.mxu0 %v15137_v1  ;;  %587 = vmatprep.mubr.f32.mxu0 %v284_v4 }
  0x59   : > { %13855 = vmatprep.subr.bf16.mxu0 %v15136_v0  ;;  %517 = vmatmul.mubr.f32.vlgmr.msra.gmra.mrb[2].mxu1 %v292_v11 }
  0x5a   : > { %13872 = vmatpush3.bf16.msra.mxu1 %v15136_v0  ;;  %735 = vmatprep.mubr.f32.mxu1 %v734_v19 }
  0x5b   : > { %589 = vmatmul.mubr.f32.vlgmr.msra.gmra.mrb[4].mxu0 %v15269_v5  ;;  %13873 = vmatprep.subr.bf16.mxu1 %v15136_v0 }
  0x5c   : > { %13856 = vmatpush3.bf16.msra.mxu0 %v15136_v0  ;;  %659 = vmatprep.mubr.f32.mxu0 %v284_v4  ;;  %v2078_v4 = vand.u32 4294901760, %v2077_v2 }
  0x5d   : > { %13857 = vmatprep.subr.bf16.mxu0 %v15136_v0 }
  0x5e   : > { %13874 = vmatpush3.bf16.msra.mxu1 %v15136_v0 }
  0x5f   : > { %13875 = vmatprep.subr.bf16.mxu1 %v15136_v0 }
  0x60   : > { %13858 = vmatpush3.bf16.msra.mxu0 %v15136_v0 }
  0x61   : > { %13859 = vmatprep.subr.bf16.mxu0 %v15136_v0 }
  0x62   : > { %13876 = vmatpush3.bf16.msra.mxu1 %v15136_v0 }
  0x63   : > { %13877 = vmatprep.subr.bf16.mxu1 %v15136_v0 }
  0x64   : > { %13860 = vmatpush3.bf16.msra.mxu0 %v15136_v0 }
  0x65   : > { %13861 = vmatprep.subr.bf16.mxu0 %v15136_v0 }
  0x66   : > { %13878 = vmatpush3.bf16.msra.mxu1 %v15136_v0 }
  0x67   : > { %13879 = vmatprep.subr.bf16.mxu1 %v15136_v0 }
  0x68   : > { %13862 = vmatpush3.bf16.msra.mxu0 %v15136_v0 }
  0x69   : > { %13863 = vmatprep.subr.bf16.mxu0 %v15136_v0 }
  0x6a   : > { %13880 = vmatpush3.bf16.msra.mxu1 %v15136_v0 }
  0x6b   : > { %13881 = vmatprep.subr.bf16.mxu1 %v15136_v0 }
  0x6c   : > { %13864 = vmatpush3.bf16.msra.mxu0 %v15136_v0 }
  0x6d   : > { %13865 = vmatprep.subr.bf16.mxu0 %v15136_v0 }
  0x6e   : > { %13882 = vmatpush3.bf16.msra.mxu1 %v15136_v0 }
  0x6f   : > { %13883 = vmatprep.subr.bf16.mxu1 %v15136_v0 }
  0x70   : > { %13866 = vmatpush3.bf16.msra.mxu0 %v15136_v0 }
  0x71   : > { %13867 = vmatprep.subr.bf16.mxu0 %v15136_v0 }
  0x72   : > { %13884 = vmatpush3.bf16.msra.mxu1 %v15136_v0 }
  0x73   : > { %13885 = vmatprep.subr.bf16.mxu1 %v15136_v0 }
  0x74   : > { %13868 = vmatpush3.bf16.msra.mxu0 %v15136_v0 }
  0x75   : > { %13869 = vmatprep.subr.bf16.mxu0 %v15136_v0 }
  0x76   : > { %13886 = vmatpush3.bf16.msra.mxu1 %v15136_v0 }
  0x77   : > { %818 = vmatprep.subr.mxu1 %v15137_v1 }
  0x78   : > { %13870 = vmatpush3.bf16.msra.mxu0 %v15136_v0 }
  0x79   : > { %746 = vmatprep.subr.mxu0 %v15137_v1  ;;  %741 = vmatmul.mubr.f32.vlgmr.msra.gmra.mrb[4].mxu1 %v740_v25  ;;  %v15653_v25 = vand.u32 4294901760, %v212_v24 }
  0x7a   : > { %819 = vmatpush1.msra.mxu1 %v15137_v1  ;;  %884 = vmatprep.mubr.f32.mxu1 %v15298_v16 }
  0x7b   : > { %661 = vmatmul.mubr.f32.vlgmr.msra.gmra.mrb[6].mxu0 %v15269_v5  ;;  %968 = vmatprep.subr.mxu1 %v15137_v1  ;;  %v15660_v26 = vsub.f32 %v212_v24, %v15653_v25 }
  0x7c   : > { %747 = vmatpush1.msra.mxu0 %v15137_v1  ;;  %811 = vmatprep.mubr.f32.mxu0 %v15291_v14 }
  0x7d   : > { %13887 = vmatprep.subr.bf16.mxu0 %v15136_v0  ;;  %887 = vmatmul.mubr.f32.vlgmr.msra.gmra.mrb[6].mxu1 %v15338_v22 }
  0x7e   : > { %969 = vmatpush1.msra.mxu1 %v15137_v1  ;;  %1033 = vmatprep.mubr.f32.mxu1 %v15291_v14 }
  0x7f   : > { %813 = vmatmul.mubr.f32.vlgmr.msra.gmra.mrb[8].mxu0 %v15331_v21  ;;  %13903 = vmatprep.subr.bf16.mxu1 %v15136_v0 }
  0x80   : > { %13888 = vmatpush3.bf16.msra.mxu0 %v15136_v0  ;;  %959 = vmatprep.mubr.f32.mxu0 %v732_v17 }
  0x81   : > { %13889 = vmatprep.subr.bf16.mxu0 %v15136_v0  ;;  %1035 = vmatmul.mubr.f32.vlgmr.msra.gmra.mrb[8].mxu1 %v15331_v21 }
  0x82   : > { %13904 = vmatpush3.bf16.msra.mxu1 %v15136_v0  ;;  %1105 = vmatprep.mubr.f32.mxu1 %v15291_v14  ;;  %v15620_v14 = vsub.f32 %v213_v6, %v15612_v9 }
  0x83   : > { %13905 = vmatprep.subr.bf16.mxu1 %v15136_v0 }
  0x84   : > { %13890 = vmatpush3.bf16.msra.mxu0 %v15136_v0  ;;  %v2516_v17 = vand.u32 4294901760, %v15620_v14 }
  0x85   : > { %13891 = vmatprep.subr.bf16.mxu0 %v15136_v0 }
  0x86   : > { %13906 = vmatpush3.bf16.msra.mxu1 %v15136_v0 }
  0x87   : > { %13907 = vmatprep.subr.bf16.mxu1 %v15136_v0 }
  0x88   : > { %13892 = vmatpush3.bf16.msra.mxu0 %v15136_v0 }
  0x89   : > { %13893 = vmatprep.subr.bf16.mxu0 %v15136_v0 }
  0x8a   : > { %13908 = vmatpush3.bf16.msra.mxu1 %v15136_v0 }
  0x8b   : > { %13909 = vmatprep.subr.bf16.mxu1 %v15136_v0 }
  0x8c   : > { %13894 = vmatpush3.bf16.msra.mxu0 %v15136_v0 }
  0x8d   : > { %13895 = vmatprep.subr.bf16.mxu0 %v15136_v0 }
  0x8e   : > { %13910 = vmatpush3.bf16.msra.mxu1 %v15136_v0 }
  0x8f   : > { %13911 = vmatprep.subr.bf16.mxu1 %v15136_v0 }
  0x90   : > { %13896 = vmatpush3.bf16.msra.mxu0 %v15136_v0 }
  0x91   : > { %13897 = vmatprep.subr.bf16.mxu0 %v15136_v0 }
  0x92   : > { %13912 = vmatpush3.bf16.msra.mxu1 %v15136_v0 }
  0x93   : > { %13913 = vmatprep.subr.bf16.mxu1 %v15136_v0 }
  0x94   : > { %13898 = vmatpush3.bf16.msra.mxu0 %v15136_v0 }
  0x95   : > { %13899 = vmatprep.subr.bf16.mxu0 %v15136_v0 }
  0x96   : > { %13914 = vmatpush3.bf16.msra.mxu1 %v15136_v0 }
  0x97   : > { %13915 = vmatprep.subr.bf16.mxu1 %v15136_v0 }
  0x98   : > { %13900 = vmatpush3.bf16.msra.mxu0 %v15136_v0 }
  0x99   : > { %13901 = vmatprep.subr.bf16.mxu0 %v15136_v0 }
  0x9a   : > { %13916 = vmatpush3.bf16.msra.mxu1 %v15136_v0 }
  0x9b   : > { %13917 = vmatprep.subr.bf16.mxu1 %v15136_v0 }
  0x9c   : > { %13902 = vmatpush3.bf16.msra.mxu0 %v15136_v0 }
  0x9d   : > { %13919 = vmatprep.subr.bf16.mxu0 %v15136_v0 }
  0x9e   : > { %13918 = vmatpush3.bf16.msra.mxu1 %v15136_v0 }
  0x9f   : > { %963 = vmatmul.mubr.f32.vlgmr.msra.gmra.mrb[10].mxu0 %v738_v23  ;;  %1192 = vmatprep.subr.mxu1 %v15137_v1 }
  0xa0   : > { %13920 = vmatpush3.bf16.msra.mxu0 %v15136_v0  ;;  %1181 = vmatprep.mubr.f32.mxu0 %v1180_v31 }
  0xa1   : > { %13921 = vmatprep.subr.bf16.mxu0 %v15136_v0  ;;  %1107 = vmatmul.mubr.f32.vlgmr.msra.gmra.mrb[10].mxu1 %v15331_v21  ;;  %v2517_v21 = vsub.f32 %v15620_v14, %v2516_v17 }
  0xa2   : > { %1193 = vmatpush1.msra.mxu1 %v15137_v1  ;;  %1257 = vmatprep.mubr.f32.mxu1 %v15389_v27 }
  0xa3   : > { %1264 = vmatprep.subr.mxu1 %v15137_v1  ;;  %v2518_v23 = vand.u32 4294901760, %v2517_v21 }
  0xa4   : > { %13922 = vmatpush3.bf16.msra.mxu0 %v15136_v0 }
  0xa5   : > { %13923 = vmatprep.subr.bf16.mxu0 %v15136_v0  ;;  %1259 = vmatmul.mubr.f32.vlgmr.msra.gmra.mrb[12].mxu1 %v15414_v33 }
  0xa6   : > { %1265 = vmatpush1.msra.mxu1 %v15137_v1  ;;  %1330 = vmatprep.mubr.f32.mxu1 %v1177_v28 }
  0xa7   : > { %13935 = vmatprep.subr.bf16.mxu1 %v15136_v0 }
  0xa8   : > { %13924 = vmatpush3.bf16.msra.mxu0 %v15136_v0 }
  0xa9   : > { %13925 = vmatprep.subr.bf16.mxu0 %v15136_v0  ;;  %1333 = vmatmul.mubr.f32.vlgmr.msra.gmra.mrb[14].mxu1 %v1183_v34 }
  0xaa   : > { %13936 = vmatpush3.bf16.msra.mxu1 %v15136_v0  ;;  %1405 = vmatprep.mubr.f32.mxu1 %v1178_v29  ;;  %v2522_v29 = vand.u32 4294901760, %v15660_v26 }
  0xab   : > { %13937 = vmatprep.subr.bf16.mxu1 %v15136_v0 }
  0xac   : > { %13926 = vmatpush3.bf16.msra.mxu0 %v15136_v0  ;;  %v2523_v36 = vsub.f32 %v15660_v26, %v2522_v29 }
  0xad   : > { %13927 = vmatprep.subr.bf16.mxu0 %v15136_v0 }
  0xae   : > { %13938 = vmatpush3.bf16.msra.mxu1 %v15136_v0 }
  0xaf   : > { %13939 = vmatprep.subr.bf16.mxu1 %v15136_v0 }
  0xb0   : > { %13928 = vmatpush3.bf16.msra.mxu0 %v15136_v0 }
  0xb1   : > { %13929 = vmatprep.subr.bf16.mxu0 %v15136_v0 }
  0xb2   : > { %13940 = vmatpush3.bf16.msra.mxu1 %v15136_v0 }
  0xb3   : > { %13941 = vmatprep.subr.bf16.mxu1 %v15136_v0 }
  0xb4   : > { %13930 = vmatpush3.bf16.msra.mxu0 %v15136_v0 }
  0xb5   : > { %13931 = vmatprep.subr.bf16.mxu0 %v15136_v0 }
  0xb6   : > { %13942 = vmatpush3.bf16.msra.mxu1 %v15136_v0 }
  0xb7   : > { %13943 = vmatprep.subr.bf16.mxu1 %v15136_v0 }
  0xb8   : > { %13932 = vmatpush3.bf16.msra.mxu0 %v15136_v0 }
  0xb9   : > { %13933 = vmatprep.subr.bf16.mxu0 %v15136_v0 }
  0xba   : > { %13944 = vmatpush3.bf16.msra.mxu1 %v15136_v0 }
  0xbb   : > { %13945 = vmatprep.subr.bf16.mxu1 %v15136_v0 }
  0xbc   : > { %13934 = vmatpush3.bf16.msra.mxu0 %v15136_v0 }
  0xbd   : > { %1414 = vmatprep.subr.mxu0 %v15137_v1 }
  0xbe   : > { %13946 = vmatpush3.bf16.msra.mxu1 %v15136_v0 }
  0xbf   : > { %1187 = vmatmul.mubr.f32.vlgmr.msra.gmra.mrb[12].mxu0 %v1186_v37  ;;  %13947 = vmatprep.subr.bf16.mxu1 %v15136_v0 }
  0xc0   : > { %1415 = vmatpush1.msra.mxu0 %v15137_v1  ;;  %1479 = vmatprep.mubr.f32.mxu0 %v15389_v27 }
  0xc1   : > { %13951 = vmatprep.subr.bf16.mxu0 %v15136_v0 }
  0xc2   : > { %13948 = vmatpush3.bf16.msra.mxu1 %v15136_v0 }
  0xc3   : > { %1481 = vmatmul.mubr.f32.vlgmr.msra.gmra.mrb[14].mxu0 %v15414_v33  ;;  %13949 = vmatprep.subr.bf16.mxu1 %v15136_v0 }
  0xc4   : > { %13952 = vmatpush3.bf16.msra.mxu0 %v15136_v0  ;;  %1551 = vmatprep.mubr.f32.mxu0 %v15389_v27 }
  0xc5   : > { %13953 = vmatprep.subr.bf16.mxu0 %v15136_v0 }
  0xc6   : > { %13950 = vmatpush3.bf16.msra.mxu1 %v15136_v0 }
  0xc7   : > { %13967 = vmatprep.subr.bf16.mxu1 %v15136_v0 }
  0xc8   : > { %13954 = vmatpush3.bf16.msra.mxu0 %v15136_v0 }
  0xc9   : > { %13955 = vmatprep.subr.bf16.mxu0 %v15136_v0  ;;  %1409 = vmatmul.mubr.f32.vlgmr.msra.gmra.mrb[16].mxu1 %v1184_v35 }
  0xca   : > { %13968 = vmatpush3.bf16.msra.mxu1 %v15136_v0  ;;  %1627 = vmatprep.mubr.f32.mxu1 %v1626_v43 }
  0xcb   : > { %13969 = vmatprep.subr.bf16.mxu1 %v15136_v0 }
  0xcc   : > { %13956 = vmatpush3.bf16.msra.mxu0 %v15136_v0 }
  0xcd   : > { %13957 = vmatprep.subr.bf16.mxu0 %v15136_v0 }
  0xce   : > { %13970 = vmatpush3.bf16.msra.mxu1 %v15136_v0 }
  0xcf   : > { %13971 = vmatprep.subr.bf16.mxu1 %v15136_v0 }
  0xd0   : > { %13958 = vmatpush3.bf16.msra.mxu0 %v15136_v0 }
  0xd1   : > { %13959 = vmatprep.subr.bf16.mxu0 %v15136_v0 }
  0xd2   : > { %13972 = vmatpush3.bf16.msra.mxu1 %v15136_v0 }
  0xd3   : > { %13973 = vmatprep.subr.bf16.mxu1 %v15136_v0 }
  0xd4   : > { %13960 = vmatpush3.bf16.msra.mxu0 %v15136_v0 }
  0xd5   : > { %13961 = vmatprep.subr.bf16.mxu0 %v15136_v0 }
  0xd6   : > { %13974 = vmatpush3.bf16.msra.mxu1 %v15136_v0 }
  0xd7   : > { %13975 = vmatprep.subr.bf16.mxu1 %v15136_v0 }
  0xd8   : > { %13962 = vmatpush3.bf16.msra.mxu0 %v15136_v0 }
  0xd9   : > { %13963 = vmatprep.subr.bf16.mxu0 %v15136_v0 }
  0xda   : > { %13976 = vmatpush3.bf16.msra.mxu1 %v15136_v0 }
  0xdb   : > { %13977 = vmatprep.subr.bf16.mxu1 %v15136_v0 }
  0xdc   : > { %13964 = vmatpush3.bf16.msra.mxu0 %v15136_v0 }
  0xdd   : > { %13965 = vmatprep.subr.bf16.mxu0 %v15136_v0 }
  0xde   : > { %13978 = vmatpush3.bf16.msra.mxu1 %v15136_v0 }
  0xdf   : > { %13979 = vmatprep.subr.bf16.mxu1 %v15136_v0 }
  0xe0   : > { %13966 = vmatpush3.bf16.msra.mxu0 %v15136_v0 }
  0xe1   : > { %1638 = vmatprep.subr.mxu0 %v15137_v1 }
  0xe2   : > { %13980 = vmatpush3.bf16.msra.mxu1 %v15136_v0 }
  0xe3   : > { %1553 = vmatmul.mubr.f32.vlgmr.msra.gmra.mrb[16].mxu0 %v15414_v33  ;;  %13981 = vmatprep.subr.bf16.mxu1 %v15136_v0 }
  0xe4   : > { %1639 = vmatpush1.msra.mxu0 %v15137_v1  ;;  %1703 = vmatprep.mubr.f32.mxu0 %v15444_v39 }
  0xe5   : > { %1710 = vmatprep.subr.mxu0 %v15137_v1 }
  0xe6   : > { %13982 = vmatpush3.bf16.msra.mxu1 %v15136_v0 }
  0xe7   : > { %1705 = vmatmul.mubr.f32.vlgmr.msra.gmra.mrb[18].mxu0 %v15485_v45  ;;  %1860 = vmatprep.subr.mxu1 %v15137_v1 }
  0xe8   : > { %1711 = vmatpush1.msra.mxu0 %v15137_v1  ;;  %1776 = vmatprep.mubr.f32.mxu0 %v15452_v40 }
  0xe9   : > { %13983 = vmatprep.subr.bf16.mxu0 %v15136_v0  ;;  %1633 = vmatmul.mubr.f32.vlgmr.msra.gmra.mrb[18].mxu1 %v1632_v51 }
  0xea   : > { %1861 = vmatpush1.msra.mxu1 %v15137_v1  ;;  %1925 = vmatprep.mubr.f32.mxu1 %v15444_v39 }
  0xeb   : > { %1779 = vmatmul.mubr.f32.vlgmr.msra.gmra.mrb[20].mxu0 %v15493_v46  ;;  %13999 = vmatprep.subr.bf16.mxu1 %v15136_v0  ;;  %v215_v46 = vld [vmem:[%s15253_s25 + $0x68] sm:$0xff] }
  0xec   : > { %13984 = vmatpush3.bf16.msra.mxu0 %v15136_v0  ;;  %1851 = vmatprep.mubr.f32.mxu0 %v1624_v41  ;;  %v2524_v41 = vand.u32 4294901760, %v2523_v36  ;;  %v15709_v47 = vand.u32 4294901760, %v215_v46 }
  0xed   : > { %13985 = vmatprep.subr.bf16.mxu0 %v15136_v0  ;;  %1927 = vmatmul.mubr.f32.vlgmr.msra.gmra.mrb[20].mxu1 %v15485_v45 }
  0xee   : > { %14000 = vmatpush3.bf16.msra.mxu1 %v15136_v0  ;;  %1997 = vmatprep.mubr.f32.mxu1 %v15444_v39 }
  0xef   : > { %14001 = vmatprep.subr.bf16.mxu1 %v15136_v0 }
  0xf0   : > { %13986 = vmatpush3.bf16.msra.mxu0 %v15136_v0 }
  0xf1   : > { %13987 = vmatprep.subr.bf16.mxu0 %v15136_v0 }
  0xf2   : > { %14002 = vmatpush3.bf16.msra.mxu1 %v15136_v0 }
  0xf3   : > { %14003 = vmatprep.subr.bf16.mxu1 %v15136_v0 }
  0xf4   : > { %13988 = vmatpush3.bf16.msra.mxu0 %v15136_v0 }
  0xf5   : > { %13989 = vmatprep.subr.bf16.mxu0 %v15136_v0 }
  0xf6   : > { %14004 = vmatpush3.bf16.msra.mxu1 %v15136_v0 }
  0xf7   : > { %14005 = vmatprep.subr.bf16.mxu1 %v15136_v0 }
  0xf8   : > { %13990 = vmatpush3.bf16.msra.mxu0 %v15136_v0 }
  0xf9   : > { %13991 = vmatprep.subr.bf16.mxu0 %v15136_v0 }
  0xfa   : > { %14006 = vmatpush3.bf16.msra.mxu1 %v15136_v0 }
  0xfb   : > { %14007 = vmatprep.subr.bf16.mxu1 %v15136_v0 }
  0xfc   : > { %13992 = vmatpush3.bf16.msra.mxu0 %v15136_v0 }
  0xfd   : > { %13993 = vmatprep.subr.bf16.mxu0 %v15136_v0 }
  0xfe   : > { %14008 = vmatpush3.bf16.msra.mxu1 %v15136_v0 }
  0xff   : > { %14009 = vmatprep.subr.bf16.mxu1 %v15136_v0 }
 0x100   : > { %13994 = vmatpush3.bf16.msra.mxu0 %v15136_v0 }
 0x101   : > { %13995 = vmatprep.subr.bf16.mxu0 %v15136_v0 }
 0x102   : > { %14010 = vmatpush3.bf16.msra.mxu1 %v15136_v0 }
 0x103   : > { %14011 = vmatprep.subr.bf16.mxu1 %v15136_v0 }
 0x104   : > { %13996 = vmatpush3.bf16.msra.mxu0 %v15136_v0 }
 0x105   : > { %13997 = vmatprep.subr.bf16.mxu0 %v15136_v0 }
 0x106   : > { %14012 = vmatpush3.bf16.msra.mxu1 %v15136_v0 }
 0x107   : > { %14013 = vmatprep.subr.bf16.mxu1 %v15136_v0 }
 0x108   : > { %13998 = vmatpush3.bf16.msra.mxu0 %v15136_v0 }
 0x109   : > { %14015 = vmatprep.subr.bf16.mxu0 %v15136_v0 }
 0x10a   : > { %14014 = vmatpush3.bf16.msra.mxu1 %v15136_v0 }
 0x10b   : > { %1855 = vmatmul.mubr.f32.vlgmr.msra.gmra.mrb[22].mxu0 %v1630_v48  ;;  %2084 = vmatprep.subr.mxu1 %v15137_v1  ;;  %v442_v59 = vpop.f32.mrb[0].mxu1  ;;  %v2961_v48 = vsub.f32 %v215_v46, %v15709_v47 }
 0x10c   : > { %14016 = vmatpush3.bf16.msra.mxu0 %v15136_v0  ;;  %2073 = vmatprep.mubr.f32.mxu0 %v2072_v57  ;;  %v444_v60 = vpop.f32.mrb[1].mxu1 }
 0x10d   : > { %14017 = vmatprep.subr.bf16.mxu0 %v15136_v0  ;;  %1999 = vmatmul.mubr.f32.vlgmr.msra.gmra.mrb[22].mxu1 %v15485_v45  ;;  %v2962_v49 = vand.u32 4294901760, %v2961_v48  ;;  %v214_v60 = vld [vmem:[%s15253_s25 + $0x60] sm:$0xff] }
 0x10e   : > { %2085 = vmatpush1.msra.mxu1 %v15137_v1  ;;  %2149 = vmatprep.mubr.f32.mxu1 %v15552_v53  ;;  %v15736_v2 = vand.u32 4294901760, %v214_v60 }
 0x10f   : > { %2156 = vmatprep.subr.mxu1 %v15137_v1  ;;  %v2963_v51 = vsub.f32 %v2961_v48, %v2962_v49 }
 0x110   : > { %14018 = vmatpush3.bf16.msra.mxu0 %v15136_v0 }
 0x111   : > { %14019 = vmatprep.subr.bf16.mxu0 %v15136_v0  ;;  %2151 = vmatmul.mubr.f32.vlgmr.msra.gmra.mrb[24].mxu1 %v15577_v61 }
 0x112   : > { %2157 = vmatpush1.msra.mxu1 %v15137_v1  ;;  %2222 = vmatprep.mubr.f32.mxu1 %v2069_v54 }
 0x113   : > { %14031 = vmatprep.subr.bf16.mxu1 %v15136_v0 }
 0x114   : > { %14020 = vmatpush3.bf16.msra.mxu0 %v15136_v0 }
 0x115   : > { %14021 = vmatprep.subr.bf16.mxu0 %v15136_v0  ;;  %2225 = vmatmul.mubr.f32.vlgmr.msra.gmra.mrb[26].mxu1 %v15586_v62 }
 0x116   : > { %14032 = vmatpush3.bf16.msra.mxu1 %v15136_v0  ;;  %2297 = vmatprep.mubr.f32.mxu1 %v2070_v55  ;;  %v2964_v55 = vand.u32 4294901760, %v2963_v51 }
 0x117   : > { %14033 = vmatprep.subr.bf16.mxu1 %v15136_v0 }
 0x118   : > { %14022 = vmatpush3.bf16.msra.mxu0 %v15136_v0 }
 0x119   : > { %14023 = vmatprep.subr.bf16.mxu0 %v15136_v0 }
 0x11a   : > { %14034 = vmatpush3.bf16.msra.mxu1 %v15136_v0 }
 0x11b   : > { %14035 = vmatprep.subr.bf16.mxu1 %v15136_v0 }
 0x11c   : > { %14024 = vmatpush3.bf16.msra.mxu0 %v15136_v0 }
 0x11d   : > { %14025 = vmatprep.subr.bf16.mxu0 %v15136_v0 }
 0x11e   : > { %14036 = vmatpush3.bf16.msra.mxu1 %v15136_v0 }
 0x11f   : > { %14037 = vmatprep.subr.bf16.mxu1 %v15136_v0 }
 0x120   : > { %14026 = vmatpush3.bf16.msra.mxu0 %v15136_v0 }
 0x121   : > { %14027 = vmatprep.subr.bf16.mxu0 %v15136_v0 }
 0x122   : > { %14038 = vmatpush3.bf16.msra.mxu1 %v15136_v0 }
 0x123   : > { %14039 = vmatprep.subr.bf16.mxu1 %v15136_v0 }
 0x124   : > { %14028 = vmatpush3.bf16.msra.mxu0 %v15136_v0 }
 0x125   : > { %14029 = vmatprep.subr.bf16.mxu0 %v15136_v0 }
 0x126   : > { %v11167_v3 = vpop.f32.mrb[0].mxu0  ;;  %14040 = vmatpush3.bf16.msra.mxu1 %v15136_v0 }
 0x127   : > { %v11168_v5 = vpop.f32.mrb[1].mxu0  ;;  %14041 = vmatprep.subr.bf16.mxu1 %v15136_v0 }
 0x128   : > { %14030 = vmatpush3.bf16.msra.mxu0 %v15136_v0  ;;  %v11169_v7 = vadd.f32 %v11168_v5, %v11167_v3  ;;  %v15745_v5 = vsub.f32 %v214_v60, %v15736_v2 }
 0x129   : > { %2306 = vmatprep.subr.mxu0 %v15137_v1 }
 0x12a   : > { %v368_v8 = vpop.f32.mrb[2].mxu0  ;;  %14042 = vmatpush3.bf16.msra.mxu1 %v15136_v0  ;;  %v2968_v6 = vand.u32 4294901760, %v15745_v5 }
 0x12b   : > { %2079 = vmatmul.mubr.f32.vlgmr.msra.gmra.mrb[24].mxu0 %v2078_v4  ;;  %v369_v10 = vadd.f32 %v11169_v7, %v368_v8  ;;  %v370_v11 = vpop.f32.mrb[3].mxu0  ;;  %14043 = vmatprep.subr.bf16.mxu1 %v15136_v0 }
 0x12c   : > { %2307 = vmatpush1.msra.mxu0 %v15137_v1  ;;  %2371 = vmatprep.mubr.f32.mxu0 %v15552_v53  ;;  %v11202_v16 = vpop.f32.mrb[2].mxu1  ;;  %v2969_v7 = vsub.f32 %v15745_v5, %v2968_v6  ;;  %v217_v11 = vld [vmem:[%s15253_s25 + $0x78] sm:$0xff] }
 0x12d   : > { %v443_v12 = vadd.f32 %v442_v59, %v369_v10  ;;  %14047 = vmatprep.subr.bf16.mxu0 %v15136_v0  ;;  %v11203_v18 = vpop.f32.mrb[3].mxu1 }
 0x12e   : > { %v590_v13 = vpop.f32.mrb[4].mxu0  ;;  %14044 = vmatpush3.bf16.msra.mxu1 %v15136_v0  ;;  %v11204_v19 = vadd.f32 %v11203_v18, %v11202_v16  ;;  %v2970_v10 = vand.u32 4294901760, %v2969_v7 }
 0x12f   : > { %2373 = vmatmul.mubr.f32.vlgmr.msra.gmra.mrb[26].mxu0 %v15577_v61  ;;  %v592_v15 = vpop.f32.mrb[5].mxu0  ;;  %14045 = vmatprep.subr.bf16.mxu1 %v15136_v0 }
 0x130   : > { %14048 = vmatpush3.bf16.msra.mxu0 %v15136_v0  ;;  %2443 = vmatprep.mubr.f32.mxu0 %v15552_v53  ;;  %v519_v20 = vadd.f32 %v11204_v19, %v443_v12  ;;  %v15771_v15 = vand.u32 4294901760, %v217_v11 }
 0x131   : > { %14049 = vmatprep.subr.bf16.mxu0 %v15136_v0 }
 0x132   : > { %14046 = vmatpush3.bf16.msra.mxu1 %v15136_v0  ;;  %v591_v22 = vadd.f32 %v590_v13, %v519_v20  ;;  %v15779_v19 = vsub.f32 %v217_v11, %v15771_v15 }
 0x133   : > { %14063 = vmatprep.subr.bf16.mxu1 %v15136_v0 }
 0x134   : > { %14050 = vmatpush3.bf16.msra.mxu0 %v15136_v0  ;;  %v3408_v20 = vand.u32 4294901760, %v15779_v19 }
 0x135   : > { %14051 = vmatprep.subr.bf16.mxu0 %v15136_v0  ;;  %2301 = vmatmul.mubr.f32.vlgmr.msra.gmra.mrb[28].mxu1 %v2076_v63 }
 0x136   : > { %14064 = vmatpush3.bf16.msra.mxu1 %v15136_v0  ;;  %2519 = vmatprep.mubr.f32.mxu1 %v2518_v23 }
 0x137   : > { %14065 = vmatprep.subr.bf16.mxu1 %v15136_v0 }
 0x138   : > { %14052 = vmatpush3.bf16.msra.mxu0 %v15136_v0 }
 0x139   : > { %14053 = vmatprep.subr.bf16.mxu0 %v15136_v0 }
 0x13a   : > { %14066 = vmatpush3.bf16.msra.mxu1 %v15136_v0 }
 0x13b   : > { %14067 = vmatprep.subr.bf16.mxu1 %v15136_v0 }
 0x13c   : > { %14054 = vmatpush3.bf16.msra.mxu0 %v15136_v0 }
 0x13d   : > { %14055 = vmatprep.subr.bf16.mxu0 %v15136_v0 }
 0x13e   : > { %14068 = vmatpush3.bf16.msra.mxu1 %v15136_v0 }
 0x13f   : > { %14069 = vmatprep.subr.bf16.mxu1 %v15136_v0 }
 0x140   : > { %14056 = vmatpush3.bf16.msra.mxu0 %v15136_v0 }
 0x141   : > { %14057 = vmatprep.subr.bf16.mxu0 %v15136_v0 }
 0x142   : > { %14070 = vmatpush3.bf16.msra.mxu1 %v15136_v0 }
 0x143   : > { %14071 = vmatprep.subr.bf16.mxu1 %v15136_v0 }
 0x144   : > { %14058 = vmatpush3.bf16.msra.mxu0 %v15136_v0 }
 0x145   : > { %14059 = vmatprep.subr.bf16.mxu0 %v15136_v0 }
 0x146   : > { %14072 = vmatpush3.bf16.msra.mxu1 %v15136_v0 }
 0x147   : > { %14073 = vmatprep.subr.bf16.mxu1 %v15136_v0 }
 0x148   : > { %14060 = vmatpush3.bf16.msra.mxu0 %v15136_v0 }
 0x149   : > { %14061 = vmatprep.subr.bf16.mxu0 %v15136_v0 }
 0x14a   : > { %14074 = vmatpush3.bf16.msra.mxu1 %v15136_v0 }
 0x14b   : > { %14075 = vmatprep.subr.bf16.mxu1 %v15136_v0 }
 0x14c   : > { %14062 = vmatpush3.bf16.msra.mxu0 %v15136_v0  ;;  %v11272_v32 = vpop.f32.mrb[4].mxu1 }
 0x14d   : > { %2530 = vmatprep.subr.mxu0 %v15137_v1  ;;  %v11273_v34 = vpop.f32.mrb[5].mxu1 }
 0x14e   : > { %v11237_v27 = vpop.f32.mrb[6].mxu0  ;;  %14076 = vmatpush3.bf16.msra.mxu1 %v15136_v0  ;;  %v11274_v37 = vadd.f32 %v11273_v34, %v11272_v32 }
 0x14f   : > { %2445 = vmatmul.mubr.f32.vlgmr.msra.gmra.mrb[28].mxu0 %v15577_v61  ;;  %v11238_v28 = vpop.f32.mrb[7].mxu0  ;;  %14077 = vmatprep.subr.bf16.mxu1 %v15136_v0 }
 0x150   : > { %2531 = vmatpush1.msra.mxu0 %v15137_v1  ;;  %v11239_v30 = vadd.f32 %v11238_v28, %v11237_v27  ;;  %2595 = vmatprep.mubr.f32.mxu0 %v15612_v9  ;;  %v888_v39 = vpop.f32.mrb[6].mxu1  ;;  %v216_v28 = vld [vmem:[%s15253_s25 + $0x70] sm:$0xff] }
 0x151   : > { %2602 = vmatprep.subr.mxu0 %v15137_v1  ;;  %v890_v40 = vpop.f32.mrb[7].mxu1 }
 0x152   : > { %v663_v31 = vadd.f32 %v11239_v30, %v591_v22  ;;  %v814_v33 = vpop.f32.mrb[8].mxu0  ;;  %14078 = vmatpush3.bf16.msra.mxu1 %v15136_v0  ;;  %v3409_v22 = vsub.f32 %v15779_v19, %v3408_v20 }
 0x153   : > { %2597 = vmatmul.mubr.f32.vlgmr.msra.gmra.mrb[30].mxu0 %v15653_v25  ;;  %v816_v35 = vpop.f32.mrb[9].mxu0  ;;  %2752 = vmatprep.subr.mxu1 %v15137_v1 }
 0x154   : > { %2603 = vmatpush1.msra.mxu0 %v15137_v1  ;;  %2668 = vmatprep.mubr.f32.mxu0 %v15620_v14  ;;  %v743_v38 = vadd.f32 %v11274_v37, %v663_v31  ;;  %v1036_v44 = vpop.f32.mrb[8].mxu1 }
 0x155   : > { %14079 = vmatprep.subr.bf16.mxu0 %v15136_v0  ;;  %2525 = vmatmul.mubr.f32.vlgmr.msra.gmra.mrb[30].mxu1 %v2524_v41  ;;  %v1038_v45 = vpop.f32.mrb[9].mxu1  ;;  %v3791_v41 = vlaneseq }
 0x156   : > { %v815_v42 = vadd.f32 %v814_v33, %v743_v38  ;;  %2753 = vmatpush1.msra.mxu1 %v15137_v1  ;;  %2817 = vmatprep.mubr.f32.mxu1 %v15612_v9 }
 0x157   : > { %2671 = vmatmul.mubr.f32.vlgmr.msra.gmra.mrb[32].mxu0 %v15660_v26  ;;  %14095 = vmatprep.subr.bf16.mxu1 %v15136_v0  ;;  %v3410_v26 = vand.u32 4294901760, %v3409_v22  ;;  %v15844_v46 = vand.u32 127, %v3791_v41  ;;  %v15037_v22 = vld [vmem:[%s15253_s25 + $0x18] sm:$0xff]  ;;  %v15038_v41 = vld [vmem:[%s15253_s25 + $0x10] sm:$0xff] }
 0x158   : > { %14080 = vmatpush3.bf16.msra.mxu0 %v15136_v0  ;;  %v889_v43 = vadd.f32 %v888_v39, %v815_v42  ;;  %2743 = vmatprep.mubr.f32.mxu0 %v2516_v17 }
 0x159   : > { %14081 = vmatprep.subr.bf16.mxu0 %v15136_v0  ;;  %2819 = vmatmul.mubr.f32.vlgmr.msra.gmra.mrb[32].mxu1 %v15653_v25  ;;  %v3793_v51 = vadd.s32 128, %v15844_v46 }
 0x15a   : > { %14096 = vmatpush3.bf16.msra.mxu1 %v15136_v0  ;;  %2889 = vmatprep.mubr.f32.mxu1 %v15612_v9 }
 0x15b   : > { %14097 = vmatprep.subr.bf16.mxu1 %v15136_v0 }
 0x15c   : > { %14082 = vmatpush3.bf16.msra.mxu0 %v15136_v0 }
 0x15d   : > { %14083 = vmatprep.subr.bf16.mxu0 %v15136_v0 }
 0x15e   : > { %14098 = vmatpush3.bf16.msra.mxu1 %v15136_v0 }
 0x15f   : > { %14099 = vmatprep.subr.bf16.mxu1 %v15136_v0 }
 0x160   : > { %14084 = vmatpush3.bf16.msra.mxu0 %v15136_v0 }
 0x161   : > { %14085 = vmatprep.subr.bf16.mxu0 %v15136_v0 }
 0x162   : > { %14100 = vmatpush3.bf16.msra.mxu1 %v15136_v0 }
 0x163   : > { %14101 = vmatprep.subr.bf16.mxu1 %v15136_v0 }
 0x164   : > { %14086 = vmatpush3.bf16.msra.mxu0 %v15136_v0 }
 0x165   : > { %14087 = vmatprep.subr.bf16.mxu0 %v15136_v0 }
 0x166   : > { %14102 = vmatpush3.bf16.msra.mxu1 %v15136_v0 }
 0x167   : > { %14103 = vmatprep.subr.bf16.mxu1 %v15136_v0 }
 0x168   : > { %14088 = vmatpush3.bf16.msra.mxu0 %v15136_v0 }
 0x169   : > { %14089 = vmatprep.subr.bf16.mxu0 %v15136_v0 }
 0x16a   : > { %14104 = vmatpush3.bf16.msra.mxu1 %v15136_v0 }
 0x16b   : > { %14105 = vmatprep.subr.bf16.mxu1 %v15136_v0 }
 0x16c   : > { %14090 = vmatpush3.bf16.msra.mxu0 %v15136_v0 }
 0x16d   : > { %14091 = vmatprep.subr.bf16.mxu0 %v15136_v0 }
 0x16e   : > { %14106 = vmatpush3.bf16.msra.mxu1 %v15136_v0 }
 0x16f   : > { %14107 = vmatprep.subr.bf16.mxu1 %v15136_v0 }
 0x170   : > { %14092 = vmatpush3.bf16.msra.mxu0 %v15136_v0 }
 0x171   : > { %14093 = vmatprep.subr.bf16.mxu0 %v15136_v0 }
 0x172   : > { %v11307_v50 = vpop.f32.mrb[10].mxu0  ;;  %14108 = vmatpush3.bf16.msra.mxu1 %v15136_v0 }
 0x173   : > { %v11308_v52 = vpop.f32.mrb[11].mxu0  ;;  %14109 = vmatprep.subr.bf16.mxu1 %v15136_v0 }
 0x174   : > { %14094 = vmatpush3.bf16.msra.mxu0 %v15136_v0  ;;  %v11309_v53 = vadd.f32 %v11308_v52, %v11307_v50  ;;  %v11342_v57 = vpop.f32.mrb[10].mxu1  ;;  %v15855_v52 = vpop.permute.xlu0 %3812 }
 0x175   : > { %14111 = vmatprep.subr.bf16.mxu0 %v15136_v0  ;;  %v11343_v58 = vpop.f32.mrb[11].mxu1  ;;  %vm3815_vm0 = vcmp.eq.s32.totalorder %v3793_v51, %v15855_v52  ;;  %vm3814_vm1 = vcmp.eq.s32.totalorder %v15844_v46, %v15855_v52 }
 0x176   : > { %v965_v54 = vadd.f32 %v11309_v53, %v889_v43  ;;  %14110 = vmatpush3.bf16.msra.mxu1 %v15136_v0  ;;  %v11344_v59 = vadd.f32 %v11343_v58, %v11342_v57 }
 0x177   : > { %2747 = vmatmul.mubr.f32.vlgmr.msra.gmra.mrb[34].mxu0 %v2522_v29  ;;  %2976 = vmatprep.subr.mxu1 %v15137_v1  ;;  %v15812_v29 = vand.u32 4294901760, %v216_v28 }
 0x178   : > { %14112 = vmatpush3.bf16.msra.mxu0 %v15136_v0  ;;  %v1037_v56 = vadd.f32 %v1036_v44, %v965_v54  ;;  %2965 = vmatprep.mubr.f32.mxu0 %v2964_v55  ;;  %v1260_v62 = vpop.f32.mrb[12].mxu1  ;;  %v15035_v54 = vld [vmem:[%s15253_s25 + $0x8] sm:$0xff] }
 0x179   : > { %14113 = vmatprep.subr.bf16.mxu0 %v15136_v0  ;;  %2891 = vmatmul.mubr.f32.vlgmr.msra.gmra.mrb[34].mxu1 %v15653_v25  ;;  %v1262_v63 = vpop.f32.mrb[13].mxu1  ;;  %v15819_v32 = vsub.f32 %v216_v28, %v15812_v29  ;;  %v3831_v55 = vsel %vm3815_vm0, %v15035_v54, 0.0 }
 0x17a   : > { %v1109_v61 = vadd.f32 %v11344_v59, %v1037_v56  ;;  %2977 = vmatpush1.msra.mxu1 %v15137_v1  ;;  %3041 = vmatprep.mubr.f32.mxu1 %v15709_v47  ;;  %v15870_v56 = vand.u32 4294901760, %v3831_v55 }
 0x17b   : > { %3048 = vmatprep.subr.mxu1 %v15137_v1  ;;  %v3414_v37 = vand.u32 4294901760, %v15819_v32 }
 0x17c   : > { %14114 = vmatpush3.bf16.msra.mxu0 %v15136_v0  ;;  %v1334_v3 = vpop.f32.mrb[14].mxu1  ;;  %v3912_v57 = vsub.f32 %v3831_v55, %v15870_v56 }
 0x17d   : > { %14115 = vmatprep.subr.bf16.mxu0 %v15136_v0  ;;  %3043 = vmatmul.mubr.f32.vlgmr.msra.gmra.mrb[36].mxu1 %v15736_v2  ;;  %v1336_v4 = vpop.f32.mrb[15].mxu1  ;;  %v3415_v40 = vsub.f32 %v15819_v32, %v3414_v37 }
 0x17e   : > { %3049 = vmatpush1.msra.mxu1 %v15137_v1  ;;  %3114 = vmatprep.mubr.f32.mxu1 %v2961_v48  ;;  %v3913_v58 = vand.u32 4294901760, %v3912_v57 }
 0x17f   : > { %14127 = vmatprep.subr.bf16.mxu1 %v15136_v0  ;;  %v3416_v44 = vand.u32 4294901760, %v3415_v40  ;;  %v3794_v40 = vadd.s32 256, %v15844_v46 }
 0x180   : > { %14116 = vmatpush3.bf16.msra.mxu0 %v15136_v0  ;;  %v3914_v60 = vsub.f32 %v3912_v57, %v3913_v58 }
 0x181   : > { %14117 = vmatprep.subr.bf16.mxu0 %v15136_v0  ;;  %3117 = vmatmul.mubr.f32.vlgmr.msra.gmra.mrb[38].mxu1 %v15745_v5  ;;  %vm3816_vm3 = vcmp.eq.s32.totalorder %v3794_v40, %v15855_v52 }
 0x182   : > { %14128 = vmatpush3.bf16.msra.mxu1 %v15136_v0  ;;  %3189 = vmatprep.mubr.f32.mxu1 %v2962_v49 }
 0x183   : > { %14129 = vmatprep.subr.bf16.mxu1 %v15136_v0 }
 0x184   : > { %14118 = vmatpush3.bf16.msra.mxu0 %v15136_v0 }
 0x185   : > { %14119 = vmatprep.subr.bf16.mxu0 %v15136_v0 }
 0x186   : > { %14130 = vmatpush3.bf16.msra.mxu1 %v15136_v0 }
 0x187   : > { %14131 = vmatprep.subr.bf16.mxu1 %v15136_v0 }
 0x188   : > { %14120 = vmatpush3.bf16.msra.mxu0 %v15136_v0 }
 0x189   : > { %14121 = vmatprep.subr.bf16.mxu0 %v15136_v0 }
 0x18a   : > { %14132 = vmatpush3.bf16.msra.mxu1 %v15136_v0 }
 0x18b   : > { %14133 = vmatprep.subr.bf16.mxu1 %v15136_v0 }
 0x18c   : > { %14122 = vmatpush3.bf16.msra.mxu0 %v15136_v0 }
 0x18d   : > { %14123 = vmatprep.subr.bf16.mxu0 %v15136_v0 }
 0x18e   : > { %14134 = vmatpush3.bf16.msra.mxu1 %v15136_v0 }
 0x18f   : > { %14135 = vmatprep.subr.bf16.mxu1 %v15136_v0 }
 0x190   : > { %14124 = vmatpush3.bf16.msra.mxu0 %v15136_v0 }
 0x191   : > { %14125 = vmatprep.subr.bf16.mxu0 %v15136_v0 }
 0x192   : > { %v11377_v8 = vpop.f32.mrb[12].mxu0  ;;  %14136 = vmatpush3.bf16.msra.mxu1 %v15136_v0 }
 0x193   : > { %v11378_v9 = vpop.f32.mrb[13].mxu0  ;;  %14137 = vmatprep.subr.bf16.mxu1 %v15136_v0 }
 0x194   : > { %14126 = vmatpush3.bf16.msra.mxu0 %v15136_v0  ;;  %v11379_v12 = vadd.f32 %v11378_v9, %v11377_v8  ;;  %v15036_v9 = vld [vmem:[%s15253_s25] sm:$0xff] }
 0x195   : > { %3198 = vmatprep.subr.mxu0 %v15137_v1 }
 0x196   : > { %v1189_v13 = vadd.f32 %v11379_v12, %v1109_v61  ;;  %v1482_v14 = vpop.f32.mrb[14].mxu0  ;;  %14138 = vmatpush3.bf16.msra.mxu1 %v15136_v0 }
 0x197   : > { %2971 = vmatmul.mubr.f32.vlgmr.msra.gmra.mrb[36].mxu0 %v2970_v10  ;;  %v1484_v16 = vpop.f32.mrb[15].mxu0  ;;  %14139 = vmatprep.subr.bf16.mxu1 %v15136_v0  ;;  %v3830_v10 = vsel %vm3814_vm1, %v15036_v9, 0.0  ;;  %vm7420_vm1 = vcmp.eq.s32.totalorder %v15844_v46, 0 }
 0x198   : > { %v1261_v17 = vadd.f32 %v1260_v62, %v1189_v13  ;;  %3199 = vmatpush1.msra.mxu0 %v15137_v1  ;;  %3263 = vmatprep.mubr.f32.mxu0 %v15709_v47  ;;  %v15907_v12 = vand.u32 4294901760, %v3830_v10 }
 0x199   : > { %14143 = vmatprep.subr.bf16.mxu0 %v15136_v0 }
 0x19a   : > { %v1335_v18 = vadd.f32 %v1334_v3, %v1261_v17  ;;  %14140 = vmatpush3.bf16.msra.mxu1 %v15136_v0  ;;  %v3795_v17 = vadd.s32 384, %v15844_v46 }
 0x19b   : > { %3265 = vmatmul.mubr.f32.vlgmr.msra.gmra.mrb[38].mxu0 %v15736_v2  ;;  %14141 = vmatprep.subr.bf16.mxu1 %v15136_v0 }
 0x19c   : > { %14144 = vmatpush3.bf16.msra.mxu0 %v15136_v0  ;;  %3335 = vmatprep.mubr.f32.mxu0 %v15709_v47  ;;  %v11412_v21 = vpop.f32.mrb[16].mxu1  ;;  %vm3817_vm2 = vcmp.eq.s32.totalorder %v3795_v17, %v15855_v52 }
 0x19d   : > { %14145 = vmatprep.subr.bf16.mxu0 %v15136_v0  ;;  %v11413_v23 = vpop.f32.mrb[17].mxu1 }
 0x19e   : > { %14142 = vmatpush3.bf16.msra.mxu1 %v15136_v0  ;;  %v11414_v24 = vadd.f32 %v11413_v23, %v11412_v21  ;;  %v3833_v23 = vsel %vm3817_vm2, %v15037_v22, 0.0  ;;  %vm15139_vm2 = vmmov 0  }
 0x19f   : > { %14159 = vmatprep.subr.bf16.mxu1 %v15136_v0  ;;  %v15940_v28 = vand.u32 4294901760, %v3833_v23 }
 0x1a0   : > { %14146 = vmatpush3.bf16.msra.mxu0 %v15136_v0  ;;  %v1411_v25 = vadd.f32 %v11414_v24, %v1335_v18 }
 0x1a1   : > { %14147 = vmatprep.subr.bf16.mxu0 %v15136_v0  ;;  %3193 = vmatmul.mubr.f32.vlgmr.msra.gmra.mrb[40].mxu1 %v2968_v6 }
 0x1a2   : > { %14160 = vmatpush3.bf16.msra.mxu1 %v15136_v0  ;;  %v1483_v27 = vadd.f32 %v1482_v14, %v1411_v25  ;;  %3411 = vmatprep.mubr.f32.mxu1 %v3410_v26 }
 0x1a3   : > { %14161 = vmatprep.subr.bf16.mxu1 %v15136_v0 }
 0x1a4   : > { %14148 = vmatpush3.bf16.msra.mxu0 %v15136_v0 }
 0x1a5   : > { %14149 = vmatprep.subr.bf16.mxu0 %v15136_v0 }
 0x1a6   : > { %14162 = vmatpush3.bf16.msra.mxu1 %v15136_v0 }
 0x1a7   : > { %14163 = vmatprep.subr.bf16.mxu1 %v15136_v0 }
 0x1a8   : > { %14150 = vmatpush3.bf16.msra.mxu0 %v15136_v0 }
 0x1a9   : > { %14151 = vmatprep.subr.bf16.mxu0 %v15136_v0 }
 0x1aa   : > { %14164 = vmatpush3.bf16.msra.mxu1 %v15136_v0 }
 0x1ab   : > { %14165 = vmatprep.subr.bf16.mxu1 %v15136_v0 }
 0x1ac   : > { %14152 = vmatpush3.bf16.msra.mxu0 %v15136_v0 }
 0x1ad   : > { %14153 = vmatprep.subr.bf16.mxu0 %v15136_v0 }
 0x1ae   : > { %14166 = vmatpush3.bf16.msra.mxu1 %v15136_v0 }
 0x1af   : > { %14167 = vmatprep.subr.bf16.mxu1 %v15136_v0 }
 0x1b0   : > { %14154 = vmatpush3.bf16.msra.mxu0 %v15136_v0 }
 0x1b1   : > { %14155 = vmatprep.subr.bf16.mxu0 %v15136_v0 }
 0x1b2   : > { %14168 = vmatpush3.bf16.msra.mxu1 %v15136_v0 }
 0x1b3   : > { %14169 = vmatprep.subr.bf16.mxu1 %v15136_v0 }
 0x1b4   : > { %14156 = vmatpush3.bf16.msra.mxu0 %v15136_v0 }
 0x1b5   : > { %14157 = vmatprep.subr.bf16.mxu0 %v15136_v0 }
 0x1b6   : > { %v11447_v30 = vpop.f32.mrb[16].mxu0  ;;  %14170 = vmatpush3.bf16.msra.mxu1 %v15136_v0 }
 0x1b7   : > { %v11448_v31 = vpop.f32.mrb[17].mxu0  ;;  %14171 = vmatprep.subr.bf16.mxu1 %v15136_v0 }
 0x1b8   : > { %14158 = vmatpush3.bf16.msra.mxu0 %v15136_v0  ;;  %v11449_v33 = vadd.f32 %v11448_v31, %v11447_v30  ;;  %v15949_v31 = vsub.f32 %v3833_v23, %v15940_v28  ;;  %v15040_v23 = vld [vmem:[%s15253_s25 + $0x20] sm:$0xff] }
 0x1b9   : > { %3422 = vmatprep.subr.mxu0 %v15137_v1 }
 0x1ba   : > { %v1555_v34 = vadd.f32 %v11449_v33, %v1483_v27  ;;  %v1706_v35 = vpop.f32.mrb[18].mxu0  ;;  %14172 = vmatpush3.bf16.msra.mxu1 %v15136_v0 }
 0x1bb   : > { %3337 = vmatmul.mubr.f32.vlgmr.msra.gmra.mrb[40].mxu0 %v15736_v2  ;;  %v1708_v36 = vpop.f32.mrb[19].mxu0  ;;  %14173 = vmatprep.subr.bf16.mxu1 %v15136_v0  ;;  %v3915_v2 = vand.u32 4294901760, %v3914_v60 }
 0x1bc   : > { %3423 = vmatpush1.msra.mxu0 %v15137_v1  ;;  %3487 = vmatprep.mubr.f32.mxu0 %v15771_v15  ;;  %v11482_v42 = vpop.f32.mrb[18].mxu1 }
 0x1bd   : > { %3494 = vmatprep.subr.mxu0 %v15137_v1  ;;  %v11483_v43 = vpop.f32.mrb[19].mxu1 }
 0x1be   : > { %v1780_v38 = vpop.f32.mrb[20].mxu0  ;;  %14174 = vmatpush3.bf16.msra.mxu1 %v15136_v0  ;;  %v11484_v45 = vadd.f32 %v11483_v43, %v11482_v42  ;;  %v3832_v42 = vsel %vm3816_vm3, %v15038_v41, 0.0 }
 0x1bf   : > { %3489 = vmatmul.mubr.f32.vlgmr.msra.gmra.mrb[42].mxu0 %v15812_v29  ;;  %v1782_v39 = vpop.f32.mrb[21].mxu0  ;;  %3644 = vmatprep.subr.mxu1 %v15137_v1  ;;  %v15987_v43 = vand.u32 4294901760, %v3832_v42 }
 0x1c0   : > { %3495 = vmatpush1.msra.mxu0 %v15137_v1  ;;  %3560 = vmatprep.mubr.f32.mxu0 %v15779_v19  ;;  %v1635_v47 = vadd.f32 %v11484_v45, %v1555_v34  ;;  %v1928_v48 = vpop.f32.mrb[20].mxu1 }
 0x1c1   : > { %14175 = vmatprep.subr.bf16.mxu0 %v15136_v0  ;;  %3417 = vmatmul.mubr.f32.vlgmr.msra.gmra.mrb[42].mxu1 %v3416_v44  ;;  %v1930_v49 = vpop.f32.mrb[21].mxu1 }
 0x1c2   : > { %v1707_v50 = vadd.f32 %v1706_v35, %v1635_v47  ;;  %3645 = vmatpush1.msra.mxu1 %v15137_v1  ;;  %3709 = vmatprep.mubr.f32.mxu1 %v15771_v15 }
 0x1c3   : > { %3563 = vmatmul.mubr.f32.vlgmr.msra.gmra.mrb[44].mxu0 %v15819_v32  ;;  %14191 = vmatprep.subr.bf16.mxu1 %v15136_v0  ;;  %v4359_v32 = vand.u32 4294901760, %v15949_v31 }
 0x1c4   : > { %14176 = vmatpush3.bf16.msra.mxu0 %v15136_v0  ;;  %3635 = vmatprep.mubr.f32.mxu0 %v3408_v20  ;;  %v1781_v53 = vadd.f32 %v1780_v38, %v1707_v50 }
 0x1c5   : > { %14177 = vmatprep.subr.bf16.mxu0 %v15136_v0  ;;  %3711 = vmatmul.mubr.f32.vlgmr.msra.gmra.mrb[44].mxu1 %v15812_v29  ;;  %v4360_v35 = vsub.f32 %v15949_v31, %v4359_v32 }
 0x1c6   : > { %14192 = vmatpush3.bf16.msra.mxu1 %v15136_v0  ;;  %3781 = vmatprep.mubr.f32.mxu1 %v15771_v15  ;;  %v15915_v15 = vsub.f32 %v3830_v10, %v15907_v12 }
 0x1c7   : > { %14193 = vmatprep.subr.bf16.mxu1 %v15136_v0  ;;  %v4361_v38 = vand.u32 4294901760, %v4360_v35 }
 0x1c8   : > { %14178 = vmatpush3.bf16.msra.mxu0 %v15136_v0  ;;  %v3919_v16 = vand.u32 4294901760, %v15915_v15 }
 0x1c9   : > { %14179 = vmatprep.subr.bf16.mxu0 %v15136_v0 }
 0x1ca   : > { %14194 = vmatpush3.bf16.msra.mxu1 %v15136_v0  ;;  %v3920_v18 = vsub.f32 %v15915_v15, %v3919_v16 }
 0x1cb   : > { %14195 = vmatprep.subr.bf16.mxu1 %v15136_v0 }
 0x1cc   : > { %14180 = vmatpush3.bf16.msra.mxu0 %v15136_v0  ;;  %v3921_v24 = vand.u32 4294901760, %v3920_v18 }
 0x1cd   : > { %14181 = vmatprep.subr.bf16.mxu0 %v15136_v0 }
 0x1ce   : > { %14196 = vmatpush3.bf16.msra.mxu1 %v15136_v0 }
 0x1cf   : > { %14197 = vmatprep.subr.bf16.mxu1 %v15136_v0 }
 0x1d0   : > { %14182 = vmatpush3.bf16.msra.mxu0 %v15136_v0 }
 0x1d1   : > { %14183 = vmatprep.subr.bf16.mxu0 %v15136_v0 }
 0x1d2   : > { %14198 = vmatpush3.bf16.msra.mxu1 %v15136_v0 }
 0x1d3   : > { %14199 = vmatprep.subr.bf16.mxu1 %v15136_v0 }
 0x1d4   : > { %14184 = vmatpush3.bf16.msra.mxu0 %v15136_v0 }
 0x1d5   : > { %14185 = vmatprep.subr.bf16.mxu0 %v15136_v0 }
 0x1d6   : > { %14200 = vmatpush3.bf16.msra.mxu1 %v15136_v0 }
 0x1d7   : > { %14201 = vmatprep.subr.bf16.mxu1 %v15136_v0 }
 0x1d8   : > { %14186 = vmatpush3.bf16.msra.mxu0 %v15136_v0 }
 0x1d9   : > { %14187 = vmatprep.subr.bf16.mxu0 %v15136_v0 }
 0x1da   : > { %14202 = vmatpush3.bf16.msra.mxu1 %v15136_v0 }
 0x1db   : > { %14203 = vmatprep.subr.bf16.mxu1 %v15136_v0 }
 0x1dc   : > { %14188 = vmatpush3.bf16.msra.mxu0 %v15136_v0 }
 0x1dd   : > { %14189 = vmatprep.subr.bf16.mxu0 %v15136_v0 }
 0x1de   : > { %v11517_v59 = vpop.f32.mrb[22].mxu0  ;;  %14204 = vmatpush3.bf16.msra.mxu1 %v15136_v0 }
 0x1df   : > { %v11518_v61 = vpop.f32.mrb[23].mxu0  ;;  %14205 = vmatprep.subr.bf16.mxu1 %v15136_v0 }
 0x1e0   : > { %14190 = vmatpush3.bf16.msra.mxu0 %v15136_v0  ;;  %v11519_v62 = vadd.f32 %v11518_v61, %v11517_v59  ;;  %v11552_v4 = vpop.f32.mrb[22].mxu1 }
 0x1e1   : > { %14207 = vmatprep.subr.bf16.mxu0 %v15136_v0  ;;  %v11553_v5 = vpop.f32.mrb[23].mxu1 }
 0x1e2   : > { %v1857_v63 = vadd.f32 %v11519_v62, %v1781_v53  ;;  %14206 = vmatpush3.bf16.msra.mxu1 %v15136_v0  ;;  %v11554_v6 = vadd.f32 %v11553_v5, %v11552_v4  ;;  %v15039_v5 = vld [vmem:[%s15253_s25 + $0x28] sm:$0xff] }
 0x1e3   : > { %3639 = vmatmul.mubr.f32.vlgmr.msra.gmra.mrb[46].mxu0 %v3414_v37  ;;  %3927 = vmatprep.subr.mxu1 %v15137_v1 }
 0x1e4   : > { %14208 = vmatpush3.bf16.msra.mxu0 %v15136_v0  ;;  %v1929_v3 = vadd.f32 %v1928_v48, %v1857_v63  ;;  %3916 = vmatprep.mubr.f32.mxu0 %v3915_v2  ;;  %v2152_v8 = vpop.f32.mrb[24].mxu1  ;;  %v15994_v48 = vsub.f32 %v3832_v42, %v15987_v43 }
 0x1e5   : > { %14209 = vmatprep.subr.bf16.mxu0 %v15136_v0  ;;  %3783 = vmatmul.mubr.f32.vlgmr.msra.gmra.mrb[46].mxu1 %v15812_v29  ;;  %v2154_v11 = vpop.f32.mrb[25].mxu1 }
 0x1e6   : > { %v2001_v7 = vadd.f32 %v11554_v6, %v1929_v3  ;;  %3928 = vmatpush1.msra.mxu1 %v15137_v1  ;;  %3992 = vmatprep.mubr.f32.mxu1 %v15870_v56  ;;  %v4365_v53 = vand.u32 4294901760, %v15994_v48  ;;  %v3797_v3 = vadd.s32 640, %v15844_v46 }
 0x1e7   : > { %3999 = vmatprep.subr.mxu1 %v15137_v1 }
 0x1e8   : > { %14210 = vmatpush3.bf16.msra.mxu0 %v15136_v0  ;;  %v2226_v13 = vpop.f32.mrb[26].mxu1  ;;  %vm3819_vm4 = vcmp.eq.s32.totalorder %v3797_v3, %v15855_v52 }
 0x1e9   : > { %14211 = vmatprep.subr.bf16.mxu0 %v15136_v0  ;;  %3994 = vmatmul.mubr.f32.vlgmr.msra.gmra.mrb[48].mxu1 %v15907_v12  ;;  %v2228_v14 = vpop.f32.mrb[27].mxu1  ;;  %v3835_v6 = vsel %vm3819_vm4, %v15039_v5, 0.0 }
 0x1ea   : > { %4000 = vmatpush1.msra.mxu1 %v15137_v1  ;;  %4065 = vmatprep.mubr.f32.mxu1 %v3912_v57 }
 0x1eb   : > { %14223 = vmatprep.subr.bf16.mxu1 %v15136_v0 }
 0x1ec   : > { %14212 = vmatpush3.bf16.msra.mxu0 %v15136_v0 }
 0x1ed   : > { %14213 = vmatprep.subr.bf16.mxu0 %v15136_v0  ;;  %4068 = vmatmul.mubr.f32.vlgmr.msra.gmra.mrb[50].mxu1 %v15915_v15 }
 0x1ee   : > { %14224 = vmatpush3.bf16.msra.mxu1 %v15136_v0  ;;  %4140 = vmatprep.mubr.f32.mxu1 %v3913_v58 }
 0x1ef   : > { %14225 = vmatprep.subr.bf16.mxu1 %v15136_v0 }
 0x1f0   : > { %14214 = vmatpush3.bf16.msra.mxu0 %v15136_v0 }
 0x1f1   : > { %14215 = vmatprep.subr.bf16.mxu0 %v15136_v0 }
 0x1f2   : > { %14226 = vmatpush3.bf16.msra.mxu1 %v15136_v0 }
 0x1f3   : > { %14227 = vmatprep.subr.bf16.mxu1 %v15136_v0 }
 0x1f4   : > { %14216 = vmatpush3.bf16.msra.mxu0 %v15136_v0 }
 0x1f5   : > { %14217 = vmatprep.subr.bf16.mxu0 %v15136_v0 }
 0x1f6   : > { %14228 = vmatpush3.bf16.msra.mxu1 %v15136_v0 }
 0x1f7   : > { %14229 = vmatprep.subr.bf16.mxu1 %v15136_v0 }
 0x1f8   : > { %14218 = vmatpush3.bf16.msra.mxu0 %v15136_v0 }
 0x1f9   : > { %14219 = vmatprep.subr.bf16.mxu0 %v15136_v0 }
 0x1fa   : > { %14230 = vmatpush3.bf16.msra.mxu1 %v15136_v0 }
 0x1fb   : > { %14231 = vmatprep.subr.bf16.mxu1 %v15136_v0 }
 0x1fc   : > { %14220 = vmatpush3.bf16.msra.mxu0 %v15136_v0 }
 0x1fd   : > { %14221 = vmatprep.subr.bf16.mxu0 %v15136_v0 }
 0x1fe   : > { %v11587_v19 = vpop.f32.mrb[24].mxu0  ;;  %14232 = vmatpush3.bf16.msra.mxu1 %v15136_v0 }
 0x1ff   : > { %v11588_v20 = vpop.f32.mrb[25].mxu0  ;;  %14233 = vmatprep.subr.bf16.mxu1 %v15136_v0 }
 0x200   : > { %14222 = vmatpush3.bf16.msra.mxu0 %v15136_v0  ;;  %v11589_v21 = vadd.f32 %v11588_v20, %v11587_v19 }
 0x201   : > { %4149 = vmatprep.subr.mxu0 %v15137_v1 }
 0x202   : > { %v2081_v25 = vadd.f32 %v11589_v21, %v2001_v7  ;;  %v2374_v26 = vpop.f32.mrb[26].mxu0  ;;  %14234 = vmatpush3.bf16.msra.mxu1 %v15136_v0  ;;  %v16037_v7 = vand.u32 4294901760, %v3835_v6 }
 0x203   : > { %3922 = vmatmul.mubr.f32.vlgmr.msra.gmra.mrb[48].mxu0 %v3921_v24  ;;  %v2376_v27 = vpop.f32.mrb[27].mxu0  ;;  %14235 = vmatprep.subr.bf16.mxu1 %v15136_v0 }
 0x204   : > { %v2153_v29 = vadd.f32 %v2152_v8, %v2081_v25  ;;  %4214 = vmatprep.mubr.f32.mxu0 %v15870_v56  ;;  %4150 = vmatpush1.msra.mxu0 %v15137_v1  ;;  %v4804_v8 = vsub.f32 %v3835_v6, %v16037_v7 }
 0x205   : > { %14239 = vmatprep.subr.bf16.mxu0 %v15136_v0 }
 0x206   : > { %v2227_v30 = vadd.f32 %v2226_v13, %v2153_v29  ;;  %14236 = vmatpush3.bf16.msra.mxu1 %v15136_v0  ;;  %v4805_v9 = vand.u32 4294901760, %v4804_v8 }
 0x207   : > { %4216 = vmatmul.mubr.f32.vlgmr.msra.gmra.mrb[50].mxu0 %v15907_v12  ;;  %14237 = vmatprep.subr.bf16.mxu1 %v15136_v0 }
 0x208   : > { %14240 = vmatpush3.bf16.msra.mxu0 %v15136_v0  ;;  %4286 = vmatprep.mubr.f32.mxu0 %v15870_v56  ;;  %v11622_v33 = vpop.f32.mrb[28].mxu1  ;;  %v4366_v56 = vsub.f32 %v15994_v48, %v4365_v53 }
 0x209   : > { %14241 = vmatprep.subr.bf16.mxu0 %v15136_v0  ;;  %v11623_v34 = vpop.f32.mrb[29].mxu1 }
 0x20a   : > { %14238 = vmatpush3.bf16.msra.mxu1 %v15136_v0  ;;  %v11624_v36 = vadd.f32 %v11623_v34, %v11622_v33  ;;  %v4367_v60 = vand.u32 4294901760, %v4366_v56  ;;  %v3798_v56 = vadd.s32 768, %v15844_v46 }
 0x20b   : > { %14255 = vmatprep.subr.bf16.mxu1 %v15136_v0 }
 0x20c   : > { %14242 = vmatpush3.bf16.msra.mxu0 %v15136_v0  ;;  %v2303_v37 = vadd.f32 %v11624_v36, %v2227_v30  ;;  %v15041_v36 = vld [vmem:[%s15253_s25 + $0x38] sm:$0xff]  ;;  %vm3820_vm8 = vcmp.eq.s32.totalorder %v3798_v56, %v15855_v52 }
 0x20d   : > { %14243 = vmatprep.subr.bf16.mxu0 %v15136_v0  ;;  %4144 = vmatmul.mubr.f32.vlgmr.msra.gmra.mrb[52].mxu1 %v3919_v16  ;;  %v3796_v16 = vadd.s32 512, %v15844_v46 }
 0x20e   : > { %14256 = vmatpush3.bf16.msra.mxu1 %v15136_v0  ;;  %v2375_v39 = vadd.f32 %v2374_v26, %v2303_v37  ;;  %4362 = vmatprep.mubr.f32.mxu1 %v4361_v38 }
 0x20f   : > { %14257 = vmatprep.subr.bf16.mxu1 %v15136_v0  ;;  %vm3818_vm6 = vcmp.eq.s32.totalorder %v3796_v16, %v15855_v52 }
 0x210   : > { %14244 = vmatpush3.bf16.msra.mxu0 %v15136_v0  ;;  %v3834_v24 = vsel %vm3818_vm6, %v15040_v23, 0.0 }
 0x211   : > { %14245 = vmatprep.subr.bf16.mxu0 %v15136_v0  ;;  %v16080_v26 = vand.u32 4294901760, %v3834_v24 }
 0x212   : > { %14258 = vmatpush3.bf16.msra.mxu1 %v15136_v0 }
 0x213   : > { %14259 = vmatprep.subr.bf16.mxu1 %v15136_v0  ;;  %v16088_v29 = vsub.f32 %v3834_v24, %v16080_v26 }
 0x214   : > { %14246 = vmatpush3.bf16.msra.mxu0 %v15136_v0 }
 0x215   : > { %14247 = vmatprep.subr.bf16.mxu0 %v15136_v0  ;;  %v4811_v30 = vand.u32 4294901760, %v16088_v29 }
 0x216   : > { %14260 = vmatpush3.bf16.msra.mxu1 %v15136_v0 }
 0x217   : > { %14261 = vmatprep.subr.bf16.mxu1 %v15136_v0 }
 0x218   : > { %14248 = vmatpush3.bf16.msra.mxu0 %v15136_v0 }
 0x219   : > { %14249 = vmatprep.subr.bf16.mxu0 %v15136_v0 }
 0x21a   : > { %14262 = vmatpush3.bf16.msra.mxu1 %v15136_v0 }
 0x21b   : > { %14263 = vmatprep.subr.bf16.mxu1 %v15136_v0 }
 0x21c   : > { %14250 = vmatpush3.bf16.msra.mxu0 %v15136_v0 }
 0x21d   : > { %14251 = vmatprep.subr.bf16.mxu0 %v15136_v0 }
 0x21e   : > { %14264 = vmatpush3.bf16.msra.mxu1 %v15136_v0 }
 0x21f   : > { %14265 = vmatprep.subr.bf16.mxu1 %v15136_v0 }
 0x220   : > { %14252 = vmatpush3.bf16.msra.mxu0 %v15136_v0 }
 0x221   : > { %14253 = vmatprep.subr.bf16.mxu0 %v15136_v0 }
 0x222   : > { %v11657_v44 = vpop.f32.mrb[28].mxu0  ;;  %14266 = vmatpush3.bf16.msra.mxu1 %v15136_v0 }
 0x223   : > { %v11658_v45 = vpop.f32.mrb[29].mxu0  ;;  %14267 = vmatprep.subr.bf16.mxu1 %v15136_v0 }
 0x224   : > { %14254 = vmatpush3.bf16.msra.mxu0 %v15136_v0  ;;  %v11659_v47 = vadd.f32 %v11658_v45, %v11657_v44 }
 0x225   : > { %4373 = vmatprep.subr.mxu0 %v15137_v1 }
 0x226   : > { %v2447_v49 = vadd.f32 %v11659_v47, %v2375_v39  ;;  %v2598_v50 = vpop.f32.mrb[30].mxu0  ;;  %14268 = vmatpush3.bf16.msra.mxu1 %v15136_v0 }
 0x227   : > { %4288 = vmatmul.mubr.f32.vlgmr.msra.gmra.mrb[52].mxu0 %v15907_v12  ;;  %v2600_v51 = vpop.f32.mrb[31].mxu0  ;;  %14269 = vmatprep.subr.bf16.mxu1 %v15136_v0  ;;  %v4806_v12 = vsub.f32 %v4804_v8, %v4805_v9 }
 0x228   : > { %4438 = vmatprep.mubr.f32.mxu0 %v15940_v28  ;;  %4374 = vmatpush1.msra.mxu0 %v15137_v1  ;;  %v11692_v57 = vpop.f32.mrb[30].mxu1 }
 0x229   : > { %4445 = vmatprep.subr.mxu0 %v15137_v1  ;;  %v11693_v58 = vpop.f32.mrb[31].mxu1  ;;  %v4807_v15 = vand.u32 4294901760, %v4806_v12 }
 0x22a   : > { %v2672_v54 = vpop.f32.mrb[32].mxu0  ;;  %14270 = vmatpush3.bf16.msra.mxu1 %v15136_v0  ;;  %v11694_v59 = vadd.f32 %v11693_v58, %v11692_v57  ;;  %v15042_v57 = vld [vmem:[%s15253_s25 + $0x30] sm:$0xff] }
 0x22b   : > { %4440 = vmatmul.mubr.f32.vlgmr.msra.gmra.mrb[54].mxu0 %v15987_v43  ;;  %v2674_v55 = vpop.f32.mrb[33].mxu0  ;;  %4595 = vmatprep.subr.mxu1 %v15137_v1  ;;  %v3836_v58 = vsel %vm3820_vm8, %v15042_v57, 0.0 }
 0x22c   : > { %4511 = vmatprep.mubr.f32.mxu0 %v15949_v31  ;;  %4446 = vmatpush1.msra.mxu0 %v15137_v1  ;;  %v2527_v61 = vadd.f32 %v11694_v59, %v2447_v49  ;;  %v2820_v62 = vpop.f32.mrb[32].mxu1  ;;  %v3799_v31 = vadd.s32 896, %v15844_v46  ;;  %v16160_v59 = vand.u32 4294901760, %v3836_v58 }
 0x22d   : > { %14271 = vmatprep.subr.bf16.mxu0 %v15136_v0  ;;  %4368 = vmatmul.mubr.f32.vlgmr.msra.gmra.mrb[54].mxu1 %v4367_v60  ;;  %v2822_v63 = vpop.f32.mrb[33].mxu1 }
 0x22e   : > { %v2599_v2 = vadd.f32 %v2598_v50, %v2527_v61  ;;  %4596 = vmatpush1.msra.mxu1 %v15137_v1  ;;  %4660 = vmatprep.mubr.f32.mxu1 %v15940_v28  ;;  %vm3821_vm7 = vcmp.eq.s32.totalorder %v3799_v31, %v15855_v52  ;;  %v16167_v63 = vsub.f32 %v3836_v58, %v16160_v59 }
 0x22f   : > { %4514 = vmatmul.mubr.f32.vlgmr.msra.gmra.mrb[56].mxu0 %v15994_v48  ;;  %14287 = vmatprep.subr.bf16.mxu1 %v15136_v0  ;;  %v3837_v37 = vsel %vm3821_vm7, %v15041_v36, 0.0 }
 0x230   : > { %14272 = vmatpush3.bf16.msra.mxu0 %v15136_v0  ;;  %4586 = vmatprep.mubr.f32.mxu0 %v4359_v32  ;;  %v2673_v4 = vadd.f32 %v2672_v54, %v2599_v2  ;;  %v4812_v32 = vsub.f32 %v16088_v29, %v4811_v30  ;;  %v16113_v42 = vand.u32 4294901760, %v3837_v37  ;;  %v5257_v5 = vand.u32 4294901760, %v16167_v63 }
 0x231   : > { %14273 = vmatprep.subr.bf16.mxu0 %v15136_v0  ;;  %4662 = vmatmul.mubr.f32.vlgmr.msra.gmra.mrb[56].mxu1 %v15987_v43 }
 0x232   : > { %14288 = vmatpush3.bf16.msra.mxu1 %v15136_v0  ;;  %4732 = vmatprep.mubr.f32.mxu1 %v15940_v28  ;;  %v4813_v38 = vand.u32 4294901760, %v4812_v32  ;;  %v16122_v45 = vsub.f32 %v3837_v37, %v16113_v42 }
 0x233   : > { %14289 = vmatprep.subr.bf16.mxu1 %v15136_v0 }
 0x234   : > { %14274 = vmatpush3.bf16.msra.mxu0 %v15136_v0  ;;  %v5251_v47 = vand.u32 4294901760, %v16122_v45 }
 0x235   : > { %14275 = vmatprep.subr.bf16.mxu0 %v15136_v0 }
 0x236   : > { %14290 = vmatpush3.bf16.msra.mxu1 %v15136_v0  ;;  %v5252_v50 = vsub.f32 %v16122_v45, %v5251_v47 }
 0x237   : > { %14291 = vmatprep.subr.bf16.mxu1 %v15136_v0 }
 0x238   : > { %14276 = vmatpush3.bf16.msra.mxu0 %v15136_v0  ;;  %v5253_v54 = vand.u32 4294901760, %v5252_v50 }
 0x239   : > { %14277 = vmatprep.subr.bf16.mxu0 %v15136_v0 }
 0x23a   : > { %14292 = vmatpush3.bf16.msra.mxu1 %v15136_v0 }
 0x23b   : > { %14293 = vmatprep.subr.bf16.mxu1 %v15136_v0 }
 0x23c   : > { %14278 = vmatpush3.bf16.msra.mxu0 %v15136_v0 }
 0x23d   : > { %14279 = vmatprep.subr.bf16.mxu0 %v15136_v0 }
 0x23e   : > { %14294 = vmatpush3.bf16.msra.mxu1 %v15136_v0 }
 0x23f   : > { %14295 = vmatprep.subr.bf16.mxu1 %v15136_v0 }
 0x240   : > { %14280 = vmatpush3.bf16.msra.mxu0 %v15136_v0 }
 0x241   : > { %14281 = vmatprep.subr.bf16.mxu0 %v15136_v0 }
 0x242   : > { %14296 = vmatpush3.bf16.msra.mxu1 %v15136_v0 }
 0x243   : > { %14297 = vmatprep.subr.bf16.mxu1 %v15136_v0 }
 0x244   : > { %14282 = vmatpush3.bf16.msra.mxu0 %v15136_v0 }
 0x245   : > { %14283 = vmatprep.subr.bf16.mxu0 %v15136_v0 }
 0x246   : > { %14298 = vmatpush3.bf16.msra.mxu1 %v15136_v0 }
 0x247   : > { %14299 = vmatprep.subr.bf16.mxu1 %v15136_v0 }
 0x248   : > { %14284 = vmatpush3.bf16.msra.mxu0 %v15136_v0 }
 0x249   : > { %14285 = vmatprep.subr.bf16.mxu0 %v15136_v0 }
 0x24a   : > { %v11727_v10 = vpop.f32.mrb[34].mxu0  ;;  %14300 = vmatpush3.bf16.msra.mxu1 %v15136_v0 }
 0x24b   : > { %v11728_v11 = vpop.f32.mrb[35].mxu0  ;;  %14301 = vmatprep.subr.bf16.mxu1 %v15136_v0 }
 0x24c   : > { %14286 = vmatpush3.bf16.msra.mxu0 %v15136_v0  ;;  %v11729_v13 = vadd.f32 %v11728_v11, %v11727_v10  ;;  %v11762_v18 = vpop.f32.mrb[34].mxu1 }
 0x24d   : > { %14303 = vmatprep.subr.bf16.mxu0 %v15136_v0  ;;  %v11763_v19 = vpop.f32.mrb[35].mxu1 }
 0x24e   : > { %v2749_v14 = vadd.f32 %v11729_v13, %v2673_v4  ;;  %14302 = vmatpush3.bf16.msra.mxu1 %v15136_v0  ;;  %v11764_v20 = vadd.f32 %v11763_v19, %v11762_v18  ;;  %v15043_v19 = vld [vmem:[%s15253_s25 + $0x48] sm:$0xff] }
 0x24f   : > { %4590 = vmatmul.mubr.f32.vlgmr.msra.gmra.mrb[58].mxu0 %v4365_v53  ;;  %4819 = vmatprep.subr.mxu1 %v15137_v1 }
 0x250   : > { %14304 = vmatpush3.bf16.msra.mxu0 %v15136_v0  ;;  %v2821_v17 = vadd.f32 %v2820_v62, %v2749_v14  ;;  %4808 = vmatprep.mubr.f32.mxu0 %v4807_v15  ;;  %v3044_v22 = vpop.f32.mrb[36].mxu1 }
 0x251   : > { %14305 = vmatprep.subr.bf16.mxu0 %v15136_v0  ;;  %4734 = vmatmul.mubr.f32.vlgmr.msra.gmra.mrb[58].mxu1 %v15987_v43  ;;  %v3046_v25 = vpop.f32.mrb[37].mxu1 }
 0x252   : > { %v2893_v21 = vadd.f32 %v11764_v20, %v2821_v17  ;;  %4820 = vmatpush1.msra.mxu1 %v15137_v1  ;;  %4884 = vmatprep.mubr.f32.mxu1 %v16037_v7  ;;  %v3801_v17 = vadd.s32 1152, %v15844_v46 }
 0x253   : > { %4891 = vmatprep.subr.mxu1 %v15137_v1 }
 0x254   : > { %14306 = vmatpush3.bf16.msra.mxu0 %v15136_v0  ;;  %v3118_v27 = vpop.f32.mrb[38].mxu1  ;;  %vm3823_vm9 = vcmp.eq.s32.totalorder %v3801_v17, %v15855_v52 }
 0x255   : > { %14307 = vmatprep.subr.bf16.mxu0 %v15136_v0  ;;  %4886 = vmatmul.mubr.f32.vlgmr.msra.gmra.mrb[60].mxu1 %v16080_v26  ;;  %v3120_v28 = vpop.f32.mrb[39].mxu1  ;;  %v3839_v20 = vsel %vm3823_vm9, %v15043_v19, 0.0 }
 0x256   : > { %4892 = vmatpush1.msra.mxu1 %v15137_v1  ;;  %4957 = vmatprep.mubr.f32.mxu1 %v4804_v8  ;;  %v5258_v8 = vsub.f32 %v16167_v63, %v5257_v5 }
 0x257   : > { %14319 = vmatprep.subr.bf16.mxu1 %v15136_v0 }
 0x258   : > { %14308 = vmatpush3.bf16.msra.mxu0 %v15136_v0  ;;  %v5259_v12 = vand.u32 4294901760, %v5258_v8 }
 0x259   : > { %14309 = vmatprep.subr.bf16.mxu0 %v15136_v0  ;;  %4960 = vmatmul.mubr.f32.vlgmr.msra.gmra.mrb[62].mxu1 %v16088_v29 }
 0x25a   : > { %14320 = vmatpush3.bf16.msra.mxu1 %v15136_v0  ;;  %5032 = vmatprep.mubr.f32.mxu1 %v4805_v9 }
 0x25b   : > { %14321 = vmatprep.subr.bf16.mxu1 %v15136_v0 }
 0x25c   : > { %14310 = vmatpush3.bf16.msra.mxu0 %v15136_v0 }
 0x25d   : > { %14311 = vmatprep.subr.bf16.mxu0 %v15136_v0 }
 0x25e   : > { %14322 = vmatpush3.bf16.msra.mxu1 %v15136_v0 }
 0x25f   : > { %14323 = vmatprep.subr.bf16.mxu1 %v15136_v0 }
 0x260   : > { %14312 = vmatpush3.bf16.msra.mxu0 %v15136_v0 }
 0x261   : > { %14313 = vmatprep.subr.bf16.mxu0 %v15136_v0 }
 0x262   : > { %14324 = vmatpush3.bf16.msra.mxu1 %v15136_v0 }
 0x263   : > { %14325 = vmatprep.subr.bf16.mxu1 %v15136_v0 }
 0x264   : > { %14314 = vmatpush3.bf16.msra.mxu0 %v15136_v0 }
 0x265   : > { %14315 = vmatprep.subr.bf16.mxu0 %v15136_v0 }
 0x266   : > { %14326 = vmatpush3.bf16.msra.mxu1 %v15136_v0 }
 0x267   : > { %14327 = vmatprep.subr.bf16.mxu1 %v15136_v0 }
 0x268   : > { %14316 = vmatpush3.bf16.msra.mxu0 %v15136_v0 }
 0x269   : > { %14317 = vmatprep.subr.bf16.mxu0 %v15136_v0 }
 0x26a   : > { %v11797_v33 = vpop.f32.mrb[36].mxu0  ;;  %14328 = vmatpush3.bf16.msra.mxu1 %v15136_v0 }
 0x26b   : > { %v11798_v34 = vpop.f32.mrb[37].mxu0  ;;  %14329 = vmatprep.subr.bf16.mxu1 %v15136_v0 }
 0x26c   : > { %14318 = vmatpush3.bf16.msra.mxu0 %v15136_v0  ;;  %v11799_v35 = vadd.f32 %v11798_v34, %v11797_v33 }
 0x26d   : > { %5041 = vmatprep.subr.mxu0 %v15137_v1 }
 0x26e   : > { %v2973_v39 = vadd.f32 %v11799_v35, %v2893_v21  ;;  %v3266_v40 = vpop.f32.mrb[38].mxu0  ;;  %14330 = vmatpush3.bf16.msra.mxu1 %v15136_v0  ;;  %v16210_v21 = vand.u32 4294901760, %v3839_v20  ;;  %v219_v35 = vld [vmem:[#allocation2] sm:$0xff] }
 0x26f   : > { %4814 = vmatmul.mubr.f32.vlgmr.msra.gmra.mrb[60].mxu0 %v4813_v38  ;;  %v3268_v41 = vpop.f32.mrb[39].mxu0  ;;  %14331 = vmatprep.subr.bf16.mxu1 %v15136_v0  ;;  %v15044_v38 = vld [vmem:[%s15253_s25 + $0x40] sm:$0xff] }
 0x270   : > { %v3045_v43 = vadd.f32 %v3044_v22, %v2973_v39  ;;  %5106 = vmatprep.mubr.f32.mxu0 %v16037_v7  ;;  %5042 = vmatpush1.msra.mxu0 %v15137_v1  ;;  %v16217_v22 = vsub.f32 %v3839_v20, %v16210_v21 }
 0x271   : > { %14335 = vmatprep.subr.bf16.mxu0 %v15136_v0 }
 0x272   : > { %v3119_v44 = vadd.f32 %v3118_v27, %v3045_v43  ;;  %14332 = vmatpush3.bf16.msra.mxu1 %v15136_v0  ;;  %v5697_v23 = vand.u32 4294901760, %v16217_v22 }
 0x273   : > { %5108 = vmatmul.mubr.f32.vlgmr.msra.gmra.mrb[62].mxu0 %v16080_v26  ;;  %14333 = vmatprep.subr.bf16.mxu1 %v15136_v0 }
 0x274   : > { %14336 = vmatpush3.bf16.msra.mxu0 %v15136_v0  ;;  %5178 = vmatprep.mubr.f32.mxu0 %v16037_v7  ;;  %v11832_v48 = vpop.f32.mrb[40].mxu1 }
 0x275   : > { %14337 = vmatprep.subr.bf16.mxu0 %v15136_v0  ;;  %v11833_v49 = vpop.f32.mrb[41].mxu1 }
 0x276   : > { %14334 = vmatpush3.bf16.msra.mxu1 %v15136_v0  ;;  %v11834_v51 = vadd.f32 %v11833_v49, %v11832_v48  ;;  %v3803_v48 = vadd.s32 1408, %v15844_v46 }
 0x277   : > { %14351 = vmatprep.subr.bf16.mxu1 %v15136_v0 }
 0x278   : > { %14338 = vmatpush3.bf16.msra.mxu0 %v15136_v0  ;;  %v3195_v53 = vadd.f32 %v11834_v51, %v3119_v44  ;;  %vm3825_vm11 = vcmp.eq.s32.totalorder %v3803_v48, %v15855_v52 }
 0x279   : > { %14339 = vmatprep.subr.bf16.mxu0 %v15136_v0  ;;  %5036 = vmatmul.mubr.f32.vlgmr.msra.gmra.mrb[64].mxu1 %v4811_v30  ;;  %v3800_v30 = vadd.s32 1024, %v15844_v46 }
 0x27a   : > { %14352 = vmatpush3.bf16.msra.mxu1 %v15136_v0  ;;  %v3267_v55 = vadd.f32 %v3266_v40, %v3195_v53  ;;  %5254 = vmatprep.mubr.f32.mxu1 %v5253_v54  ;;  %v15045_v54 = vld [vmem:[%s15253_s25 + $0x58] sm:$0xff] }
 0x27b   : > { %14353 = vmatprep.subr.bf16.mxu1 %v15136_v0  ;;  %vm3822_vm10 = vcmp.eq.s32.totalorder %v3800_v30, %v15855_v52 }
 0x27c   : > { %14340 = vmatpush3.bf16.msra.mxu0 %v15136_v0  ;;  %v3838_v39 = vsel %vm3822_vm10, %v15044_v38, 0.0 }
 0x27d   : > { %14341 = vmatprep.subr.bf16.mxu0 %v15136_v0 }
 0x27e   : > { %14354 = vmatpush3.bf16.msra.mxu1 %v15136_v0 }
 0x27f   : > { %14355 = vmatprep.subr.bf16.mxu1 %v15136_v0 }
 0x280   : > { %14342 = vmatpush3.bf16.msra.mxu0 %v15136_v0 }
 0x281   : > { %14343 = vmatprep.subr.bf16.mxu0 %v15136_v0 }
 0x282   : > { %14356 = vmatpush3.bf16.msra.mxu1 %v15136_v0 }
 0x283   : > { %14357 = vmatprep.subr.bf16.mxu1 %v15136_v0 }
 0x284   : > { %14344 = vmatpush3.bf16.msra.mxu0 %v15136_v0 }
 0x285   : > { %14345 = vmatprep.subr.bf16.mxu0 %v15136_v0 }
 0x286   : > { %14358 = vmatpush3.bf16.msra.mxu1 %v15136_v0 }
 0x287   : > { %14359 = vmatprep.subr.bf16.mxu1 %v15136_v0 }
 0x288   : > { %14346 = vmatpush3.bf16.msra.mxu0 %v15136_v0 }
 0x289   : > { %14347 = vmatprep.subr.bf16.mxu0 %v15136_v0 }
 0x28a   : > { %14360 = vmatpush3.bf16.msra.mxu1 %v15136_v0 }
 0x28b   : > { %14361 = vmatprep.subr.bf16.mxu1 %v15136_v0 }
 0x28c   : > { %14348 = vmatpush3.bf16.msra.mxu0 %v15136_v0 }
 0x28d   : > { %14349 = vmatprep.subr.bf16.mxu0 %v15136_v0 }
 0x28e   : > { %v11867_v60 = vpop.f32.mrb[40].mxu0  ;;  %14362 = vmatpush3.bf16.msra.mxu1 %v15136_v0 }
 0x28f   : > { %v11868_v61 = vpop.f32.mrb[41].mxu0  ;;  %14363 = vmatprep.subr.bf16.mxu1 %v15136_v0 }
 0x290   : > { %14350 = vmatpush3.bf16.msra.mxu0 %v15136_v0  ;;  %v11869_v62 = vadd.f32 %v11868_v61, %v11867_v60 }
 0x291   : > { %5265 = vmatprep.subr.mxu0 %v15137_v1 }
 0x292   : > { %v3339_v2 = vadd.f32 %v11869_v62, %v3267_v55  ;;  %v3490_v3 = vpop.f32.mrb[42].mxu0  ;;  %14364 = vmatpush3.bf16.msra.mxu1 %v15136_v0  ;;  %v3841_v55 = vsel %vm3825_vm11, %v15045_v54, 0.0  ;;  %v15048_v54 = vld [vmem:[%s15253_s25 + $0x60] sm:$0xff] }
 0x293   : > { %5180 = vmatmul.mubr.f32.vlgmr.msra.gmra.mrb[64].mxu0 %v16080_v26  ;;  %v3492_v4 = vpop.f32.mrb[43].mxu0  ;;  %14365 = vmatprep.subr.bf16.mxu1 %v15136_v0  ;;  %v5698_v26 = vsub.f32 %v16217_v22, %v5697_v23  ;;  %v16281_v60 = vand.u32 4294901760, %v3841_v55 }
 0x294   : > { %5330 = vmatprep.mubr.f32.mxu0 %v16113_v42  ;;  %5266 = vmatpush1.msra.mxu0 %v15137_v1  ;;  %v11902_v9 = vpop.f32.mrb[42].mxu1 }
 0x295   : > { %5337 = vmatprep.subr.mxu0 %v15137_v1  ;;  %v11903_v10 = vpop.f32.mrb[43].mxu1  ;;  %v5699_v29 = vand.u32 4294901760, %v5698_v26  ;;  %v16290_v62 = vsub.f32 %v3841_v55, %v16281_v60 }
 0x296   : > { %v3564_v6 = vpop.f32.mrb[44].mxu0  ;;  %14366 = vmatpush3.bf16.msra.mxu1 %v15136_v0  ;;  %v11904_v11 = vadd.f32 %v11903_v10, %v11902_v9  ;;  %v3802_v9 = vadd.s32 1280, %v15844_v46  ;;  %v15046_v10 = vld [vmem:[%s15253_s25 + $0x50] sm:$0xff] }
 0x297   : > { %5332 = vmatmul.mubr.f32.vlgmr.msra.gmra.mrb[66].mxu0 %v16160_v59  ;;  %v3566_v7 = vpop.f32.mrb[45].mxu0  ;;  %5487 = vmatprep.subr.mxu1 %v15137_v1 }
 0x298   : > { %5403 = vmatprep.mubr.f32.mxu0 %v16122_v45  ;;  %5338 = vmatpush1.msra.mxu0 %v15137_v1  ;;  %v3419_v13 = vadd.f32 %v11904_v11, %v3339_v2  ;;  %v3712_v14 = vpop.f32.mrb[44].mxu1  ;;  %vm3824_vm12 = vcmp.eq.s32.totalorder %v3802_v9, %v15855_v52 }
 0x299   : > { %14367 = vmatprep.subr.bf16.mxu0 %v15136_v0  ;;  %5260 = vmatmul.mubr.f32.vlgmr.msra.gmra.mrb[66].mxu1 %v5259_v12  ;;  %v3714_v15 = vpop.f32.mrb[45].mxu1  ;;  %v3840_v11 = vsel %vm3824_vm12, %v15046_v10, 0.0 }
 0x29a   : > { %v3491_v16 = vadd.f32 %v3490_v3, %v3419_v13  ;;  %5488 = vmatpush1.msra.mxu1 %v15137_v1  ;;  %5552 = vmatprep.mubr.f32.mxu1 %v16113_v42  ;;  %v16328_v12 = vand.u32 4294901760, %v3840_v11 }
 0x29b   : > { %5406 = vmatmul.mubr.f32.vlgmr.msra.gmra.mrb[68].mxu0 %v16167_v63  ;;  %14383 = vmatprep.subr.bf16.mxu1 %v15136_v0  ;;  %v6143_v63 = vand.u32 4294901760, %v16290_v62 }
 0x29c   : > { %14368 = vmatpush3.bf16.msra.mxu0 %v15136_v0  ;;  %5478 = vmatprep.mubr.f32.mxu0 %v5251_v47  ;;  %v3565_v18 = vadd.f32 %v3564_v6, %v3491_v16  ;;  %v16335_v16 = vsub.f32 %v3840_v11, %v16328_v12 }
 0x29d   : > { %14369 = vmatprep.subr.bf16.mxu0 %v15136_v0  ;;  %5554 = vmatmul.mubr.f32.vlgmr.msra.gmra.mrb[68].mxu1 %v16160_v59  ;;  %v6144_v4 = vsub.f32 %v16290_v62, %v6143_v63 }
 0x29e   : > { %14384 = vmatpush3.bf16.msra.mxu1 %v15136_v0  ;;  %5624 = vmatprep.mubr.f32.mxu1 %v16113_v42  ;;  %v16251_v42 = vand.u32 4294901760, %v3838_v39  ;;  %v6149_v20 = vand.u32 4294901760, %v16335_v16 }
 0x29f   : > { %14385 = vmatprep.subr.bf16.mxu1 %v15136_v0  ;;  %v6145_v7 = vand.u32 4294901760, %v6144_v4 }
 0x2a0   : > { %14370 = vmatpush3.bf16.msra.mxu0 %v15136_v0  ;;  %v5702_v45 = vsub.f32 %v3838_v39, %v16251_v42 }
 0x2a1   : > { %14371 = vmatprep.subr.bf16.mxu0 %v15136_v0 }
 0x2a2   : > { %14386 = vmatpush3.bf16.msra.mxu1 %v15136_v0  ;;  %v5703_v47 = vand.u32 4294901760, %v5702_v45 }
 0x2a3   : > { %14387 = vmatprep.subr.bf16.mxu1 %v15136_v0 }
 0x2a4   : > { %14372 = vmatpush3.bf16.msra.mxu0 %v15136_v0  ;;  %v5704_v49 = vsub.f32 %v5702_v45, %v5703_v47 }
 0x2a5   : > { %14373 = vmatprep.subr.bf16.mxu0 %v15136_v0 }
 0x2a6   : > { %14388 = vmatpush3.bf16.msra.mxu1 %v15136_v0  ;;  %v5705_v56 = vand.u32 4294901760, %v5704_v49 }
 0x2a7   : > { %14389 = vmatprep.subr.bf16.mxu1 %v15136_v0 }
 0x2a8   : > { %14374 = vmatpush3.bf16.msra.mxu0 %v15136_v0 }
 0x2a9   : > { %14375 = vmatprep.subr.bf16.mxu0 %v15136_v0 }
 0x2aa   : > { %14390 = vmatpush3.bf16.msra.mxu1 %v15136_v0 }
 0x2ab   : > { %14391 = vmatprep.subr.bf16.mxu1 %v15136_v0 }
 0x2ac   : > { %14376 = vmatpush3.bf16.msra.mxu0 %v15136_v0 }
 0x2ad   : > { %14377 = vmatprep.subr.bf16.mxu0 %v15136_v0 }
 0x2ae   : > { %14392 = vmatpush3.bf16.msra.mxu1 %v15136_v0 }
 0x2af   : > { %14393 = vmatprep.subr.bf16.mxu1 %v15136_v0 }
 0x2b0   : > { %14378 = vmatpush3.bf16.msra.mxu0 %v15136_v0 }
 0x2b1   : > { %14379 = vmatprep.subr.bf16.mxu0 %v15136_v0 }
 0x2b2   : > { %14394 = vmatpush3.bf16.msra.mxu1 %v15136_v0 }
 0x2b3   : > { %14395 = vmatprep.subr.bf16.mxu1 %v15136_v0 }
 0x2b4   : > { %14380 = vmatpush3.bf16.msra.mxu0 %v15136_v0 }
 0x2b5   : > { %14381 = vmatprep.subr.bf16.mxu0 %v15136_v0 }
 0x2b6   : > { %v11937_v24 = vpop.f32.mrb[46].mxu0  ;;  %14396 = vmatpush3.bf16.msra.mxu1 %v15136_v0 }
 0x2b7   : > { %v11938_v25 = vpop.f32.mrb[47].mxu0  ;;  %14397 = vmatprep.subr.bf16.mxu1 %v15136_v0 }
 0x2b8   : > { %14382 = vmatpush3.bf16.msra.mxu0 %v15136_v0  ;;  %v11939_v27 = vadd.f32 %v11938_v25, %v11937_v24  ;;  %v11972_v32 = vpop.f32.mrb[46].mxu1 }
 0x2b9   : > { %14399 = vmatprep.subr.bf16.mxu0 %v15136_v0  ;;  %v11973_v33 = vpop.f32.mrb[47].mxu1 }
 0x2ba   : > { %v3641_v28 = vadd.f32 %v11939_v27, %v3565_v18  ;;  %14398 = vmatpush3.bf16.msra.mxu1 %v15136_v0  ;;  %v11974_v34 = vadd.f32 %v11973_v33, %v11972_v32  ;;  %v3805_v32 = vadd.s32 1664, %v15844_v46 }
 0x2bb   : > { %5482 = vmatmul.mubr.f32.vlgmr.msra.gmra.mrb[70].mxu0 %v5257_v5  ;;  %5711 = vmatprep.subr.mxu1 %v15137_v1 }
 0x2bc   : > { %14400 = vmatpush3.bf16.msra.mxu0 %v15136_v0  ;;  %v3713_v31 = vadd.f32 %v3712_v14, %v3641_v28  ;;  %5700 = vmatprep.mubr.f32.mxu0 %v5699_v29  ;;  %v3995_v37 = vpop.f32.mrb[48].mxu1  ;;  %vm3827_vm13 = vcmp.eq.s32.totalorder %v3805_v32, %v15855_v52 }
 0x2bd   : > { %14401 = vmatprep.subr.bf16.mxu0 %v15136_v0  ;;  %5626 = vmatmul.mubr.f32.vlgmr.msra.gmra.mrb[70].mxu1 %v16160_v59  ;;  %v3997_v40 = vpop.f32.mrb[49].mxu1 }
 0x2be   : > { %v3785_v36 = vadd.f32 %v11974_v34, %v3713_v31  ;;  %5712 = vmatpush1.msra.mxu1 %v15137_v1  ;;  %5776 = vmatprep.mubr.f32.mxu1 %v16210_v21  ;;  %v15047_v34 = vld [vmem:[%s15253_s25 + $0x68] sm:$0xff] }
 0x2bf   : > { %5783 = vmatprep.subr.mxu1 %v15137_v1 }
 0x2c0   : > { %14402 = vmatpush3.bf16.msra.mxu0 %v15136_v0  ;;  %v3788_v41 = vadd.f32 %v3785_v36, %v219_v35  ;;  %v4069_v43 = vpop.f32.mrb[50].mxu1  ;;  %v3843_v35 = vsel %vm3827_vm13, %v15047_v34, 0.0 }
 0x2c1   : > { %14403 = vmatprep.subr.bf16.mxu0 %v15136_v0  ;;  %5778 = vmatmul.mubr.f32.vlgmr.msra.gmra.mrb[72].mxu1 %v16251_v42  ;;  %v4071_v44 = vpop.f32.mrb[51].mxu1  ;;  %v16378_v36 = vand.u32 4294901760, %v3843_v35 }
 0x2c2   : > { %3790 = vst.msk [vmem:[#allocation2] sm:$0xff] %vm198_vm5, %v3788_v41  ;;  %5784 = vmatpush1.msra.mxu1 %v15137_v1  ;;  %5849 = vmatprep.mubr.f32.mxu1 %v16217_v22 }
 0x2c3   : > { %14415 = vmatprep.subr.bf16.mxu1 %v15136_v0 }
 0x2c4   : > { %14404 = vmatpush3.bf16.msra.mxu0 %v15136_v0 }
 0x2c5   : > { %14405 = vmatprep.subr.bf16.mxu0 %v15136_v0  ;;  %5852 = vmatmul.mubr.f32.vlgmr.msra.gmra.mrb[74].mxu1 %v5702_v45  ;;  %v3804_v45 = vadd.s32 1536, %v15844_v46 }
 0x2c6   : > { %14416 = vmatpush3.bf16.msra.mxu1 %v15136_v0  ;;  %5924 = vmatprep.mubr.f32.mxu1 %v5697_v23  ;;  %v6150_v23 = vsub.f32 %v16335_v16, %v6149_v20 }
 0x2c7   : > { %14417 = vmatprep.subr.bf16.mxu1 %v15136_v0  ;;  %vm3826_vm14 = vcmp.eq.s32.totalorder %v3804_v45, %v15855_v52 }
 0x2c8   : > { %14406 = vmatpush3.bf16.msra.mxu0 %v15136_v0  ;;  %v6151_v27 = vand.u32 4294901760, %v6150_v23  ;;  %v3842_v55 = vsel %vm3826_vm14, %v15048_v54, 0.0  ;;  %v3806_v23 = vadd.s32 1792, %v15844_v46 }
 0x2c9   : > { %14407 = vmatprep.subr.bf16.mxu0 %v15136_v0 }
 0x2ca   : > { %14418 = vmatpush3.bf16.msra.mxu1 %v15136_v0  ;;  %vm3828_vm0 = vcmp.eq.s32.totalorder %v3806_v23, %v15855_v52 }
 0x2cb   : > { %14419 = vmatprep.subr.bf16.mxu1 %v15136_v0 }
 0x2cc   : > { %14408 = vmatpush3.bf16.msra.mxu0 %v15136_v0 }
 0x2cd   : > { %14409 = vmatprep.subr.bf16.mxu0 %v15136_v0 }
 0x2ce   : > { %14420 = vmatpush3.bf16.msra.mxu1 %v15136_v0 }
 0x2cf   : > { %14421 = vmatprep.subr.bf16.mxu1 %v15136_v0 }
 0x2d0   : > { %14410 = vmatpush3.bf16.msra.mxu0 %v15136_v0 }
 0x2d1   : > { %14411 = vmatprep.subr.bf16.mxu0 %v15136_v0 }
 0x2d2   : > { %14422 = vmatpush3.bf16.msra.mxu1 %v15136_v0 }
 0x2d3   : > { %14423 = vmatprep.subr.bf16.mxu1 %v15136_v0 }
 0x2d4   : > { %14412 = vmatpush3.bf16.msra.mxu0 %v15136_v0 }
 0x2d5   : > { %14413 = vmatprep.subr.bf16.mxu0 %v15136_v0 }
 0x2d6   : > { %v12007_v50 = vpop.f32.mrb[48].mxu0  ;;  %14424 = vmatpush3.bf16.msra.mxu1 %v15136_v0 }
 0x2d7   : > { %v12008_v51 = vpop.f32.mrb[49].mxu0  ;;  %14425 = vmatprep.subr.bf16.mxu1 %v15136_v0 }
 0x2d8   : > { %14414 = vmatpush3.bf16.msra.mxu0 %v15136_v0  ;;  %v12009_v53 = vadd.f32 %v12008_v51, %v12007_v50 }
 0x2d9   : > { %5933 = vmatprep.subr.mxu0 %v15137_v1 }
 0x2da   : > { %v3996_v57 = vadd.f32 %v12009_v53, %v3995_v37  ;;  %v4217_v58 = vpop.f32.mrb[50].mxu0  ;;  %14426 = vmatpush3.bf16.msra.mxu1 %v15136_v0  ;;  %v6588_v37 = vsub.f32 %v3843_v35, %v16378_v36 }
 0x2db   : > { %5706 = vmatmul.mubr.f32.vlgmr.msra.gmra.mrb[72].mxu0 %v5705_v56  ;;  %v4219_v59 = vpop.f32.mrb[51].mxu0  ;;  %14427 = vmatprep.subr.bf16.mxu1 %v15136_v0 }
 0x2dc   : > { %5998 = vmatprep.mubr.f32.mxu0 %v16210_v21  ;;  %v4070_v61 = vadd.f32 %v4069_v43, %v3996_v57  ;;  %5934 = vmatpush1.msra.mxu0 %v15137_v1  ;;  %v6589_v38 = vand.u32 4294901760, %v6588_v37  ;;  %v16415_v57 = vand.u32 4294901760, %v3842_v55 }
 0x2dd   : > { %14431 = vmatprep.subr.bf16.mxu0 %v15136_v0 }
 0x2de   : > { %14428 = vmatpush3.bf16.msra.mxu1 %v15136_v0  ;;  %v6590_v41 = vsub.f32 %v6588_v37, %v6589_v38 }
 0x2df   : > { %6000 = vmatmul.mubr.f32.vlgmr.msra.gmra.mrb[74].mxu0 %v16251_v42  ;;  %14429 = vmatprep.subr.bf16.mxu1 %v15136_v0 }
 0x2e0   : > { %14432 = vmatpush3.bf16.msra.mxu0 %v15136_v0  ;;  %6070 = vmatprep.mubr.f32.mxu0 %v16210_v21  ;;  %v12042_v2 = vpop.f32.mrb[52].mxu1  ;;  %v6591_v44 = vand.u32 4294901760, %v6590_v41 }
 0x2e1   : > { %14433 = vmatprep.subr.bf16.mxu0 %v15136_v0  ;;  %v12043_v3 = vpop.f32.mrb[53].mxu1 }
 0x2e2   : > { %14430 = vmatpush3.bf16.msra.mxu1 %v15136_v0  ;;  %v12044_v5 = vadd.f32 %v12043_v3, %v12042_v2 }
 0x2e3   : > { %14447 = vmatprep.subr.bf16.mxu1 %v15136_v0 }
 0x2e4   : > { %14434 = vmatpush3.bf16.msra.mxu0 %v15136_v0  ;;  %v4146_v6 = vadd.f32 %v12044_v5, %v4070_v61  ;;  %v15049_v5 = vld [vmem:[%s15253_s25 + $0x78] sm:$0xff] }
 0x2e5   : > { %14435 = vmatprep.subr.bf16.mxu0 %v15136_v0  ;;  %5928 = vmatmul.mubr.f32.vlgmr.msra.gmra.mrb[76].mxu1 %v5703_v47 }
 0x2e6   : > { %14448 = vmatpush3.bf16.msra.mxu1 %v15136_v0  ;;  %v4218_v8 = vadd.f32 %v4217_v58, %v4146_v6  ;;  %6146 = vmatprep.mubr.f32.mxu1 %v6145_v7 }
 0x2e7   : > { %14449 = vmatprep.subr.bf16.mxu1 %v15136_v0 }
 0x2e8   : > { %14436 = vmatpush3.bf16.msra.mxu0 %v15136_v0 }
 0x2e9   : > { %14437 = vmatprep.subr.bf16.mxu0 %v15136_v0 }
 0x2ea   : > { %14450 = vmatpush3.bf16.msra.mxu1 %v15136_v0 }
 0x2eb   : > { %14451 = vmatprep.subr.bf16.mxu1 %v15136_v0 }
 0x2ec   : > { %14438 = vmatpush3.bf16.msra.mxu0 %v15136_v0 }
 0x2ed   : > { %14439 = vmatprep.subr.bf16.mxu0 %v15136_v0 }
 0x2ee   : > { %14452 = vmatpush3.bf16.msra.mxu1 %v15136_v0 }
 0x2ef   : > { %14453 = vmatprep.subr.bf16.mxu1 %v15136_v0 }
 0x2f0   : > { %14440 = vmatpush3.bf16.msra.mxu0 %v15136_v0 }
 0x2f1   : > { %14441 = vmatprep.subr.bf16.mxu0 %v15136_v0 }
 0x2f2   : > { %14454 = vmatpush3.bf16.msra.mxu1 %v15136_v0 }
 0x2f3   : > { %14455 = vmatprep.subr.bf16.mxu1 %v15136_v0 }
 0x2f4   : > { %14442 = vmatpush3.bf16.msra.mxu0 %v15136_v0 }
 0x2f5   : > { %14443 = vmatprep.subr.bf16.mxu0 %v15136_v0 }
 0x2f6   : > { %14456 = vmatpush3.bf16.msra.mxu1 %v15136_v0 }
 0x2f7   : > { %14457 = vmatprep.subr.bf16.mxu1 %v15136_v0 }
 0x2f8   : > { %14444 = vmatpush3.bf16.msra.mxu0 %v15136_v0 }
 0x2f9   : > { %14445 = vmatprep.subr.bf16.mxu0 %v15136_v0 }
 0x2fa   : > { %v12077_v13 = vpop.f32.mrb[52].mxu0  ;;  %14458 = vmatpush3.bf16.msra.mxu1 %v15136_v0 }
 0x2fb   : > { %v12078_v14 = vpop.f32.mrb[53].mxu0  ;;  %14459 = vmatprep.subr.bf16.mxu1 %v15136_v0 }
 0x2fc   : > { %14446 = vmatpush3.bf16.msra.mxu0 %v15136_v0  ;;  %v12079_v15 = vadd.f32 %v12078_v14, %v12077_v13 }
 0x2fd   : > { %6157 = vmatprep.subr.mxu0 %v15137_v1 }
 0x2fe   : > { %v4290_v17 = vadd.f32 %v12079_v15, %v4218_v8  ;;  %v4441_v18 = vpop.f32.mrb[54].mxu0  ;;  %14460 = vmatpush3.bf16.msra.mxu1 %v15136_v0 }
 0x2ff   : > { %6072 = vmatmul.mubr.f32.vlgmr.msra.gmra.mrb[76].mxu0 %v16251_v42  ;;  %v4443_v19 = vpop.f32.mrb[55].mxu0  ;;  %14461 = vmatprep.subr.bf16.mxu1 %v15136_v0 }
 0x300   : > { %6222 = vmatprep.mubr.f32.mxu0 %v16281_v60  ;;  %6158 = vmatpush1.msra.mxu0 %v15137_v1  ;;  %v12112_v24 = vpop.f32.mrb[54].mxu1 }
 0x301   : > { %6229 = vmatprep.subr.mxu0 %v15137_v1  ;;  %v12113_v25 = vpop.f32.mrb[55].mxu1 }
 0x302   : > { %v4515_v21 = vpop.f32.mrb[56].mxu0  ;;  %14462 = vmatpush3.bf16.msra.mxu1 %v15136_v0  ;;  %v12114_v26 = vadd.f32 %v12113_v25, %v12112_v24  ;;  %v15050_v24 = vld [vmem:[%s15253_s25 + $0x70] sm:$0xff] }
 0x303   : > { %6224 = vmatmul.mubr.f32.vlgmr.msra.gmra.mrb[78].mxu0 %v16328_v12  ;;  %v4517_v22 = vpop.f32.mrb[57].mxu0  ;;  %6379 = vmatprep.subr.mxu1 %v15137_v1  ;;  %v3844_v25 = vsel %vm3828_vm0, %v15050_v24, 0.0 }
 0x304   : > { %6295 = vmatprep.mubr.f32.mxu0 %v16290_v62  ;;  %6230 = vmatpush1.msra.mxu0 %v15137_v1  ;;  %v4370_v28 = vadd.f32 %v12114_v26, %v4290_v17  ;;  %v4663_v29 = vpop.f32.mrb[56].mxu1  ;;  %v3807_v62 = vadd.s32 1920, %v15844_v46  ;;  %v16495_v26 = vand.u32 4294901760, %v3844_v25 }
 0x305   : > { %14463 = vmatprep.subr.bf16.mxu0 %v15136_v0  ;;  %6152 = vmatmul.mubr.f32.vlgmr.msra.gmra.mrb[78].mxu1 %v6151_v27  ;;  %v4665_v30 = vpop.f32.mrb[57].mxu1 }
 0x306   : > { %v4442_v31 = vadd.f32 %v4441_v18, %v4370_v28  ;;  %6380 = vmatpush1.msra.mxu1 %v15137_v1  ;;  %6444 = vmatprep.mubr.f32.mxu1 %v16281_v60  ;;  %vm3829_vm15 = vcmp.eq.s32.totalorder %v3807_v62, %v15855_v52 }
 0x307   : > { %6298 = vmatmul.mubr.f32.vlgmr.msra.gmra.mrb[80].mxu0 %v16335_v16  ;;  %14479 = vmatprep.subr.bf16.mxu1 %v15136_v0  ;;  %v3845_v6 = vsel %vm3829_vm15, %v15049_v5, 0.0 }
 0x308   : > { %14464 = vmatpush3.bf16.msra.mxu0 %v15136_v0  ;;  %6370 = vmatprep.mubr.f32.mxu0 %v6143_v63  ;;  %v4516_v33 = vadd.f32 %v4515_v21, %v4442_v31  ;;  %v16448_v11 = vand.u32 4294901760, %v3845_v6 }
 0x309   : > { %14465 = vmatprep.subr.bf16.mxu0 %v15136_v0  ;;  %6446 = vmatmul.mubr.f32.vlgmr.msra.gmra.mrb[80].mxu1 %v16328_v12 }
 0x30a   : > { %14480 = vmatpush3.bf16.msra.mxu1 %v15136_v0  ;;  %6516 = vmatprep.mubr.f32.mxu1 %v16281_v60  ;;  %v16423_v60 = vsub.f32 %v3842_v55, %v16415_v57  ;;  %v16457_v14 = vsub.f32 %v3845_v6, %v16448_v11 }
 0x30b   : > { %14481 = vmatprep.subr.bf16.mxu1 %v15136_v0 }
 0x30c   : > { %14466 = vmatpush3.bf16.msra.mxu0 %v15136_v0  ;;  %v6595_v61 = vand.u32 4294901760, %v16423_v60  ;;  %v7035_v15 = vand.u32 4294901760, %v16457_v14 }
 0x30d   : > { %14467 = vmatprep.subr.bf16.mxu0 %v15136_v0 }
 0x30e   : > { %14482 = vmatpush3.bf16.msra.mxu1 %v15136_v0  ;;  %v6596_v63 = vsub.f32 %v16423_v60, %v6595_v61  ;;  %v7036_v18 = vsub.f32 %v16457_v14, %v7035_v15 }
 0x30f   : > { %14483 = vmatprep.subr.bf16.mxu1 %v15136_v0 }
 0x310   : > { %14468 = vmatpush3.bf16.msra.mxu0 %v15136_v0  ;;  %v6597_v7 = vand.u32 4294901760, %v6596_v63  ;;  %v7037_v21 = vand.u32 4294901760, %v7036_v18 }
 0x311   : > { %14469 = vmatprep.subr.bf16.mxu0 %v15136_v0 }
 0x312   : > { %14484 = vmatpush3.bf16.msra.mxu1 %v15136_v0 }
 0x313   : > { %14485 = vmatprep.subr.bf16.mxu1 %v15136_v0 }
 0x314   : > { %14470 = vmatpush3.bf16.msra.mxu0 %v15136_v0 }
 0x315   : > { %14471 = vmatprep.subr.bf16.mxu0 %v15136_v0 }
 0x316   : > { %14486 = vmatpush3.bf16.msra.mxu1 %v15136_v0 }
 0x317   : > { %14487 = vmatprep.subr.bf16.mxu1 %v15136_v0 }
 0x318   : > { %14472 = vmatpush3.bf16.msra.mxu0 %v15136_v0 }
 0x319   : > { %14473 = vmatprep.subr.bf16.mxu0 %v15136_v0 }
 0x31a   : > { %14488 = vmatpush3.bf16.msra.mxu1 %v15136_v0 }
 0x31b   : > { %14489 = vmatprep.subr.bf16.mxu1 %v15136_v0 }
 0x31c   : > { %14474 = vmatpush3.bf16.msra.mxu0 %v15136_v0 }
 0x31d   : > { %14475 = vmatprep.subr.bf16.mxu0 %v15136_v0 }
 0x31e   : > { %14490 = vmatpush3.bf16.msra.mxu1 %v15136_v0 }
 0x31f   : > { %14491 = vmatprep.subr.bf16.mxu1 %v15136_v0 }
 0x320   : > { %14476 = vmatpush3.bf16.msra.mxu0 %v15136_v0 }
 0x321   : > { %14477 = vmatprep.subr.bf16.mxu0 %v15136_v0 }
 0x322   : > { %v12147_v39 = vpop.f32.mrb[58].mxu0  ;;  %14492 = vmatpush3.bf16.msra.mxu1 %v15136_v0 }
 0x323   : > { %v12148_v40 = vpop.f32.mrb[59].mxu0  ;;  %14493 = vmatprep.subr.bf16.mxu1 %v15136_v0 }
 0x324   : > { %14478 = vmatpush3.bf16.msra.mxu0 %v15136_v0  ;;  %v12149_v42 = vadd.f32 %v12148_v40, %v12147_v39  ;;  %v12182_v48 = vpop.f32.mrb[58].mxu1 }
 0x325   : > { %14495 = vmatprep.subr.bf16.mxu0 %v15136_v0  ;;  %v12183_v49 = vpop.f32.mrb[59].mxu1 }
 0x326   : > { %v4592_v43 = vadd.f32 %v12149_v42, %v4516_v33  ;;  %14494 = vmatpush3.bf16.msra.mxu1 %v15136_v0  ;;  %v12184_v50 = vadd.f32 %v12183_v49, %v12182_v48 }
 0x327   : > { %6374 = vmatmul.mubr.f32.vlgmr.msra.gmra.mrb[82].mxu0 %v6149_v20  ;;  %6603 = vmatprep.subr.mxu1 %v15137_v1 }
 0x328   : > { %14496 = vmatpush3.bf16.msra.mxu0 %v15136_v0  ;;  %v4664_v47 = vadd.f32 %v4663_v29, %v4592_v43  ;;  %6592 = vmatprep.mubr.f32.mxu0 %v6591_v44  ;;  %v4887_v53 = vpop.f32.mrb[60].mxu1  ;;  %v16502_v29 = vsub.f32 %v3844_v25, %v16495_v26 }
 0x329   : > { %14497 = vmatprep.subr.bf16.mxu0 %v15136_v0  ;;  %6518 = vmatmul.mubr.f32.vlgmr.msra.gmra.mrb[82].mxu1 %v16328_v12  ;;  %v4889_v56 = vpop.f32.mrb[61].mxu1 }
 0x32a   : > { %v4736_v51 = vadd.f32 %v12184_v50, %v4664_v47  ;;  %6604 = vmatpush1.msra.mxu1 %v15137_v1  ;;  %6668 = vmatprep.mubr.f32.mxu1 %v16378_v36  ;;  %v7041_v33 = vand.u32 4294901760, %v16502_v29  ;;  %v15051_v56 = vld [vmem:[%s15253_s25] sm:$0xff] }
 0x32b   : > { %6675 = vmatprep.subr.mxu1 %v15137_v1 }
 0x32c   : > { %14498 = vmatpush3.bf16.msra.mxu0 %v15136_v0  ;;  %v4961_v58 = vpop.f32.mrb[62].mxu1 }
 0x32d   : > { %14499 = vmatprep.subr.bf16.mxu0 %v15136_v0  ;;  %6670 = vmatmul.mubr.f32.vlgmr.msra.gmra.mrb[84].mxu1 %v16415_v57  ;;  %v4963_v59 = vpop.f32.mrb[63].mxu1 }
 0x32e   : > { %6676 = vmatpush1.msra.mxu1 %v15137_v1  ;;  %6741 = vmatprep.mubr.f32.mxu1 %v6588_v37 }
 0x32f   : > { %14511 = vmatprep.subr.bf16.mxu1 %v15136_v0 }
 0x330   : > { %14500 = vmatpush3.bf16.msra.mxu0 %v15136_v0 }
 0x331   : > { %14501 = vmatprep.subr.bf16.mxu0 %v15136_v0  ;;  %6744 = vmatmul.mubr.f32.vlgmr.msra.gmra.mrb[86].mxu1 %v16423_v60 }
 0x332   : > { %14512 = vmatpush3.bf16.msra.mxu1 %v15136_v0  ;;  %6816 = vmatprep.mubr.f32.mxu1 %v6589_v38 }
 0x333   : > { %14513 = vmatprep.subr.bf16.mxu1 %v15136_v0 }
 0x334   : > { %14502 = vmatpush3.bf16.msra.mxu0 %v15136_v0 }
 0x335   : > { %14503 = vmatprep.subr.bf16.mxu0 %v15136_v0 }
 0x336   : > { %14514 = vmatpush3.bf16.msra.mxu1 %v15136_v0 }
 0x337   : > { %14515 = vmatprep.subr.bf16.mxu1 %v15136_v0 }
 0x338   : > { %14504 = vmatpush3.bf16.msra.mxu0 %v15136_v0 }
 0x339   : > { %14505 = vmatprep.subr.bf16.mxu0 %v15136_v0 }
 0x33a   : > { %14516 = vmatpush3.bf16.msra.mxu1 %v15136_v0 }
 0x33b   : > { %14517 = vmatprep.subr.bf16.mxu1 %v15136_v0 }
 0x33c   : > { %14506 = vmatpush3.bf16.msra.mxu0 %v15136_v0 }
 0x33d   : > { %14507 = vmatprep.subr.bf16.mxu0 %v15136_v0 }
 0x33e   : > { %14518 = vmatpush3.bf16.msra.mxu1 %v15136_v0 }
 0x33f   : > { %14519 = vmatprep.subr.bf16.mxu1 %v15136_v0 }
 0x340   : > { %14508 = vmatpush3.bf16.msra.mxu0 %v15136_v0 }
 0x341   : > { %14509 = vmatprep.subr.bf16.mxu0 %v15136_v0 }
 0x342   : > { %v12217_v2 = vpop.f32.mrb[60].mxu0  ;;  %14520 = vmatpush3.bf16.msra.mxu1 %v15136_v0 }
 0x343   : > { %v12218_v3 = vpop.f32.mrb[61].mxu0  ;;  %14521 = vmatprep.subr.bf16.mxu1 %v15136_v0 }
 0x344   : > { %14510 = vmatpush3.bf16.msra.mxu0 %v15136_v0  ;;  %v12219_v4 = vadd.f32 %v12218_v3, %v12217_v2 }
 0x345   : > { %6825 = vmatprep.subr.mxu0 %v15137_v1 }
 0x346   : > { %v4816_v8 = vadd.f32 %v12219_v4, %v4736_v51  ;;  %v5109_v9 = vpop.f32.mrb[62].mxu0  ;;  %14522 = vmatpush3.bf16.msra.mxu1 %v15136_v0 }
 0x347   : > { %6598 = vmatmul.mubr.f32.vlgmr.msra.gmra.mrb[84].mxu0 %v6597_v7  ;;  %v5111_v10 = vpop.f32.mrb[63].mxu0  ;;  %14523 = vmatprep.subr.bf16.mxu1 %v15136_v0 }
 0x348   : > { %v4888_v12 = vadd.f32 %v4887_v53, %v4816_v8  ;;  %6890 = vmatprep.mubr.f32.mxu0 %v16378_v36  ;;  %6826 = vmatpush1.msra.mxu0 %v15137_v1 }
 0x349   : > { %14527 = vmatprep.subr.bf16.mxu0 %v15136_v0 }
 0x34a   : > { %v4962_v13 = vadd.f32 %v4961_v58, %v4888_v12  ;;  %14524 = vmatpush3.bf16.msra.mxu1 %v15136_v0 }
 0x34b   : > { %6892 = vmatmul.mubr.f32.vlgmr.msra.gmra.mrb[86].mxu0 %v16415_v57  ;;  %14525 = vmatprep.subr.bf16.mxu1 %v15136_v0 }
 0x34c   : > { %14528 = vmatpush3.bf16.msra.mxu0 %v15136_v0  ;;  %6962 = vmatprep.mubr.f32.mxu0 %v16378_v36  ;;  %v12252_v16 = vpop.f32.mrb[64].mxu1  ;;  %v7042_v36 = vsub.f32 %v16502_v29, %v7041_v33 }
 0x34d   : > { %14529 = vmatprep.subr.bf16.mxu0 %v15136_v0  ;;  %v12253_v17 = vpop.f32.mrb[65].mxu1 }
 0x34e   : > { %14526 = vmatpush3.bf16.msra.mxu1 %v15136_v0  ;;  %v12254_v19 = vadd.f32 %v12253_v17, %v12252_v16  ;;  %v7043_v40 = vand.u32 4294901760, %v7042_v36 }
 0x34f   : > { %14543 = vmatprep.subr.bf16.mxu1 %v15136_v0 }
 0x350   : > { %14530 = vmatpush3.bf16.msra.mxu0 %v15136_v0  ;;  %v5038_v20 = vadd.f32 %v12254_v19, %v4962_v13 }
 0x351   : > { %14531 = vmatprep.subr.bf16.mxu0 %v15136_v0  ;;  %6820 = vmatmul.mubr.f32.vlgmr.msra.gmra.mrb[88].mxu1 %v6595_v61 }
 0x352   : > { %14544 = vmatpush3.bf16.msra.mxu1 %v15136_v0  ;;  %v5110_v22 = vadd.f32 %v5109_v9, %v5038_v20  ;;  %7038 = vmatprep.mubr.f32.mxu1 %v7037_v21 }
 0x353   : > { %14545 = vmatprep.subr.bf16.mxu1 %v15136_v0 }
 0x354   : > { %14532 = vmatpush3.bf16.msra.mxu0 %v15136_v0 }
 0x355   : > { %14533 = vmatprep.subr.bf16.mxu0 %v15136_v0 }
 0x356   : > { %14546 = vmatpush3.bf16.msra.mxu1 %v15136_v0 }
 0x357   : > { %14547 = vmatprep.subr.bf16.mxu1 %v15136_v0 }
 0x358   : > { %14534 = vmatpush3.bf16.msra.mxu0 %v15136_v0 }
 0x359   : > { %14535 = vmatprep.subr.bf16.mxu0 %v15136_v0 }
 0x35a   : > { %14548 = vmatpush3.bf16.msra.mxu1 %v15136_v0 }
 0x35b   : > { %14549 = vmatprep.subr.bf16.mxu1 %v15136_v0 }
 0x35c   : > { %14536 = vmatpush3.bf16.msra.mxu0 %v15136_v0 }
 0x35d   : > { %14537 = vmatprep.subr.bf16.mxu0 %v15136_v0 }
 0x35e   : > { %14550 = vmatpush3.bf16.msra.mxu1 %v15136_v0 }
 0x35f   : > { %14551 = vmatprep.subr.bf16.mxu1 %v15136_v0 }
 0x360   : > { %14538 = vmatpush3.bf16.msra.mxu0 %v15136_v0 }
 0x361   : > { %14539 = vmatprep.subr.bf16.mxu0 %v15136_v0 }
 0x362   : > { %14552 = vmatpush3.bf16.msra.mxu1 %v15136_v0 }
 0x363   : > { %14553 = vmatprep.subr.bf16.mxu1 %v15136_v0 }
 0x364   : > { %14540 = vmatpush3.bf16.msra.mxu0 %v15136_v0 }
 0x365   : > { %14541 = vmatprep.subr.bf16.mxu0 %v15136_v0 }
 0x366   : > { %v12287_v52 = vpop.f32.mrb[64].mxu0  ;;  %14554 = vmatpush3.bf16.msra.mxu1 %v15136_v0 }
 0x367   : > { %v12288_v27 = vpop.f32.mrb[65].mxu0  ;;  %14555 = vmatprep.subr.bf16.mxu1 %v15136_v0 }
 0x368   : > { %14542 = vmatpush3.bf16.msra.mxu0 %v15136_v0  ;;  %v12289_v28 = vadd.f32 %v12288_v27, %v12287_v52 }
 0x369   : > { %7049 = vmatprep.subr.mxu0 %v15137_v1 }
 0x36a   : > { %v5182_v30 = vadd.f32 %v12289_v28, %v5110_v22  ;;  %v5333_v31 = vpop.f32.mrb[66].mxu0  ;;  %14556 = vmatpush3.bf16.msra.mxu1 %v15136_v0 }
 0x36b   : > { %6964 = vmatmul.mubr.f32.vlgmr.msra.gmra.mrb[88].mxu0 %v16415_v57  ;;  %v5335_v32 = vpop.f32.mrb[67].mxu0  ;;  %14557 = vmatprep.subr.bf16.mxu1 %v15136_v0  ;;  %v7436_v57 = vsel %vm7420_vm1, %v15051_v56, 0.0 }
 0x36c   : > { %7114 = vmatprep.mubr.f32.mxu0 %v16448_v11  ;;  %7050 = vmatpush1.msra.mxu0 %v15137_v1  ;;  %v12322_v37 = vpop.f32.mrb[66].mxu1  ;;  %v16568_v60 = vand.u32 4294901760, %v7436_v57 }
 0x36d   : > { %7121 = vmatprep.subr.mxu0 %v15137_v1  ;;  %v12323_v38 = vpop.f32.mrb[67].mxu1 }
 0x36e   : > { %v5407_v34 = vpop.f32.mrb[68].mxu0  ;;  %14558 = vmatpush3.bf16.msra.mxu1 %v15136_v0  ;;  %v12324_v39 = vadd.f32 %v12323_v38, %v12322_v37  ;;  %v7523_v63 = vsub.f32 %v7436_v57, %v16568_v60 }
 0x36f   : > { %7116 = vmatmul.mubr.f32.vlgmr.msra.gmra.mrb[90].mxu0 %v16495_v26  ;;  %v5409_v35 = vpop.f32.mrb[69].mxu0  ;;  %7271 = vmatprep.subr.mxu1 %v15137_v1 }
 0x370   : > { %7187 = vmatprep.mubr.f32.mxu0 %v16457_v14  ;;  %7122 = vmatpush1.msra.mxu0 %v15137_v1  ;;  %v5262_v41 = vadd.f32 %v12324_v39, %v5182_v30  ;;  %v5555_v42 = vpop.f32.mrb[68].mxu1  ;;  %v7524_v2 = vand.u32 4294901760, %v7523_v63 }
 0x371   : > { %14559 = vmatprep.subr.bf16.mxu0 %v15136_v0  ;;  %7044 = vmatmul.mubr.f32.vlgmr.msra.gmra.mrb[90].mxu1 %v7043_v40  ;;  %v5557_v43 = vpop.f32.mrb[69].mxu1 }
 0x372   : > { %v5334_v44 = vadd.f32 %v5333_v31, %v5262_v41  ;;  %7272 = vmatpush1.msra.mxu1 %v15137_v1  ;;  %7336 = vmatprep.mubr.f32.mxu1 %v16448_v11  ;;  %v7525_v3 = vsub.f32 %v7523_v63, %v7524_v2 }
 0x373   : > { %7190 = vmatmul.mubr.f32.vlgmr.msra.gmra.mrb[92].mxu0 %v16502_v29  ;;  %14575 = vmatprep.subr.bf16.mxu1 %v15136_v0 }
 0x374   : > { %14560 = vmatpush3.bf16.msra.mxu0 %v15136_v0  ;;  %7262 = vmatprep.mubr.f32.mxu0 %v7035_v15  ;;  %v5408_v45 = vadd.f32 %v5407_v34, %v5334_v44  ;;  %v7526_v6 = vand.u32 4294901760, %v7525_v3 }
 0x375   : > { %14561 = vmatprep.subr.bf16.mxu0 %v15136_v0  ;;  %7338 = vmatmul.mubr.f32.vlgmr.msra.gmra.mrb[92].mxu1 %v16495_v26 }
 0x376   : > { %14576 = vmatpush3.bf16.msra.mxu1 %v15136_v0  ;;  %7408 = vmatprep.mubr.f32.mxu1 %v16448_v11 }
 0x377   : > { %14577 = vmatprep.subr.bf16.mxu1 %v15136_v0 }
 0x378   : > { %14562 = vmatpush3.bf16.msra.mxu0 %v15136_v0 }
 0x379   : > { %14563 = vmatprep.subr.bf16.mxu0 %v15136_v0 }
 0x37a   : > { %14578 = vmatpush3.bf16.msra.mxu1 %v15136_v0 }
 0x37b   : > { %14579 = vmatprep.subr.bf16.mxu1 %v15136_v0 }
 0x37c   : > { %14564 = vmatpush3.bf16.msra.mxu0 %v15136_v0 }
 0x37d   : > { %14565 = vmatprep.subr.bf16.mxu0 %v15136_v0 }
 0x37e   : > { %14580 = vmatpush3.bf16.msra.mxu1 %v15136_v0 }
 0x37f   : > { %14581 = vmatprep.subr.bf16.mxu1 %v15136_v0 }
 0x380   : > { %14566 = vmatpush3.bf16.msra.mxu0 %v15136_v0 }
 0x381   : > { %14567 = vmatprep.subr.bf16.mxu0 %v15136_v0 }
 0x382   : > { %14582 = vmatpush3.bf16.msra.mxu1 %v15136_v0 }
 0x383   : > { %14583 = vmatprep.subr.bf16.mxu1 %v15136_v0 }
 0x384   : > { %14568 = vmatpush3.bf16.msra.mxu0 %v15136_v0 }
 0x385   : > { %14569 = vmatprep.subr.bf16.mxu0 %v15136_v0 }
 0x386   : > { %14584 = vmatpush3.bf16.msra.mxu1 %v15136_v0 }
 0x387   : > { %14585 = vmatprep.subr.bf16.mxu1 %v15136_v0 }
 0x388   : > { %14570 = vmatpush3.bf16.msra.mxu0 %v15136_v0 }
 0x389   : > { %14571 = vmatprep.subr.bf16.mxu0 %v15136_v0 }
 0x38a   : > { %14586 = vmatpush3.bf16.msra.mxu1 %v15136_v0 }
 0x38b   : > { %14587 = vmatprep.subr.bf16.mxu1 %v15136_v0 }
 0x38c   : > { %14572 = vmatpush3.bf16.msra.mxu0 %v15136_v0 }
 0x38d   : > { %14573 = vmatprep.subr.bf16.mxu0 %v15136_v0 }
 0x38e   : > { %v12357_v47 = vpop.f32.mrb[70].mxu0  ;;  %14588 = vmatpush3.bf16.msra.mxu1 %v15136_v0 }
 0x38f   : > { %v12358_v48 = vpop.f32.mrb[71].mxu0  ;;  %14589 = vmatprep.subr.bf16.mxu1 %v15136_v0 }
 0x390   : > { %14574 = vmatpush3.bf16.msra.mxu0 %v15136_v0  ;;  %v12359_v49 = vadd.f32 %v12358_v48, %v12357_v47  ;;  %v12392_v53 = vpop.f32.mrb[70].mxu1 }
 0x391   : > { %14591 = vmatprep.subr.bf16.mxu0 %v15136_v0  ;;  %v12393_v54 = vpop.f32.mrb[71].mxu1 }
 0x392   : > { %v5484_v50 = vadd.f32 %v12359_v49, %v5408_v45  ;;  %14590 = vmatpush3.bf16.msra.mxu1 %v15136_v0  ;;  %v12394_v55 = vadd.f32 %v12393_v54, %v12392_v53 }
 0x393   : > { %7266 = vmatmul.mubr.f32.vlgmr.msra.gmra.mrb[94].mxu0 %v7041_v33  ;;  %13703 = vmatprep.subr.mxu1 %v15137_v1 }
 0x394   : > { %14592 = vmatpush3.bf16.msra.mxu0 %v15136_v0  ;;  %v5556_v51 = vadd.f32 %v5555_v42, %v5484_v50  ;;  %7521 = vmatprep.mubr.f32.mxu0 %v15137_v1  ;;  %v5779_v59 = vpop.f32.mrb[72].mxu1 }
 0x395   : > { %14593 = vmatprep.subr.bf16.mxu0 %v15136_v0  ;;  %7410 = vmatmul.mubr.f32.vlgmr.msra.gmra.mrb[94].mxu1 %v16495_v26  ;;  %v5781_v46 = vpop.f32.mrb[73].mxu1 }
 0x396   : > { %v5628_v58 = vadd.f32 %v12394_v55, %v5556_v51  ;;  %13704 = vmatpush3.msra.mxu1 %v15137_v1  ;;  %13705 = vmatprep.mubr.msk.f32.mxu1 %vm15139_vm2, %v15137_v1 }
 0x397   : > { %13708 = vmatprep.subr.mxu1 %v15137_v1 }
 0x398   : > { %14594 = vmatpush3.bf16.msra.mxu0 %v15136_v0  ;;  %v5853_v61 = vpop.f32.mrb[74].mxu1 }
 0x399   : > { %14595 = vmatprep.subr.bf16.mxu0 %v15136_v0  ;;  %13706 = vmatmul.mubr.f32.vlgmr.msra.gmra.mrb[96].mxu1 %v16568_v60  ;;  %v5855_v62 = vpop.f32.mrb[75].mxu1 }
 0x39a   : > { %13709 = vmatpush3.msra.mxu1 %v15137_v1  ;;  %13710 = vmatprep.mubr.msk.f32.mxu1 %vm15139_vm2, %v15137_v1 }
 0x39b   : > { %14607 = vmatprep.subr.bf16.mxu1 %v15136_v0 }
 0x39c   : > { %14596 = vmatpush3.bf16.msra.mxu0 %v15136_v0 }
 0x39d   : > { %14597 = vmatprep.subr.bf16.mxu0 %v15136_v0  ;;  %13711 = vmatmul.mubr.f32.vlgmr.msra.gmra.mrb[98].mxu1 %v7523_v63 }
 0x39e   : > { %14608 = vmatpush3.bf16.msra.mxu1 %v15136_v0  ;;  %7745 = vmatprep.mubr.f32.mxu1 %v15137_v1 }
 0x39f   : > { %14609 = vmatprep.subr.bf16.mxu1 %v15136_v0 }
 0x3a0   : > { %14598 = vmatpush3.bf16.msra.mxu0 %v15136_v0 }
 0x3a1   : > { %14599 = vmatprep.subr.bf16.mxu0 %v15136_v0 }
 0x3a2   : > { %14610 = vmatpush3.bf16.msra.mxu1 %v15136_v0 }
 0x3a3   : > { %14611 = vmatprep.subr.bf16.mxu1 %v15136_v0 }
 0x3a4   : > { %14600 = vmatpush3.bf16.msra.mxu0 %v15136_v0 }
 0x3a5   : > { %14601 = vmatprep.subr.bf16.mxu0 %v15136_v0 }
 0x3a6   : > { %14612 = vmatpush3.bf16.msra.mxu1 %v15136_v0 }
 0x3a7   : > { %14613 = vmatprep.subr.bf16.mxu1 %v15136_v0 }
 0x3a8   : > { %14602 = vmatpush3.bf16.msra.mxu0 %v15136_v0 }
 0x3a9   : > { %14603 = vmatprep.subr.bf16.mxu0 %v15136_v0 }
 0x3aa   : > { %14614 = vmatpush3.bf16.msra.mxu1 %v15136_v0 }
 0x3ab   : > { %14615 = vmatprep.subr.bf16.mxu1 %v15136_v0 }
 0x3ac   : > { %14604 = vmatpush3.bf16.msra.mxu0 %v15136_v0 }
 0x3ad   : > { %14605 = vmatprep.subr.bf16.mxu0 %v15136_v0 }
 0x3ae   : > { %v12427_v4 = vpop.f32.mrb[72].mxu0  ;;  %14616 = vmatpush3.bf16.msra.mxu1 %v15136_v0 }
 0x3af   : > { %v12428_v5 = vpop.f32.mrb[73].mxu0  ;;  %14617 = vmatprep.subr.bf16.mxu1 %v15136_v0 }
 0x3b0   : > { %14606 = vmatpush3.bf16.msra.mxu0 %v15136_v0  ;;  %v12429_v7 = vadd.f32 %v12428_v5, %v12427_v4 }
 0x3b1   : > { %13713 = vmatprep.subr.mxu0 %v15137_v1 }
 0x3b2   : > { %v5708_v8 = vadd.f32 %v12429_v7, %v5628_v58  ;;  %v6001_v9 = vpop.f32.mrb[74].mxu0  ;;  %14618 = vmatpush3.bf16.msra.mxu1 %v15136_v0 }
 0x3b3   : > { %7527 = vmatmul.mubr.f32.vlgmr.msra.gmra.mrb[96].mxu0 %v7526_v6  ;;  %v6003_v10 = vpop.f32.mrb[75].mxu0  ;;  %14619 = vmatprep.subr.bf16.mxu1 %v15136_v0 }
 0x3b4   : > { %v5780_v11 = vadd.f32 %v5779_v59, %v5708_v8  ;;  %13714 = vmatpush3.msra.mxu0 %v15137_v1  ;;  %13715 = vmatprep.mubr.msk.f32.mxu0 %vm15139_vm2, %v15137_v1 }
 0x3b5   : > { %14623 = vmatprep.subr.bf16.mxu0 %v15136_v0 }
 0x3b6   : > { %v5854_v12 = vadd.f32 %v5853_v61, %v5780_v11  ;;  %14620 = vmatpush3.bf16.msra.mxu1 %v15136_v0 }
 0x3b7   : > { %13716 = vmatmul.mubr.f32.vlgmr.msra.gmra.mrb[98].mxu0 %v16568_v60  ;;  %14621 = vmatprep.subr.bf16.mxu1 %v15136_v0 }
 0x3b8   : > { %14624 = vmatpush3.bf16.msra.mxu0 %v15136_v0  ;;  %7891 = vmatprep.mubr.f32.mxu0 %v15137_v1  ;;  %v12462_v13 = vpop.f32.mrb[76].mxu1 }
 0x3b9   : > { %14625 = vmatprep.subr.bf16.mxu0 %v15136_v0  ;;  %v12463_v14 = vpop.f32.mrb[77].mxu1 }
 0x3ba   : > { %14622 = vmatpush3.bf16.msra.mxu1 %v15136_v0  ;;  %v12464_v15 = vadd.f32 %v12463_v14, %v12462_v13 }
 0x3bb   : > { %14639 = vmatprep.subr.bf16.mxu1 %v15136_v0 }
 0x3bc   : > { %14626 = vmatpush3.bf16.msra.mxu0 %v15136_v0  ;;  %v5930_v16 = vadd.f32 %v12464_v15, %v5854_v12 }
 0x3bd   : > { %14627 = vmatprep.subr.bf16.mxu0 %v15136_v0  ;;  %7749 = vmatmul.mubr.f32.vlgmr.msra.gmra.mrb[100].mxu1 %v7524_v2 }
 0x3be   : > { %14640 = vmatpush3.bf16.msra.mxu1 %v15136_v0  ;;  %v6002_v17 = vadd.f32 %v6001_v9, %v5930_v16  ;;  %7967 = vmatprep.mubr.f32.mxu1 %v15137_v1 }
 0x3bf   : > { %14641 = vmatprep.subr.bf16.mxu1 %v15136_v0 }
 0x3c0   : > { %14628 = vmatpush3.bf16.msra.mxu0 %v15136_v0 }
 0x3c1   : > { %14629 = vmatprep.subr.bf16.mxu0 %v15136_v0 }
 0x3c2   : > { %14642 = vmatpush3.bf16.msra.mxu1 %v15136_v0 }
 0x3c3   : > { %14643 = vmatprep.subr.bf16.mxu1 %v15136_v0 }
 0x3c4   : > { %14630 = vmatpush3.bf16.msra.mxu0 %v15136_v0 }
 0x3c5   : > { %14631 = vmatprep.subr.bf16.mxu0 %v15136_v0 }
 0x3c6   : > { %14644 = vmatpush3.bf16.msra.mxu1 %v15136_v0 }
 0x3c7   : > { %14645 = vmatprep.subr.bf16.mxu1 %v15136_v0 }
 0x3c8   : > { %14632 = vmatpush3.bf16.msra.mxu0 %v15136_v0 }
 0x3c9   : > { %14633 = vmatprep.subr.bf16.mxu0 %v15136_v0 }
 0x3ca   : > { %14646 = vmatpush3.bf16.msra.mxu1 %v15136_v0 }
 0x3cb   : > { %14647 = vmatprep.subr.bf16.mxu1 %v15136_v0 }
 0x3cc   : > { %14634 = vmatpush3.bf16.msra.mxu0 %v15136_v0 }
 0x3cd   : > { %14635 = vmatprep.subr.bf16.mxu0 %v15136_v0 }
 0x3ce   : > { %14648 = vmatpush3.bf16.msra.mxu1 %v15136_v0 }
 0x3cf   : > { %14649 = vmatprep.subr.bf16.mxu1 %v15136_v0 }
 0x3d0   : > { %14636 = vmatpush3.bf16.msra.mxu0 %v15136_v0 }
 0x3d1   : > { %14637 = vmatprep.subr.bf16.mxu0 %v15136_v0 }
 0x3d2   : > { %v12497_v18 = vpop.f32.mrb[76].mxu0  ;;  %14650 = vmatpush3.bf16.msra.mxu1 %v15136_v0 }
 0x3d3   : > { %v12498_v19 = vpop.f32.mrb[77].mxu0  ;;  %14651 = vmatprep.subr.bf16.mxu1 %v15136_v0 }
 0x3d4   : > { %14638 = vmatpush3.bf16.msra.mxu0 %v15136_v0  ;;  %v12499_v20 = vadd.f32 %v12498_v19, %v12497_v18 }
 0x3d5   : > { %13718 = vmatprep.subr.mxu0 %v15137_v1 }
 0x3d6   : > { %v6074_v21 = vadd.f32 %v12499_v20, %v6002_v17  ;;  %v6225_v22 = vpop.f32.mrb[78].mxu0  ;;  %14652 = vmatpush3.bf16.msra.mxu1 %v15136_v0 }
 0x3d7   : > { %7893 = vmatmul.mubr.f32.vlgmr.msra.gmra.mrb[100].mxu0 %v16568_v60  ;;  %v6227_v23 = vpop.f32.mrb[79].mxu0  ;;  %14653 = vmatprep.subr.bf16.mxu1 %v15136_v0 }
 0x3d8   : > { %13719 = vmatpush3.msra.mxu0 %v15137_v1  ;;  %13720 = vmatprep.mubr.msk.f32.mxu0 %vm15139_vm2, %v15137_v1  ;;  %v12532_v26 = vpop.f32.mrb[78].mxu1 }
 0x3d9   : > { %13723 = vmatprep.subr.mxu0 %v15137_v1  ;;  %v12533_v52 = vpop.f32.mrb[79].mxu1 }
 0x3da   : > { %v6299_v24 = vpop.f32.mrb[80].mxu0  ;;  %14654 = vmatpush3.bf16.msra.mxu1 %v15136_v0  ;;  %v12534_v27 = vadd.f32 %v12533_v52, %v12532_v26 }
 0x3db   : > { %13721 = vmatmul.mubr.f32.vlgmr.msra.gmra.mrb[102].mxu0 %v15137_v1  ;;  %v6301_v25 = vpop.f32.mrb[81].mxu0  ;;  %13728 = vmatprep.subr.mxu1 %v15137_v1 }
 0x3dc   : > { %13724 = vmatpush3.msra.mxu0 %v15137_v1  ;;  %13725 = vmatprep.mubr.msk.f32.mxu0 %vm15139_vm2, %v15137_v1  ;;  %v6154_v28 = vadd.f32 %v12534_v27, %v6074_v21  ;;  %v6447_v29 = vpop.f32.mrb[80].mxu1 }
 0x3dd   : > { %14655 = vmatprep.subr.bf16.mxu0 %v15136_v0  ;;  %7973 = vmatmul.mubr.f32.vlgmr.msra.gmra.mrb[102].mxu1 %v15137_v1  ;;  %v6449_v30 = vpop.f32.mrb[81].mxu1 }
 0x3de   : > { %v6226_v31 = vadd.f32 %v6225_v22, %v6154_v28  ;;  %13729 = vmatpush3.msra.mxu1 %v15137_v1  ;;  %13730 = vmatprep.mubr.msk.f32.mxu1 %vm15139_vm2, %v15137_v1  ;;  %v3846_v22 = vld [vmem:[#allocation3] sm:$0xff] }
 0x3df   : > { %13726 = vmatmul.mubr.f32.vlgmr.msra.gmra.mrb[104].mxu0 %v15137_v1  ;;  %14671 = vmatprep.subr.bf16.mxu1 %v15136_v0 }
 0x3e0   : > { %14656 = vmatpush3.bf16.msra.mxu0 %v15136_v0  ;;  %8191 = vmatprep.mubr.f32.mxu0 %v15137_v1  ;;  %v6300_v32 = vadd.f32 %v6299_v24, %v6226_v31 }
 0x3e1   : > { %14657 = vmatprep.subr.bf16.mxu0 %v15136_v0  ;;  %13731 = vmatmul.mubr.f32.vlgmr.msra.gmra.mrb[104].mxu1 %v15137_v1 }
 0x3e2   : > { %14672 = vmatpush3.bf16.msra.mxu1 %v15136_v0  ;;  %8337 = vmatprep.mubr.f32.mxu1 %v15137_v1 }
 0x3e3   : > { %14673 = vmatprep.subr.bf16.mxu1 %v15136_v0 }
 0x3e4   : > { %14658 = vmatpush3.bf16.msra.mxu0 %v15136_v0 }
 0x3e5   : > { %14659 = vmatprep.subr.bf16.mxu0 %v15136_v0 }
 0x3e6   : > { %14674 = vmatpush3.bf16.msra.mxu1 %v15136_v0 }
 0x3e7   : > { %14675 = vmatprep.subr.bf16.mxu1 %v15136_v0 }
 0x3e8   : > { %14660 = vmatpush3.bf16.msra.mxu0 %v15136_v0 }
 0x3e9   : > { %14661 = vmatprep.subr.bf16.mxu0 %v15136_v0 }
 0x3ea   : > { %14676 = vmatpush3.bf16.msra.mxu1 %v15136_v0 }
 0x3eb   : > { %14677 = vmatprep.subr.bf16.mxu1 %v15136_v0 }
 0x3ec   : > { %14662 = vmatpush3.bf16.msra.mxu0 %v15136_v0 }
 0x3ed   : > { %14663 = vmatprep.subr.bf16.mxu0 %v15136_v0 }
 0x3ee   : > { %14678 = vmatpush3.bf16.msra.mxu1 %v15136_v0 }
 0x3ef   : > { %14679 = vmatprep.subr.bf16.mxu1 %v15136_v0 }
 0x3f0   : > { %14664 = vmatpush3.bf16.msra.mxu0 %v15136_v0 }
 0x3f1   : > { %14665 = vmatprep.subr.bf16.mxu0 %v15136_v0 }
 0x3f2   : > { %14680 = vmatpush3.bf16.msra.mxu1 %v15136_v0 }
 0x3f3   : > { %14681 = vmatprep.subr.bf16.mxu1 %v15136_v0 }
 0x3f4   : > { %14666 = vmatpush3.bf16.msra.mxu0 %v15136_v0 }
 0x3f5   : > { %14667 = vmatprep.subr.bf16.mxu0 %v15136_v0 }
 0x3f6   : > { %14682 = vmatpush3.bf16.msra.mxu1 %v15136_v0 }
 0x3f7   : > { %14683 = vmatprep.subr.bf16.mxu1 %v15136_v0 }
 0x3f8   : > { %14668 = vmatpush3.bf16.msra.mxu0 %v15136_v0 }
 0x3f9   : > { %14669 = vmatprep.subr.bf16.mxu0 %v15136_v0 }
 0x3fa   : > { %v12567_v33 = vpop.f32.mrb[82].mxu0  ;;  %14684 = vmatpush3.bf16.msra.mxu1 %v15136_v0 }
 0x3fb   : > { %v12568_v34 = vpop.f32.mrb[83].mxu0  ;;  %14685 = vmatprep.subr.bf16.mxu1 %v15136_v0 }
 0x3fc   : > { %14670 = vmatpush3.bf16.msra.mxu0 %v15136_v0  ;;  %v12569_v35 = vadd.f32 %v12568_v34, %v12567_v33  ;;  %v12602_v38 = vpop.f32.mrb[82].mxu1 }
 0x3fd   : > { %14687 = vmatprep.subr.bf16.mxu0 %v15136_v0  ;;  %v12603_v39 = vpop.f32.mrb[83].mxu1 }
 0x3fe   : > { %v6376_v36 = vadd.f32 %v12569_v35, %v6300_v32  ;;  %14686 = vmatpush3.bf16.msra.mxu1 %v15136_v0  ;;  %v12604_v40 = vadd.f32 %v12603_v39, %v12602_v38 }
 0x3ff   : > { %8195 = vmatmul.mubr.f32.vlgmr.msra.gmra.mrb[106].mxu0 %v15137_v1  ;;  %13733 = vmatprep.subr.mxu1 %v15137_v1 }
 0x400   : > { %14688 = vmatpush3.bf16.msra.mxu0 %v15136_v0  ;;  %v6448_v37 = vadd.f32 %v6447_v29, %v6376_v36  ;;  %8413 = vmatprep.mubr.f32.mxu0 %v15137_v1  ;;  %v6671_v42 = vpop.f32.mrb[84].mxu1 }
 0x401   : > { %14689 = vmatprep.subr.bf16.mxu0 %v15136_v0  ;;  %8339 = vmatmul.mubr.f32.vlgmr.msra.gmra.mrb[106].mxu1 %v15137_v1  ;;  %v6673_v43 = vpop.f32.mrb[85].mxu1 }
 0x402   : > { %v6520_v41 = vadd.f32 %v12604_v40, %v6448_v37  ;;  %13734 = vmatpush3.msra.mxu1 %v15137_v1  ;;  %13735 = vmatprep.mubr.msk.f32.mxu1 %vm15139_vm2, %v15137_v1 }
 0x403   : > { %13738 = vmatprep.subr.mxu1 %v15137_v1 }
 0x404   : > { %14690 = vmatpush3.bf16.msra.mxu0 %v15136_v0  ;;  %v6745_v44 = vpop.f32.mrb[86].mxu1 }
 0x405   : > { %14691 = vmatprep.subr.bf16.mxu0 %v15136_v0  ;;  %13736 = vmatmul.mubr.f32.vlgmr.msra.gmra.mrb[108].mxu1 %v15137_v1  ;;  %v6747_v45 = vpop.f32.mrb[87].mxu1 }
 0x406   : > { %13739 = vmatpush3.msra.mxu1 %v15137_v1  ;;  %13740 = vmatprep.mubr.msk.f32.mxu1 %vm15139_vm2, %v15137_v1 }
 0x407   : > { %14703 = vmatprep.subr.bf16.mxu1 %v15136_v0 }
 0x408   : > { %14692 = vmatpush3.bf16.msra.mxu0 %v15136_v0 }
 0x409   : > { %14693 = vmatprep.subr.bf16.mxu0 %v15136_v0  ;;  %13741 = vmatmul.mubr.f32.vlgmr.msra.gmra.mrb[110].mxu1 %v15137_v1 }
 0x40a   : > { %14704 = vmatpush3.bf16.msra.mxu1 %v15136_v0  ;;  %8637 = vmatprep.mubr.f32.mxu1 %v15137_v1 }
 0x40b   : > { %14705 = vmatprep.subr.bf16.mxu1 %v15136_v0 }
 0x40c   : > { %14694 = vmatpush3.bf16.msra.mxu0 %v15136_v0 }
 0x40d   : > { %14695 = vmatprep.subr.bf16.mxu0 %v15136_v0 }
 0x40e   : > { %14706 = vmatpush3.bf16.msra.mxu1 %v15136_v0 }
 0x40f   : > { %14707 = vmatprep.subr.bf16.mxu1 %v15136_v0 }
 0x410   : > { %14696 = vmatpush3.bf16.msra.mxu0 %v15136_v0 }
 0x411   : > { %14697 = vmatprep.subr.bf16.mxu0 %v15136_v0 }
 0x412   : > { %14708 = vmatpush3.bf16.msra.mxu1 %v15136_v0 }
 0x413   : > { %14709 = vmatprep.subr.bf16.mxu1 %v15136_v0 }
 0x414   : > { %14698 = vmatpush3.bf16.msra.mxu0 %v15136_v0 }
 0x415   : > { %14699 = vmatprep.subr.bf16.mxu0 %v15136_v0 }
 0x416   : > { %14710 = vmatpush3.bf16.msra.mxu1 %v15136_v0 }
 0x417   : > { %14711 = vmatprep.subr.bf16.mxu1 %v15136_v0 }
 0x418   : > { %14700 = vmatpush3.bf16.msra.mxu0 %v15136_v0 }
 0x419   : > { %14701 = vmatprep.subr.bf16.mxu0 %v15136_v0 }
 0x41a   : > { %v12637_v47 = vpop.f32.mrb[84].mxu0  ;;  %14712 = vmatpush3.bf16.msra.mxu1 %v15136_v0 }
 0x41b   : > { %v12638_v48 = vpop.f32.mrb[85].mxu0  ;;  %14713 = vmatprep.subr.bf16.mxu1 %v15136_v0 }
 0x41c   : > { %14702 = vmatpush3.bf16.msra.mxu0 %v15136_v0  ;;  %v12639_v49 = vadd.f32 %v12638_v48, %v12637_v47 }
 0x41d   : > { %13743 = vmatprep.subr.mxu0 %v15137_v1 }
 0x41e   : > { %v6600_v50 = vadd.f32 %v12639_v49, %v6520_v41  ;;  %v6893_v51 = vpop.f32.mrb[86].mxu0  ;;  %14714 = vmatpush3.bf16.msra.mxu1 %v15136_v0 }
 0x41f   : > { %8419 = vmatmul.mubr.f32.vlgmr.msra.gmra.mrb[108].mxu0 %v15137_v1  ;;  %v6895_v53 = vpop.f32.mrb[87].mxu0  ;;  %14715 = vmatprep.subr.bf16.mxu1 %v15136_v0 }
 0x420   : > { %v6672_v54 = vadd.f32 %v6671_v42, %v6600_v50  ;;  %13744 = vmatpush3.msra.mxu0 %v15137_v1  ;;  %13745 = vmatprep.mubr.msk.f32.mxu0 %vm15139_vm2, %v15137_v1 }
 0x421   : > { %14719 = vmatprep.subr.bf16.mxu0 %v15136_v0 }
 0x422   : > { %v6746_v55 = vadd.f32 %v6745_v44, %v6672_v54  ;;  %14716 = vmatpush3.bf16.msra.mxu1 %v15136_v0 }
 0x423   : > { %13746 = vmatmul.mubr.f32.vlgmr.msra.gmra.mrb[110].mxu0 %v15137_v1  ;;  %14717 = vmatprep.subr.bf16.mxu1 %v15136_v0 }
 0x424   : > { %14720 = vmatpush3.bf16.msra.mxu0 %v15136_v0  ;;  %8783 = vmatprep.mubr.f32.mxu0 %v15137_v1  ;;  %v12672_v56 = vpop.f32.mrb[88].mxu1 }
 0x425   : > { %14721 = vmatprep.subr.bf16.mxu0 %v15136_v0  ;;  %v12673_v57 = vpop.f32.mrb[89].mxu1 }
 0x426   : > { %14718 = vmatpush3.bf16.msra.mxu1 %v15136_v0  ;;  %v12674_v58 = vadd.f32 %v12673_v57, %v12672_v56 }
 0x427   : > { %14735 = vmatprep.subr.bf16.mxu1 %v15136_v0 }
 0x428   : > { %14722 = vmatpush3.bf16.msra.mxu0 %v15136_v0  ;;  %v6822_v59 = vadd.f32 %v12674_v58, %v6746_v55 }
 0x429   : > { %14723 = vmatprep.subr.bf16.mxu0 %v15136_v0  ;;  %8641 = vmatmul.mubr.f32.vlgmr.msra.gmra.mrb[112].mxu1 %v15137_v1 }
 0x42a   : > { %14736 = vmatpush3.bf16.msra.mxu1 %v15136_v0  ;;  %v6894_v46 = vadd.f32 %v6893_v51, %v6822_v59  ;;  %8859 = vmatprep.mubr.f32.mxu1 %v15137_v1 }
 0x42b   : > { %14737 = vmatprep.subr.bf16.mxu1 %v15136_v0 }
 0x42c   : > { %14724 = vmatpush3.bf16.msra.mxu0 %v15136_v0 }
 0x42d   : > { %14725 = vmatprep.subr.bf16.mxu0 %v15136_v0 }
 0x42e   : > { %14738 = vmatpush3.bf16.msra.mxu1 %v15136_v0 }
 0x42f   : > { %14739 = vmatprep.subr.bf16.mxu1 %v15136_v0 }
 0x430   : > { %14726 = vmatpush3.bf16.msra.mxu0 %v15136_v0 }
 0x431   : > { %14727 = vmatprep.subr.bf16.mxu0 %v15136_v0 }
 0x432   : > { %14740 = vmatpush3.bf16.msra.mxu1 %v15136_v0 }
 0x433   : > { %14741 = vmatprep.subr.bf16.mxu1 %v15136_v0 }
 0x434   : > { %14728 = vmatpush3.bf16.msra.mxu0 %v15136_v0 }
 0x435   : > { %14729 = vmatprep.subr.bf16.mxu0 %v15136_v0 }
 0x436   : > { %14742 = vmatpush3.bf16.msra.mxu1 %v15136_v0 }
 0x437   : > { %14743 = vmatprep.subr.bf16.mxu1 %v15136_v0 }
 0x438   : > { %14730 = vmatpush3.bf16.msra.mxu0 %v15136_v0 }
 0x439   : > { %14731 = vmatprep.subr.bf16.mxu0 %v15136_v0 }
 0x43a   : > { %14744 = vmatpush3.bf16.msra.mxu1 %v15136_v0 }
 0x43b   : > { %14745 = vmatprep.subr.bf16.mxu1 %v15136_v0 }
 0x43c   : > { %14732 = vmatpush3.bf16.msra.mxu0 %v15136_v0 }
 0x43d   : > { %14733 = vmatprep.subr.bf16.mxu0 %v15136_v0 }
 0x43e   : > { %v12707_v60 = vpop.f32.mrb[88].mxu0  ;;  %14746 = vmatpush3.bf16.msra.mxu1 %v15136_v0 }
 0x43f   : > { %v12708_v61 = vpop.f32.mrb[89].mxu0  ;;  %14747 = vmatprep.subr.bf16.mxu1 %v15136_v0 }
 0x440   : > { %14734 = vmatpush3.bf16.msra.mxu0 %v15136_v0  ;;  %v12709_v62 = vadd.f32 %v12708_v61, %v12707_v60 }
 0x441   : > { %13748 = vmatprep.subr.mxu0 %v15137_v1 }
 0x442   : > { %v6966_v63 = vadd.f32 %v12709_v62, %v6894_v46  ;;  %v7117_v2 = vpop.f32.mrb[90].mxu0  ;;  %14748 = vmatpush3.bf16.msra.mxu1 %v15136_v0 }
 0x443   : > { %8785 = vmatmul.mubr.f32.vlgmr.msra.gmra.mrb[112].mxu0 %v15137_v1  ;;  %v7119_v3 = vpop.f32.mrb[91].mxu0  ;;  %14749 = vmatprep.subr.bf16.mxu1 %v15136_v0 }
 0x444   : > { %13749 = vmatpush3.msra.mxu0 %v15137_v1  ;;  %13750 = vmatprep.mubr.msk.f32.mxu0 %vm15139_vm2, %v15137_v1  ;;  %v12742_v6 = vpop.f32.mrb[90].mxu1 }
 0x445   : > { %13753 = vmatprep.subr.mxu0 %v15137_v1  ;;  %v12743_v7 = vpop.f32.mrb[91].mxu1 }
 0x446   : > { %v7191_v4 = vpop.f32.mrb[92].mxu0  ;;  %14750 = vmatpush3.bf16.msra.mxu1 %v15136_v0  ;;  %v12744_v8 = vadd.f32 %v12743_v7, %v12742_v6 }
 0x447   : > { %13751 = vmatmul.mubr.f32.vlgmr.msra.gmra.mrb[114].mxu0 %v15137_v1  ;;  %v7193_v5 = vpop.f32.mrb[93].mxu0  ;;  %13758 = vmatprep.subr.mxu1 %v15137_v1 }
 0x448   : > { %13754 = vmatpush3.msra.mxu0 %v15137_v1  ;;  %13755 = vmatprep.mubr.msk.f32.mxu0 %vm15139_vm2, %v15137_v1  ;;  %v7046_v9 = vadd.f32 %v12744_v8, %v6966_v63  ;;  %v7339_v10 = vpop.f32.mrb[92].mxu1 }
 0x449   : > { %14751 = vmatprep.subr.bf16.mxu0 %v15136_v0  ;;  %8865 = vmatmul.mubr.f32.vlgmr.msra.gmra.mrb[114].mxu1 %v15137_v1  ;;  %v7341_v11 = vpop.f32.mrb[93].mxu1 }
 0x44a   : > { %v7118_v12 = vadd.f32 %v7117_v2, %v7046_v9  ;;  %13759 = vmatpush3.msra.mxu1 %v15137_v1  ;;  %13760 = vmatprep.mubr.msk.f32.mxu1 %vm15139_vm2, %v15137_v1 }
 0x44b   : > { %13756 = vmatmul.mubr.f32.vlgmr.msra.gmra.mrb[116].mxu0 %v15137_v1  ;;  %14767 = vmatprep.subr.bf16.mxu1 %v15136_v0 }
 0x44c   : > { %14752 = vmatpush3.bf16.msra.mxu0 %v15136_v0  ;;  %9083 = vmatprep.mubr.f32.mxu0 %v15137_v1  ;;  %v7192_v13 = vadd.f32 %v7191_v4, %v7118_v12 }
 0x44d   : > { %14753 = vmatprep.subr.bf16.mxu0 %v15136_v0  ;;  %13761 = vmatmul.mubr.f32.vlgmr.msra.gmra.mrb[116].mxu1 %v15137_v1 }
 0x44e   : > { %14768 = vmatpush3.bf16.msra.mxu1 %v15136_v0  ;;  %9229 = vmatprep.mubr.f32.mxu1 %v15137_v1 }
 0x44f   : > { %14769 = vmatprep.subr.bf16.mxu1 %v15136_v0 }
 0x450   : > { %14754 = vmatpush3.bf16.msra.mxu0 %v15136_v0 }
 0x451   : > { %14755 = vmatprep.subr.bf16.mxu0 %v15136_v0 }
 0x452   : > { %14770 = vmatpush3.bf16.msra.mxu1 %v15136_v0 }
 0x453   : > { %14771 = vmatprep.subr.bf16.mxu1 %v15136_v0 }
 0x454   : > { %14756 = vmatpush3.bf16.msra.mxu0 %v15136_v0 }
 0x455   : > { %14757 = vmatprep.subr.bf16.mxu0 %v15136_v0 }
 0x456   : > { %14772 = vmatpush3.bf16.msra.mxu1 %v15136_v0 }
 0x457   : > { %14773 = vmatprep.subr.bf16.mxu1 %v15136_v0 }
 0x458   : > { %14758 = vmatpush3.bf16.msra.mxu0 %v15136_v0 }
 0x459   : > { %14759 = vmatprep.subr.bf16.mxu0 %v15136_v0 }
 0x45a   : > { %14774 = vmatpush3.bf16.msra.mxu1 %v15136_v0 }
 0x45b   : > { %14775 = vmatprep.subr.bf16.mxu1 %v15136_v0 }
 0x45c   : > { %14760 = vmatpush3.bf16.msra.mxu0 %v15136_v0 }
 0x45d   : > { %14761 = vmatprep.subr.bf16.mxu0 %v15136_v0 }
 0x45e   : > { %14776 = vmatpush3.bf16.msra.mxu1 %v15136_v0 }
 0x45f   : > { %14777 = vmatprep.subr.bf16.mxu1 %v15136_v0 }
 0x460   : > { %14762 = vmatpush3.bf16.msra.mxu0 %v15136_v0 }
 0x461   : > { %14763 = vmatprep.subr.bf16.mxu0 %v15136_v0 }
 0x462   : > { %14778 = vmatpush3.bf16.msra.mxu1 %v15136_v0 }
 0x463   : > { %14779 = vmatprep.subr.bf16.mxu1 %v15136_v0 }
 0x464   : > { %14764 = vmatpush3.bf16.msra.mxu0 %v15136_v0 }
 0x465   : > { %14765 = vmatprep.subr.bf16.mxu0 %v15136_v0 }
 0x466   : > { %v12777_v14 = vpop.f32.mrb[94].mxu0  ;;  %14780 = vmatpush3.bf16.msra.mxu1 %v15136_v0 }
 0x467   : > { %v12778_v15 = vpop.f32.mrb[95].mxu0  ;;  %14781 = vmatprep.subr.bf16.mxu1 %v15136_v0 }
 0x468   : > { %14766 = vmatpush3.bf16.msra.mxu0 %v15136_v0  ;;  %v12779_v16 = vadd.f32 %v12778_v15, %v12777_v14  ;;  %v12812_v19 = vpop.f32.mrb[94].mxu1 }
 0x469   : > { %14783 = vmatprep.subr.bf16.mxu0 %v15136_v0  ;;  %v12813_v20 = vpop.f32.mrb[95].mxu1 }
 0x46a   : > { %v7268_v17 = vadd.f32 %v12779_v16, %v7192_v13  ;;  %14782 = vmatpush3.bf16.msra.mxu1 %v15136_v0  ;;  %v12814_v21 = vadd.f32 %v12813_v20, %v12812_v19 }
 0x46b   : > { %9087 = vmatmul.mubr.f32.vlgmr.msra.gmra.mrb[118].mxu0 %v15137_v1  ;;  %13763 = vmatprep.subr.mxu1 %v15137_v1 }
 0x46c   : > { %14784 = vmatpush3.bf16.msra.mxu0 %v15136_v0  ;;  %v7340_v18 = vadd.f32 %v7339_v10, %v7268_v17  ;;  %9305 = vmatprep.mubr.f32.mxu0 %v15137_v1  ;;  %v7600_v24 = vpop.f32.mrb[96].mxu1 }
 0x46d   : > { %14785 = vmatprep.subr.bf16.mxu0 %v15136_v0  ;;  %9231 = vmatmul.mubr.f32.vlgmr.msra.gmra.mrb[118].mxu1 %v15137_v1  ;;  %v13707_v25 = vpop.f32.mrb[97].mxu1 }
 0x46e   : > { %v7412_v23 = vadd.f32 %v12814_v21, %v7340_v18  ;;  %13764 = vmatpush3.msra.mxu1 %v15137_v1  ;;  %13765 = vmatprep.mubr.msk.f32.mxu1 %vm15139_vm2, %v15137_v1 }
 0x46f   : > { %13768 = vmatprep.subr.mxu1 %v15137_v1 }
 0x470   : > { %14786 = vmatpush3.bf16.msra.mxu0 %v15136_v0  ;;  %v7415_v26 = vadd.f32 %v7412_v23, %v3846_v22  ;;  %v7674_v52 = vpop.f32.mrb[98].mxu1 }
 0x471   : > { %14787 = vmatprep.subr.bf16.mxu0 %v15136_v0  ;;  %13766 = vmatmul.mubr.f32.vlgmr.msra.gmra.mrb[120].mxu1 %v15137_v1  ;;  %v13712_v27 = vpop.f32.mrb[99].mxu1 }
 0x472   : > { %7416 = vst.msk [vmem:[#allocation3] sm:$0xff] %vm198_vm5, %v7415_v26  ;;  %13769 = vmatpush3.msra.mxu1 %v15137_v1  ;;  %13770 = vmatprep.mubr.msk.f32.mxu1 %vm15139_vm2, %v15137_v1 }
 0x473   : > { %14799 = vmatprep.subr.bf16.mxu1 %v15136_v0 }
 0x474   : > { %14788 = vmatpush3.bf16.msra.mxu0 %v15136_v0 }
 0x475   : > { %14789 = vmatprep.subr.bf16.mxu0 %v15136_v0  ;;  %13771 = vmatmul.mubr.f32.vlgmr.msra.gmra.mrb[122].mxu1 %v15137_v1 }
 0x476   : > { %14800 = vmatpush3.bf16.msra.mxu1 %v15136_v0  ;;  %9529 = vmatprep.mubr.f32.mxu1 %v15137_v1 }
 0x477   : > { %14801 = vmatprep.subr.bf16.mxu1 %v15136_v0 }
 0x478   : > { %14790 = vmatpush3.bf16.msra.mxu0 %v15136_v0 }
 0x479   : > { %14791 = vmatprep.subr.bf16.mxu0 %v15136_v0 }
 0x47a   : > { %14802 = vmatpush3.bf16.msra.mxu1 %v15136_v0 }
 0x47b   : > { %14803 = vmatprep.subr.bf16.mxu1 %v15136_v0 }
 0x47c   : > { %14792 = vmatpush3.bf16.msra.mxu0 %v15136_v0 }
 0x47d   : > { %14793 = vmatprep.subr.bf16.mxu0 %v15136_v0 }
 0x47e   : > { %14804 = vmatpush3.bf16.msra.mxu1 %v15136_v0 }
 0x47f   : > { %14805 = vmatprep.subr.bf16.mxu1 %v15136_v0 }
 0x480   : > { %14794 = vmatpush3.bf16.msra.mxu0 %v15136_v0 }
 0x481   : > { %14795 = vmatprep.subr.bf16.mxu0 %v15136_v0 }
 0x482   : > { %14806 = vmatpush3.bf16.msra.mxu1 %v15136_v0 }
 0x483   : > { %14807 = vmatprep.subr.bf16.mxu1 %v15136_v0 }
 0x484   : > { %14796 = vmatpush3.bf16.msra.mxu0 %v15136_v0 }
 0x485   : > { %14797 = vmatprep.subr.bf16.mxu0 %v15136_v0 }
 0x486   : > { %v12847_v28 = vpop.f32.mrb[96].mxu0  ;;  %14808 = vmatpush3.bf16.msra.mxu1 %v15136_v0 }
 0x487   : > { %v12848_v29 = vpop.f32.mrb[97].mxu0  ;;  %14809 = vmatprep.subr.bf16.mxu1 %v15136_v0 }
 0x488   : > { %14798 = vmatpush3.bf16.msra.mxu0 %v15136_v0  ;;  %v12849_v30 = vadd.f32 %v12848_v29, %v12847_v28 }
 0x489   : > { %13773 = vmatprep.subr.mxu0 %v15137_v1 }
 0x48a   : > { %v7601_v31 = vadd.f32 %v12849_v30, %v7600_v24  ;;  %v7822_v32 = vpop.f32.mrb[98].mxu0  ;;  %14810 = vmatpush3.bf16.msra.mxu1 %v15136_v0 }
 0x48b   : > { %9311 = vmatmul.mubr.f32.vlgmr.msra.gmra.mrb[120].mxu0 %v15137_v1  ;;  %v13717_v33 = vpop.f32.mrb[99].mxu0  ;;  %14811 = vmatprep.subr.bf16.mxu1 %v15136_v0 }
 0x48c   : > { %13774 = vmatpush3.msra.mxu0 %v15137_v1  ;;  %v7675_v34 = vadd.f32 %v7674_v52, %v7601_v31  ;;  %13775 = vmatprep.mubr.msk.f32.mxu0 %vm15139_vm2, %v15137_v1 }
 0x48d   : > { %14815 = vmatprep.subr.bf16.mxu0 %v15136_v0 }
 0x48e   : > { %14812 = vmatpush3.bf16.msra.mxu1 %v15136_v0 }
 0x48f   : > { %13776 = vmatmul.mubr.f32.vlgmr.msra.gmra.mrb[122].mxu0 %v15137_v1  ;;  %14813 = vmatprep.subr.bf16.mxu1 %v15136_v0 }
 0x490   : > { %14816 = vmatpush3.bf16.msra.mxu0 %v15136_v0  ;;  %9675 = vmatprep.mubr.f32.mxu0 %v15137_v1  ;;  %v12886_v35 = vpop.f32.mrb[100].mxu1 }
 0x491   : > { %14817 = vmatprep.subr.bf16.mxu0 %v15136_v0  ;;  %v12887_v36 = vpop.f32.mrb[101].mxu1 }
 0x492   : > { %14814 = vmatpush3.bf16.msra.mxu1 %v15136_v0  ;;  %v12888_v37 = vadd.f32 %v12887_v36, %v12886_v35 }
 0x493   : > { %14831 = vmatprep.subr.bf16.mxu1 %v15136_v0 }
 0x494   : > { %14818 = vmatpush3.bf16.msra.mxu0 %v15136_v0  ;;  %v7751_v38 = vadd.f32 %v12888_v37, %v7675_v34 }
 0x495   : > { %14819 = vmatprep.subr.bf16.mxu0 %v15136_v0  ;;  %9533 = vmatmul.mubr.f32.vlgmr.msra.gmra.mrb[124].mxu1 %v15137_v1 }
 0x496   : > { %14832 = vmatpush3.bf16.msra.mxu1 %v15136_v0  ;;  %v7823_v39 = vadd.f32 %v7822_v32, %v7751_v38  ;;  %9751 = vmatprep.mubr.f32.mxu1 %v15137_v1 }
 0x497   : > { %14833 = vmatprep.subr.bf16.mxu1 %v15136_v0 }
 0x498   : > { %14820 = vmatpush3.bf16.msra.mxu0 %v15136_v0 }
 0x499   : > { %14821 = vmatprep.subr.bf16.mxu0 %v15136_v0 }
 0x49a   : > { %14834 = vmatpush3.bf16.msra.mxu1 %v15136_v0 }
 0x49b   : > { %14835 = vmatprep.subr.bf16.mxu1 %v15136_v0 }
 0x49c   : > { %14822 = vmatpush3.bf16.msra.mxu0 %v15136_v0 }
 0x49d   : > { %14823 = vmatprep.subr.bf16.mxu0 %v15136_v0 }
 0x49e   : > { %14836 = vmatpush3.bf16.msra.mxu1 %v15136_v0 }
 0x49f   : > { %14837 = vmatprep.subr.bf16.mxu1 %v15136_v0 }
 0x4a0   : > { %14824 = vmatpush3.bf16.msra.mxu0 %v15136_v0 }
 0x4a1   : > { %14825 = vmatprep.subr.bf16.mxu0 %v15136_v0 }
 0x4a2   : > { %14838 = vmatpush3.bf16.msra.mxu1 %v15136_v0 }
 0x4a3   : > { %14839 = vmatprep.subr.bf16.mxu1 %v15136_v0 }
 0x4a4   : > { %14826 = vmatpush3.bf16.msra.mxu0 %v15136_v0 }
 0x4a5   : > { %14827 = vmatprep.subr.bf16.mxu0 %v15136_v0 }
 0x4a6   : > { %14840 = vmatpush3.bf16.msra.mxu1 %v15136_v0 }
 0x4a7   : > { %14841 = vmatprep.subr.bf16.mxu1 %v15136_v0 }
 0x4a8   : > { %14828 = vmatpush3.bf16.msra.mxu0 %v15136_v0 }
 0x4a9   : > { %14829 = vmatprep.subr.bf16.mxu0 %v15136_v0 }
 0x4aa   : > { %v12923_v40 = vpop.f32.mrb[100].mxu0  ;;  %14842 = vmatpush3.bf16.msra.mxu1 %v15136_v0 }
 0x4ab   : > { %v12924_v41 = vpop.f32.mrb[101].mxu0  ;;  %14843 = vmatprep.subr.bf16.mxu1 %v15136_v0 }
 0x4ac   : > { %14830 = vmatpush3.bf16.msra.mxu0 %v15136_v0  ;;  %v12925_v42 = vadd.f32 %v12924_v41, %v12923_v40 }
 0x4ad   : > { %13778 = vmatprep.subr.mxu0 %v15137_v1 }
 0x4ae   : > { %v7895_v43 = vadd.f32 %v12925_v42, %v7823_v39  ;;  %v8046_v44 = vpop.f32.mrb[102].mxu0  ;;  %14844 = vmatpush3.bf16.msra.mxu1 %v15136_v0 }
 0x4af   : > { %9677 = vmatmul.mubr.f32.vlgmr.msra.gmra.mrb[124].mxu0 %v15137_v1  ;;  %v13722_v45 = vpop.f32.mrb[103].mxu0  ;;  %14845 = vmatprep.subr.bf16.mxu1 %v15136_v0 }
 0x4b0   : > { %13779 = vmatpush3.msra.mxu0 %v15137_v1  ;;  %13780 = vmatprep.mubr.msk.f32.mxu0 %vm15139_vm2, %v15137_v1  ;;  %v12958_v49 = vpop.f32.mrb[102].mxu1 }
 0x4b1   : > { %13783 = vmatprep.subr.mxu0 %v15137_v1  ;;  %v12959_v50 = vpop.f32.mrb[103].mxu1 }
 0x4b2   : > { %v8120_v47 = vpop.f32.mrb[104].mxu0  ;;  %14846 = vmatpush3.bf16.msra.mxu1 %v15136_v0  ;;  %v12960_v51 = vadd.f32 %v12959_v50, %v12958_v49 }
 0x4b3   : > { %13781 = vmatmul.mubr.f32.vlgmr.msra.gmra.mrb[126].mxu0 %v15137_v1  ;;  %v13727_v48 = vpop.f32.mrb[105].mxu0  ;;  %13788 = vmatprep.subr.mxu1 %v15137_v1 }
 0x4b4   : > { %13784 = vmatpush3.msra.mxu0 %v15137_v1  ;;  %13785 = vmatprep.mubr.msk.f32.mxu0 %vm15139_vm2, %v15137_v1  ;;  %v7975_v53 = vadd.f32 %v12960_v51, %v7895_v43  ;;  %v8268_v54 = vpop.f32.mrb[104].mxu1 }
 0x4b5   : > { %14847 = vmatprep.subr.bf16.mxu0 %v15136_v0  ;;  %9757 = vmatmul.mubr.f32.vlgmr.msra.gmra.mrb[126].mxu1 %v15137_v1  ;;  %v13732_v55 = vpop.f32.mrb[105].mxu1 }
 0x4b6   : > { %v8047_v56 = vadd.f32 %v8046_v44, %v7975_v53  ;;  %13789 = vmatpush3.msra.mxu1 %v15137_v1  ;;  %13790 = vmatprep.mubr.msk.f32.mxu1 %vm15139_vm2, %v15137_v1 }
 0x4b7   : > { %13786 = vmatmul.mubr.f32.vlgmr.msra.gmra.mrb[128].mxu0 %v15137_v1  ;;  %14863 = vmatprep.subr.bf16.mxu1 %v15136_v0 }
 0x4b8   : > { %14848 = vmatpush3.bf16.msra.mxu0 %v15136_v0  ;;  %9975 = vmatprep.mubr.f32.mxu0 %v15137_v1  ;;  %v8121_v57 = vadd.f32 %v8120_v47, %v8047_v56 }
 0x4b9   : > { %14849 = vmatprep.subr.bf16.mxu0 %v15136_v0  ;;  %13791 = vmatmul.mubr.f32.vlgmr.msra.gmra.mrb[128].mxu1 %v15137_v1 }
 0x4ba   : > { %14864 = vmatpush3.bf16.msra.mxu1 %v15136_v0  ;;  %10121 = vmatprep.mubr.f32.mxu1 %v15137_v1 }
 0x4bb   : > { %14865 = vmatprep.subr.bf16.mxu1 %v15136_v0 }
 0x4bc   : > { %14850 = vmatpush3.bf16.msra.mxu0 %v15136_v0 }
 0x4bd   : > { %14851 = vmatprep.subr.bf16.mxu0 %v15136_v0 }
 0x4be   : > { %14866 = vmatpush3.bf16.msra.mxu1 %v15136_v0 }
 0x4bf   : > { %14867 = vmatprep.subr.bf16.mxu1 %v15136_v0 }
 0x4c0   : > { %14852 = vmatpush3.bf16.msra.mxu0 %v15136_v0 }
 0x4c1   : > { %14853 = vmatprep.subr.bf16.mxu0 %v15136_v0 }
 0x4c2   : > { %14868 = vmatpush3.bf16.msra.mxu1 %v15136_v0 }
 0x4c3   : > { %14869 = vmatprep.subr.bf16.mxu1 %v15136_v0 }
 0x4c4   : > { %14854 = vmatpush3.bf16.msra.mxu0 %v15136_v0 }
 0x4c5   : > { %14855 = vmatprep.subr.bf16.mxu0 %v15136_v0 }
 0x4c6   : > { %14870 = vmatpush3.bf16.msra.mxu1 %v15136_v0 }
 0x4c7   : > { %14871 = vmatprep.subr.bf16.mxu1 %v15136_v0 }
 0x4c8   : > { %14856 = vmatpush3.bf16.msra.mxu0 %v15136_v0 }
 0x4c9   : > { %14857 = vmatprep.subr.bf16.mxu0 %v15136_v0 }
 0x4ca   : > { %14872 = vmatpush3.bf16.msra.mxu1 %v15136_v0 }
 0x4cb   : > { %14873 = vmatprep.subr.bf16.mxu1 %v15136_v0 }
 0x4cc   : > { %14858 = vmatpush3.bf16.msra.mxu0 %v15136_v0 }
 0x4cd   : > { %14859 = vmatprep.subr.bf16.mxu0 %v15136_v0 }
 0x4ce   : > { %14874 = vmatpush3.bf16.msra.mxu1 %v15136_v0 }
 0x4cf   : > { %14875 = vmatprep.subr.bf16.mxu1 %v15136_v0 }
 0x4d0   : > { %14860 = vmatpush3.bf16.msra.mxu0 %v15136_v0 }
 0x4d1   : > { %14861 = vmatprep.subr.bf16.mxu0 %v15136_v0 }
 0x4d2   : > { %v12997_v58 = vpop.f32.mrb[106].mxu0  ;;  %14876 = vmatpush3.bf16.msra.mxu1 %v15136_v0 }
 0x4d3   : > { %v12998_v59 = vpop.f32.mrb[107].mxu0  ;;  %14877 = vmatprep.subr.bf16.mxu1 %v15136_v0 }
 0x4d4   : > { %14862 = vmatpush3.bf16.msra.mxu0 %v15136_v0  ;;  %v12999_v46 = vadd.f32 %v12998_v59, %v12997_v58  ;;  %v13034_v62 = vpop.f32.mrb[106].mxu1 }
 0x4d5   : > { %14879 = vmatprep.subr.bf16.mxu0 %v15136_v0  ;;  %v13035_v63 = vpop.f32.mrb[107].mxu1 }
 0x4d6   : > { %v8197_v60 = vadd.f32 %v12999_v46, %v8121_v57  ;;  %14878 = vmatpush3.bf16.msra.mxu1 %v15136_v0  ;;  %v13036_v2 = vadd.f32 %v13035_v63, %v13034_v62 }
 0x4d7   : > { %9979 = vmatmul.mubr.f32.vlgmr.msra.gmra.mrb[130].mxu0 %v15137_v1  ;;  %13793 = vmatprep.subr.mxu1 %v15137_v1 }
 0x4d8   : > { %14880 = vmatpush3.bf16.msra.mxu0 %v15136_v0  ;;  %v8269_v61 = vadd.f32 %v8268_v54, %v8197_v60  ;;  %10197 = vmatprep.mubr.f32.mxu0 %v15137_v1  ;;  %v8492_v4 = vpop.f32.mrb[108].mxu1 }
 0x4d9   : > { %14881 = vmatprep.subr.bf16.mxu0 %v15136_v0  ;;  %10123 = vmatmul.mubr.f32.vlgmr.msra.gmra.mrb[130].mxu1 %v15137_v1  ;;  %v13737_v5 = vpop.f32.mrb[109].mxu1 }
 0x4da   : > { %v8341_v3 = vadd.f32 %v13036_v2, %v8269_v61  ;;  %13794 = vmatpush3.msra.mxu1 %v15137_v1  ;;  %13795 = vmatprep.mubr.msk.f32.mxu1 %vm15139_vm2, %v15137_v1 }
 0x4db   : > { %13798 = vmatprep.subr.mxu1 %v15137_v1 }
 0x4dc   : > { %14882 = vmatpush3.bf16.msra.mxu0 %v15136_v0  ;;  %v8566_v6 = vpop.f32.mrb[110].mxu1 }
 0x4dd   : > { %14883 = vmatprep.subr.bf16.mxu0 %v15136_v0  ;;  %13796 = vmatmul.mubr.f32.vlgmr.msra.gmra.mrb[132].mxu1 %v15137_v1  ;;  %v13742_v7 = vpop.f32.mrb[111].mxu1 }
 0x4de   : > { %13799 = vmatpush3.msra.mxu1 %v15137_v1  ;;  %13800 = vmatprep.mubr.msk.f32.mxu1 %vm15139_vm2, %v15137_v1 }
 0x4df   : > { %14895 = vmatprep.subr.bf16.mxu1 %v15136_v0 }
 0x4e0   : > { %14884 = vmatpush3.bf16.msra.mxu0 %v15136_v0 }
 0x4e1   : > { %14885 = vmatprep.subr.bf16.mxu0 %v15136_v0  ;;  %13801 = vmatmul.mubr.f32.vlgmr.msra.gmra.mrb[134].mxu1 %v15137_v1 }
 0x4e2   : > { %14896 = vmatpush3.bf16.msra.mxu1 %v15136_v0  ;;  %10421 = vmatprep.mubr.f32.mxu1 %v15137_v1 }
 0x4e3   : > { %14897 = vmatprep.subr.bf16.mxu1 %v15136_v0 }
 0x4e4   : > { %14886 = vmatpush3.bf16.msra.mxu0 %v15136_v0 }
 0x4e5   : > { %14887 = vmatprep.subr.bf16.mxu0 %v15136_v0 }
 0x4e6   : > { %14898 = vmatpush3.bf16.msra.mxu1 %v15136_v0 }
 0x4e7   : > { %14899 = vmatprep.subr.bf16.mxu1 %v15136_v0 }
 0x4e8   : > { %14888 = vmatpush3.bf16.msra.mxu0 %v15136_v0 }
 0x4e9   : > { %14889 = vmatprep.subr.bf16.mxu0 %v15136_v0 }
 0x4ea   : > { %14900 = vmatpush3.bf16.msra.mxu1 %v15136_v0 }
 0x4eb   : > { %14901 = vmatprep.subr.bf16.mxu1 %v15136_v0 }
 0x4ec   : > { %14890 = vmatpush3.bf16.msra.mxu0 %v15136_v0 }
 0x4ed   : > { %14891 = vmatprep.subr.bf16.mxu0 %v15136_v0 }
 0x4ee   : > { %14902 = vmatpush3.bf16.msra.mxu1 %v15136_v0 }
 0x4ef   : > { %14903 = vmatprep.subr.bf16.mxu1 %v15136_v0 }
 0x4f0   : > { %14892 = vmatpush3.bf16.msra.mxu0 %v15136_v0 }
 0x4f1   : > { %14893 = vmatprep.subr.bf16.mxu0 %v15136_v0 }
 0x4f2   : > { %v13069_v8 = vpop.f32.mrb[108].mxu0  ;;  %14904 = vmatpush3.bf16.msra.mxu1 %v15136_v0 }
 0x4f3   : > { %v13070_v9 = vpop.f32.mrb[109].mxu0  ;;  %14905 = vmatprep.subr.bf16.mxu1 %v15136_v0 }
 0x4f4   : > { %14894 = vmatpush3.bf16.msra.mxu0 %v15136_v0  ;;  %v13071_v10 = vadd.f32 %v13070_v9, %v13069_v8 }
 0x4f5   : > { %13803 = vmatprep.subr.mxu0 %v15137_v1 }
 0x4f6   : > { %v8421_v11 = vadd.f32 %v13071_v10, %v8341_v3  ;;  %v8714_v12 = vpop.f32.mrb[110].mxu0  ;;  %14906 = vmatpush3.bf16.msra.mxu1 %v15136_v0 }
 0x4f7   : > { %10203 = vmatmul.mubr.f32.vlgmr.msra.gmra.mrb[132].mxu0 %v15137_v1  ;;  %v13747_v13 = vpop.f32.mrb[111].mxu0  ;;  %14907 = vmatprep.subr.bf16.mxu1 %v15136_v0 }
 0x4f8   : > { %v8493_v14 = vadd.f32 %v8492_v4, %v8421_v11  ;;  %13804 = vmatpush3.msra.mxu0 %v15137_v1  ;;  %13805 = vmatprep.mubr.msk.f32.mxu0 %vm15139_vm2, %v15137_v1 }
 0x4f9   : > { %14911 = vmatprep.subr.bf16.mxu0 %v15136_v0 }
 0x4fa   : > { %v8567_v15 = vadd.f32 %v8566_v6, %v8493_v14  ;;  %14908 = vmatpush3.bf16.msra.mxu1 %v15136_v0 }
 0x4fb   : > { %13806 = vmatmul.mubr.f32.vlgmr.msra.gmra.mrb[134].mxu0 %v15137_v1  ;;  %14909 = vmatprep.subr.bf16.mxu1 %v15136_v0 }
 0x4fc   : > { %14912 = vmatpush3.bf16.msra.mxu0 %v15136_v0  ;;  %10567 = vmatprep.mubr.f32.mxu0 %v15137_v1  ;;  %v13108_v16 = vpop.f32.mrb[112].mxu1 }
 0x4fd   : > { %14913 = vmatprep.subr.bf16.mxu0 %v15136_v0  ;;  %v13109_v17 = vpop.f32.mrb[113].mxu1 }
 0x4fe   : > { %14910 = vmatpush3.bf16.msra.mxu1 %v15136_v0  ;;  %v13110_v18 = vadd.f32 %v13109_v17, %v13108_v16 }
 0x4ff   : > { %14927 = vmatprep.subr.bf16.mxu1 %v15136_v0 }
 0x500   : > { %14914 = vmatpush3.bf16.msra.mxu0 %v15136_v0  ;;  %v8643_v19 = vadd.f32 %v13110_v18, %v8567_v15 }
 0x501   : > { %14915 = vmatprep.subr.bf16.mxu0 %v15136_v0  ;;  %10425 = vmatmul.mubr.f32.vlgmr.msra.gmra.mrb[136].mxu1 %v15137_v1 }
 0x502   : > { %14928 = vmatpush3.bf16.msra.mxu1 %v15136_v0  ;;  %v8715_v20 = vadd.f32 %v8714_v12, %v8643_v19  ;;  %10643 = vmatprep.mubr.f32.mxu1 %v15137_v1 }
 0x503   : > { %14929 = vmatprep.subr.bf16.mxu1 %v15136_v0 }
 0x504   : > { %14916 = vmatpush3.bf16.msra.mxu0 %v15136_v0 }
 0x505   : > { %14917 = vmatprep.subr.bf16.mxu0 %v15136_v0 }
 0x506   : > { %14930 = vmatpush3.bf16.msra.mxu1 %v15136_v0 }
 0x507   : > { %14931 = vmatprep.subr.bf16.mxu1 %v15136_v0 }
 0x508   : > { %14918 = vmatpush3.bf16.msra.mxu0 %v15136_v0 }
 0x509   : > { %14919 = vmatprep.subr.bf16.mxu0 %v15136_v0 }
 0x50a   : > { %14932 = vmatpush3.bf16.msra.mxu1 %v15136_v0 }
 0x50b   : > { %14933 = vmatprep.subr.bf16.mxu1 %v15136_v0 }
 0x50c   : > { %14920 = vmatpush3.bf16.msra.mxu0 %v15136_v0 }
 0x50d   : > { %14921 = vmatprep.subr.bf16.mxu0 %v15136_v0 }
 0x50e   : > { %14934 = vmatpush3.bf16.msra.mxu1 %v15136_v0 }
 0x50f   : > { %14935 = vmatprep.subr.bf16.mxu1 %v15136_v0 }
 0x510   : > { %14922 = vmatpush3.bf16.msra.mxu0 %v15136_v0 }
 0x511   : > { %14923 = vmatprep.subr.bf16.mxu0 %v15136_v0 }
 0x512   : > { %14936 = vmatpush3.bf16.msra.mxu1 %v15136_v0 }
 0x513   : > { %14937 = vmatprep.subr.bf16.mxu1 %v15136_v0 }
 0x514   : > { %14924 = vmatpush3.bf16.msra.mxu0 %v15136_v0 }
 0x515   : > { %14925 = vmatprep.subr.bf16.mxu0 %v15136_v0 }
 0x516   : > { %v13145_v21 = vpop.f32.mrb[112].mxu0  ;;  %14938 = vmatpush3.bf16.msra.mxu1 %v15136_v0 }
 0x517   : > { %v13146_v22 = vpop.f32.mrb[113].mxu0  ;;  %14939 = vmatprep.subr.bf16.mxu1 %v15136_v0 }
 0x518   : > { %14926 = vmatpush3.bf16.msra.mxu0 %v15136_v0  ;;  %v13147_v23 = vadd.f32 %v13146_v22, %v13145_v21 }
 0x519   : > { %13808 = vmatprep.subr.mxu0 %v15137_v1 }
 0x51a   : > { %v8787_v24 = vadd.f32 %v13147_v23, %v8715_v20  ;;  %v8938_v25 = vpop.f32.mrb[114].mxu0  ;;  %14940 = vmatpush3.bf16.msra.mxu1 %v15136_v0 }
 0x51b   : > { %10569 = vmatmul.mubr.f32.vlgmr.msra.gmra.mrb[136].mxu0 %v15137_v1  ;;  %v13752_v26 = vpop.f32.mrb[115].mxu0  ;;  %14941 = vmatprep.subr.bf16.mxu1 %v15136_v0 }
 0x51c   : > { %13809 = vmatpush3.msra.mxu0 %v15137_v1  ;;  %13810 = vmatprep.mubr.msk.f32.mxu0 %vm15139_vm2, %v15137_v1  ;;  %v13180_v28 = vpop.f32.mrb[114].mxu1 }
 0x51d   : > { %13813 = vmatprep.subr.mxu0 %v15137_v1  ;;  %v13181_v29 = vpop.f32.mrb[115].mxu1 }
 0x51e   : > { %v9012_v52 = vpop.f32.mrb[116].mxu0  ;;  %14942 = vmatpush3.bf16.msra.mxu1 %v15136_v0  ;;  %v13182_v30 = vadd.f32 %v13181_v29, %v13180_v28 }
 0x51f   : > { %13811 = vmatmul.mubr.f32.vlgmr.msra.gmra.mrb[138].mxu0 %v15137_v1  ;;  %v13757_v27 = vpop.f32.mrb[117].mxu0  ;;  %13818 = vmatprep.subr.mxu1 %v15137_v1 }
 0x520   : > { %13814 = vmatpush3.msra.mxu0 %v15137_v1  ;;  %13815 = vmatprep.mubr.msk.f32.mxu0 %vm15139_vm2, %v15137_v1  ;;  %v8867_v31 = vadd.f32 %v13182_v30, %v8787_v24  ;;  %v9160_v32 = vpop.f32.mrb[116].mxu1 }
 0x521   : > { %14943 = vmatprep.subr.bf16.mxu0 %v15136_v0  ;;  %10649 = vmatmul.mubr.f32.vlgmr.msra.gmra.mrb[138].mxu1 %v15137_v1  ;;  %v13762_v33 = vpop.f32.mrb[117].mxu1 }
 0x522   : > { %v8939_v34 = vadd.f32 %v8938_v25, %v8867_v31  ;;  %13819 = vmatpush3.msra.mxu1 %v15137_v1  ;;  %13820 = vmatprep.mubr.msk.f32.mxu1 %vm15139_vm2, %v15137_v1 }
 0x523   : > { %13816 = vmatmul.mubr.f32.vlgmr.msra.gmra.mrb[140].mxu0 %v15137_v1  ;;  %14959 = vmatprep.subr.bf16.mxu1 %v15136_v0 }
 0x524   : > { %14944 = vmatpush3.bf16.msra.mxu0 %v15136_v0  ;;  %10867 = vmatprep.mubr.f32.mxu0 %v15137_v1  ;;  %v9013_v35 = vadd.f32 %v9012_v52, %v8939_v34 }
 0x525   : > { %14945 = vmatprep.subr.bf16.mxu0 %v15136_v0  ;;  %13821 = vmatmul.mubr.f32.vlgmr.msra.gmra.mrb[140].mxu1 %v15137_v1 }
 0x526   : > { %14960 = vmatpush3.bf16.msra.mxu1 %v15136_v0  ;;  %11013 = vmatprep.mubr.f32.mxu1 %v15137_v1 }
 0x527   : > { %14961 = vmatprep.subr.bf16.mxu1 %v15136_v0 }
 0x528   : > { %14946 = vmatpush3.bf16.msra.mxu0 %v15136_v0 }
 0x529   : > { %14947 = vmatprep.subr.bf16.mxu0 %v15136_v0 }
 0x52a   : > { %14962 = vmatpush3.bf16.msra.mxu1 %v15136_v0 }
 0x52b   : > { %14963 = vmatprep.subr.bf16.mxu1 %v15136_v0 }
 0x52c   : > { %14948 = vmatpush3.bf16.msra.mxu0 %v15136_v0 }
 0x52d   : > { %14949 = vmatprep.subr.bf16.mxu0 %v15136_v0 }
 0x52e   : > { %14964 = vmatpush3.bf16.msra.mxu1 %v15136_v0 }
 0x52f   : > { %14965 = vmatprep.subr.bf16.mxu1 %v15136_v0 }
 0x530   : > { %14950 = vmatpush3.bf16.msra.mxu0 %v15136_v0 }
 0x531   : > { %14951 = vmatprep.subr.bf16.mxu0 %v15136_v0 }
 0x532   : > { %14966 = vmatpush3.bf16.msra.mxu1 %v15136_v0 }
 0x533   : > { %14967 = vmatprep.subr.bf16.mxu1 %v15136_v0 }
 0x534   : > { %14952 = vmatpush3.bf16.msra.mxu0 %v15136_v0 }
 0x535   : > { %14953 = vmatprep.subr.bf16.mxu0 %v15136_v0 }
 0x536   : > { %14968 = vmatpush3.bf16.msra.mxu1 %v15136_v0 }
 0x537   : > { %14969 = vmatprep.subr.bf16.mxu1 %v15136_v0 }
 0x538   : > { %14954 = vmatpush3.bf16.msra.mxu0 %v15136_v0 }
 0x539   : > { %14955 = vmatprep.subr.bf16.mxu0 %v15136_v0 }
 0x53a   : > { %14970 = vmatpush3.bf16.msra.mxu1 %v15136_v0 }
 0x53b   : > { %14971 = vmatprep.subr.bf16.mxu1 %v15136_v0 }
 0x53c   : > { %14956 = vmatpush3.bf16.msra.mxu0 %v15136_v0 }
 0x53d   : > { %14957 = vmatprep.subr.bf16.mxu0 %v15136_v0 }
 0x53e   : > { %v13219_v36 = vpop.f32.mrb[118].mxu0  ;;  %14972 = vmatpush3.bf16.msra.mxu1 %v15136_v0 }
 0x53f   : > { %v13220_v37 = vpop.f32.mrb[119].mxu0  ;;  %14973 = vmatprep.subr.bf16.mxu1 %v15136_v0 }
 0x540   : > { %14958 = vmatpush3.bf16.msra.mxu0 %v15136_v0  ;;  %v13221_v38 = vadd.f32 %v13220_v37, %v13219_v36  ;;  %v13256_v41 = vpop.f32.mrb[118].mxu1 }
 0x541   : > { %v13257_v42 = vpop.f32.mrb[119].mxu1 }
 0x542   : > { %v9089_v39 = vadd.f32 %v13221_v38, %v9013_v35  ;;  %14974 = vmatpush3.bf16.msra.mxu1 %v15136_v0  ;;  %v13258_v43 = vadd.f32 %v13257_v42, %v13256_v41 }
 0x543   : > { %10871 = vmatmul.mubr.f32.vlgmr.msra.gmra.mrb[142].mxu0 %v15137_v1 }
 0x544   : > { %v9161_v40 = vadd.f32 %v9160_v32, %v9089_v39  ;;  %v9384_v45 = vpop.f32.mrb[120].mxu1 }
 0x545   : > { %11015 = vmatmul.mubr.f32.vlgmr.msra.gmra.mrb[142].mxu1 %v15137_v1  ;;  %v13767_v47 = vpop.f32.mrb[121].mxu1 }
 0x546   : > { %v9233_v44 = vadd.f32 %v13258_v43, %v9161_v40 }
 0x548   : > { %v9458_v48 = vpop.f32.mrb[122].mxu1 }
 0x549   : > { %v13772_v49 = vpop.f32.mrb[123].mxu1 }
 0x55e   : > { %v13291_v50 = vpop.f32.mrb[120].mxu0 }
 0x55f   : > { %v13292_v51 = vpop.f32.mrb[121].mxu0 }
 0x560   : > { %v13293_v53 = vadd.f32 %v13292_v51, %v13291_v50 }
 0x562   : > { %v9313_v54 = vadd.f32 %v13293_v53, %v9233_v44  ;;  %v9606_v55 = vpop.f32.mrb[122].mxu0 }
 0x563   : > { %v13777_v56 = vpop.f32.mrb[123].mxu0 }
 0x564   : > { %v9385_v57 = vadd.f32 %v9384_v45, %v9313_v54 }
 0x566   : > { %v9459_v58 = vadd.f32 %v9458_v48, %v9385_v57 }
 0x568   : > { %v13330_v59 = vpop.f32.mrb[124].mxu1 }
 0x569   : > { %v13331_v46 = vpop.f32.mrb[125].mxu1 }
 0x56a   : > { %v13332_v60 = vadd.f32 %v13331_v46, %v13330_v59 }
 0x56c   : > { %v9535_v0 = vadd.f32 %v13332_v60, %v9459_v58 }
 0x56e   : > { %v9607_v61 = vadd.f32 %v9606_v55, %v9535_v0 }
 0x582   : > { %v13367_v62 = vpop.f32.mrb[124].mxu0 }
 0x583   : > { %v13368_v63 = vpop.f32.mrb[125].mxu0 }
 0x584   : > { %v13369_v2 = vadd.f32 %v13368_v63, %v13367_v62 }
 0x586   : > { %v9679_v1 = vadd.f32 %v13369_v2, %v9607_v61  ;;  %v9830_v3 = vpop.f32.mrb[126].mxu0 }
 0x587   : > { %v13782_v4 = vpop.f32.mrb[127].mxu0 }
 0x588   : > { %v13402_v7 = vpop.f32.mrb[126].mxu1 }
 0x589   : > { %v13403_v8 = vpop.f32.mrb[127].mxu1 }
 0x58a   : > { %v9904_v5 = vpop.f32.mrb[128].mxu0  ;;  %v13404_v9 = vadd.f32 %v13403_v8, %v13402_v7 }
 0x58b   : > { %v13787_v6 = vpop.f32.mrb[129].mxu0 }
 0x58c   : > { %v9759_v10 = vadd.f32 %v13404_v9, %v9679_v1  ;;  %v10052_v11 = vpop.f32.mrb[128].mxu1  ;;  %v11023_v1 = vld [vmem:[#allocation3] sm:$0xff] }
 0x58d   : > { %v13792_v12 = vpop.f32.mrb[129].mxu1  ;;  %v11024_v4 = vmul.f32 0.8999511, %v11023_v1 }
 0x58e   : > { %v9831_v13 = vadd.f32 %v9830_v3, %v9759_v10  ;;  %v11021_v3 = vld [vmem:[#allocation2] sm:$0xff] }
 0x58f   : > { %v15052_v10 = vld [vmem:[%s15508_s28] sm:$0xff] }
 0x590   : > { %v9905_v14 = vadd.f32 %v9904_v5, %v9831_v13  ;;  %v11022_v5 = vmul.f32 4.8875856e-05, %v11021_v3  ;;  %vm11030_vm3 = vcmp.eq.s32.totalorder %v15052_v10, 0 }
 0x592   : > { %v11025_v7 = vadd.f32 %v11024_v4, %v11022_v5 }
 0x5aa   : > { %v13441_v15 = vpop.f32.mrb[130].mxu0 }
 0x5ab   : > { %v13442_v16 = vpop.f32.mrb[131].mxu0 }
 0x5ac   : > { %v13443_v17 = vadd.f32 %v13442_v16, %v13441_v15  ;;  %v13478_v20 = vpop.f32.mrb[130].mxu1 }
 0x5ad   : > { %v13479_v21 = vpop.f32.mrb[131].mxu1 }
 0x5ae   : > { %v9981_v18 = vadd.f32 %v13443_v17, %v9905_v14  ;;  %v13480_v22 = vadd.f32 %v13479_v21, %v13478_v20 }
 0x5b0   : > { %v10053_v19 = vadd.f32 %v10052_v11, %v9981_v18  ;;  %v10276_v24 = vpop.f32.mrb[132].mxu1 }
 0x5b1   : > { %v13797_v25 = vpop.f32.mrb[133].mxu1 }
 0x5b2   : > { %v10125_v23 = vadd.f32 %v13480_v22, %v10053_v19 }
 0x5b4   : > { %v10350_v26 = vpop.f32.mrb[134].mxu1 }
 0x5b5   : > { %v13802_v52 = vpop.f32.mrb[135].mxu1 }
 0x5ca   : > { %v13513_v27 = vpop.f32.mrb[132].mxu0 }
 0x5cb   : > { %v13514_v28 = vpop.f32.mrb[133].mxu0 }
 0x5cc   : > { %v13515_v29 = vadd.f32 %v13514_v28, %v13513_v27 }
 0x5ce   : > { %v10205_v30 = vadd.f32 %v13515_v29, %v10125_v23  ;;  %v10498_v31 = vpop.f32.mrb[134].mxu0 }
 0x5cf   : > { %v13807_v32 = vpop.f32.mrb[135].mxu0 }
 0x5d0   : > { %v10277_v33 = vadd.f32 %v10276_v24, %v10205_v30 }
 0x5d2   : > { %v10351_v34 = vadd.f32 %v10350_v26, %v10277_v33 }
 0x5d4   : > { %v13552_v35 = vpop.f32.mrb[136].mxu1 }
 0x5d5   : > { %v13553_v36 = vpop.f32.mrb[137].mxu1 }
 0x5d6   : > { %v13554_v37 = vadd.f32 %v13553_v36, %v13552_v35 }
 0x5d8   : > { %v10427_v38 = vadd.f32 %v13554_v37, %v10351_v34 }
 0x5da   : > { %v10499_v39 = vadd.f32 %v10498_v31, %v10427_v38 }
 0x5ee   : > { %v13589_v40 = vpop.f32.mrb[136].mxu0 }
 0x5ef   : > { %v13590_v41 = vpop.f32.mrb[137].mxu0 }
 0x5f0   : > { %v13591_v42 = vadd.f32 %v13590_v41, %v13589_v40 }
 0x5f2   : > { %v10571_v43 = vadd.f32 %v13591_v42, %v10499_v39  ;;  %v10722_v44 = vpop.f32.mrb[138].mxu0 }
 0x5f3   : > { %v13812_v45 = vpop.f32.mrb[139].mxu0 }
 0x5f4   : > { %v13624_v49 = vpop.f32.mrb[138].mxu1 }
 0x5f5   : > { %v13625_v50 = vpop.f32.mrb[139].mxu1 }
 0x5f6   : > { %v10796_v47 = vpop.f32.mrb[140].mxu0  ;;  %v13626_v51 = vadd.f32 %v13625_v50, %v13624_v49 }
 0x5f7   : > { %v13817_v48 = vpop.f32.mrb[141].mxu0 }
 0x5f8   : > { %v10651_v53 = vadd.f32 %v13626_v51, %v10571_v43  ;;  %v10944_v54 = vpop.f32.mrb[140].mxu1 }
 0x5f9   : > { %v13822_v55 = vpop.f32.mrb[141].mxu1 }
 0x5fa   : > { %v10723_v56 = vadd.f32 %v10722_v44, %v10651_v53 }
 0x5fc   : > { %v10797_v57 = vadd.f32 %v10796_v47, %v10723_v56 }
 0x616   : > { %v13663_v58 = vpop.f32.mrb[142].mxu0 }
 0x617   : > { %v13664_v59 = vpop.f32.mrb[143].mxu0 }
 0x618   : > { %v13665_v46 = vadd.f32 %v13664_v59, %v13663_v58  ;;  %v13700_v61 = vpop.f32.mrb[142].mxu1 }
 0x619   : > { %v13701_v62 = vpop.f32.mrb[143].mxu1 }
 0x61a   : > { %v10873_v60 = vadd.f32 %v13665_v46, %v10797_v57  ;;  %v13702_v63 = vadd.f32 %v13701_v62, %v13700_v61 }
 0x61c   : > { %v10945_v0 = vadd.f32 %v10944_v54, %v10873_v60 }
 0x61e   : > { %v11017_v2 = vadd.f32 %v13702_v63, %v10945_v0 }
 0x620   : > { %11020 = vst.msk [vmem:[#allocation4] sm:$0xff] %vm198_vm5, %v11017_v2 }
 0x627   : > { %v11026_v6 = vld [vmem:[#allocation4] sm:$0xff] }
 0x628   : > { %v11027_v8 = vmul.f32 4.8875856e-05, %v11026_v6 }
 0x62a   : > { %v11028_v9 = vsub.f32 %v11025_v7, %v11027_v8 }
 0x62c   : > { %v11029_v11 = vsub.f32 -1.0874472, %v11028_v9 }
 0x62e   : > { %v11031_v12 = vsel %vm11030_vm3, 0.0, %v11029_v11 }
 0x62f   : > { %11032 = vst.msk [vmem:[%s193_s3] sm:$0xff] %vm198_vm5, %v11031_v12 }
 0x630 PF: > { %s15_s14 = sadd.s32 1, %s15133_s14   ;;  %s17148_s9 = smov %s15117_s10 }
 0x631   : > { %p12_p9 = scmp.ge.s32.totalorder %s15_s14, 4   ;;  %s17149_s10 = smov %s15121_s11 }
 0x632   : > { %s17150_s11 = smov %s15204_s21  ;;  %s17151_s12 = smov %s15129_s13 }
 0x633   : > { %s17152_s13 = smov %s17154_s16  ;;  %14 = sbr.rel (!%p12_p9) target bundleno = 4 (0x4), region = 79 }
 0x63a   :  { %11052 = vsyncpa [#allocation6], 1 }
 0x63b   :  { %11054 = vsyncpa [#allocation6 + $0x1], 1 }

</bundles_post_ra>
